<compile_context>
chip_gen: v5e
topology: v5e:2x2
jax: 0.10.0
libtpu: 0.0.40
codegen_flags: <defaults>
</compile_context>

<pallas_src>
import functools

import jax
import jax.numpy as jnp
import numpy as np
from jax import lax
from jax.experimental import pallas as pl
from jax.experimental.pallas import tpu as pltpu


def _dot(a, b, precision):
    return jnp.dot(a, b, preferred_element_type=jnp.float32, precision=precision)


# --- 3-multiply (Karatsuba) complex matmuls --------------------------------
# The DFT operand always supplies a precomputed sum (re+im) or diff (re-im)
# matrix, so each complex product costs exactly 3 real MXU matmuls and no
# operand negation is ever materialised in the kernel.

def _cmm_dft_lhs(fr, fi, fs, br, bi, precision):
    """(fr + i*fi) @ (br + i*bi), with fs = fr + fi precomputed."""
    p1 = _dot(fr, br, precision)
    p2 = _dot(fi, bi, precision)
    p3 = _dot(fs, br + bi, precision)
    return p1 - p2, p3 - p1 - p2


def _cmm_dft_lhs_conj(fr, fi, fd, br, bi, precision):
    """conj(fr + i*fi) @ (br + i*bi), with fd = fr - fi precomputed."""
    p1 = _dot(fr, br, precision)
    p2 = _dot(fi, bi, precision)
    p3 = _dot(fd, br + bi, precision)
    return p1 + p2, p3 - p1 + p2


def _cmm_dft_rhs(ar, ai, fr, fi, fs, precision):
    """(ar + i*ai) @ (fr + i*fi), with fs = fr + fi precomputed."""
    p1 = _dot(ar, fr, precision)
    p2 = _dot(ai, fi, precision)
    p3 = _dot(ar + ai, fs, precision)
    return p1 - p2, p3 - p1 - p2


def _cmm_dft_rhs_conj(ar, ai, fr, fi, fd, precision):
    """(ar + i*ai) @ conj(fr + i*fi), with fd = fr - fi precomputed."""
    p1 = _dot(ar, fr, precision)
    p2 = _dot(ai, fi, precision)
    p3 = _dot(ar + ai, fd, precision)
    return p1 + p2, p3 - p1 + p2


def make_ata_kernel(lam, Cc, H, W, precision):
    lam = float(lam)

    def ata_kernel(im_re_ref, im_im_ref, csm_re_ref, csm_im_ref, m2_ref,
                   fh_re_ref, fh_im_ref, fh_sum_ref, fh_dif_ref,
                   fw_re_ref, fw_im_ref, fw_sum_ref, fw_dif_ref,
                   out_re_ref, out_im_ref,
                   st_re_ref, st_im_ref):
        cc = pl.program_id(1)                 # coil-chunk index (innermost axis)

        xr = im_re_ref[0]                     # (H, W)
        xi = im_im_ref[0]
        fhr = fh_re_ref[...]
        fhi = fh_im_ref[...]
        fhs = fh_sum_ref[...]                 # fh_re + fh_im
        fhd = fh_dif_ref[...]                 # fh_re - fh_im
        fwr = fw_re_ref[...]
        fwi = fw_im_ref[...]
        fws = fw_sum_ref[...]
        fwd = fw_dif_ref[...]

        # Output block is resident across the coil-chunk axis: initialize with
        # the lam*im term on the first chunk, accumulate per coil below.
        @pl.when(cc == 0)
        def _init():
            out_re_ref[0] = lam * xr
            out_im_ref[0] = lam * xi

        # ---- forward row-DFT per coil of this chunk: t_c = Fh @ (csm_c * im)
        # Static loop bounded by the chunk size Cc (<= 8 by default); the coil
        # axis itself is a grid dimension, so code size / live ranges do not
        # grow with the total coil count.
        # TODO(synk): switch to lax.fori_loop(unroll=2) with dynamic pl.ds row
        # slices if much larger chunk sizes are ever needed.
        for c in range(Cc):
            sr = csm_re_ref[0, c]             # (H, W)
            si = csm_im_ref[0, c]
            cr = sr * xr - si * xi
            ci = sr * xi + si * xr
            tr, ti = _cmm_dft_lhs(fhr, fhi, fhs, cr, ci, precision)
            st_re_ref[c * H:(c + 1) * H, :] = tr
            st_im_ref[c * H:(c + 1) * H, :] = ti

        # ---- coil-stacked column-DFT, mask**2, adjoint column-DFT ---------
        t_r = st_re_ref[...]                  # (Cc*H, W) coil-stacked
        t_i = st_im_ref[...]
        kr, ki = _cmm_dft_rhs(t_r, t_i, fwr, fwi, fws, precision)
        m2t = jnp.tile(m2_ref[...], (Cc, 1))  # on-chip tile; VPU work under MXU
        kr = kr * m2t
        ki = ki * m2t
        yr, yi = _cmm_dft_rhs_conj(kr, ki, fwr, fwi, fwd, precision)

        # park adjoint rows in the (now free) coil-stacked scratch
        st_re_ref[...] = yr
        st_im_ref[...] = yi

        # ---- adjoint row-DFT + conj(csm) reduction straight into the output
        for c in range(Cc):
            yrc = st_re_ref[c * H:(c + 1) * H, :]
            yic = st_im_ref[c * H:(c + 1) * H, :]
            zr, zi = _cmm_dft_lhs_conj(fhr, fhi, fhd, yrc, yic, precision)
            sr = csm_re_ref[0, c]
            si = csm_im_ref[0, c]
            out_re_ref[0] += sr * zr + si * zi
            out_im_ref[0] += sr * zi - si * zr

    return ata_kernel


def dft_matrix(n):
    """Orthonormal symmetric DFT matrix: F[k, m] = exp(-2*pi*i*k*m/n)/sqrt(n)."""
    k = np.arange(n)
    f = np.exp(-2j * np.pi * np.outer(k, k) / n) / np.sqrt(n)
    return (jnp.asarray(f.real, jnp.float32), jnp.asarray(f.imag, jnp.float32))


def _vmem_limit_bytes(fallback=48 * 1024 * 1024):
    """Scoped-VMEM budget derived per TPU generation (64 MiB/TC on v7x,
    128 MiB on v5e/v6e) instead of one hard-coded number."""
    try:
        cap = int(pltpu.get_tpu_info().vmem_capacity_bytes)
        return max(16 * 1024 * 1024, min(cap * 3 // 4, 100 * 1024 * 1024))
    except Exception:
        return fallback


@functools.lru_cache(maxsize=None)
def _default_precision():
    """Prefer 3-pass bf16 (HIGH) for the fp32 DFT matmuls — roughly half the
    MXU passes of HIGHEST with ~1e-5 relative error for orthonormal DFTs.
    Probe once and fall back to HIGHEST if this Pallas/Mosaic version only
    lowers DEFAULT/HIGHEST."""
    def probe(x_ref, o_ref):
        o_ref[...] = jnp.dot(x_ref[...], x_ref[...],
                             preferred_element_type=jnp.float32,
                             precision=lax.Precision.HIGH)
    try:
        x = jnp.zeros((128, 128), jnp.float32)
        jax.block_until_ready(
            pl.pallas_call(
                probe,
                out_shape=jax.ShapeDtypeStruct((128, 128), jnp.float32))(x))
        return lax.Precision.HIGH
    except Exception:
        return lax.Precision.HIGHEST


def make_my_ata(csm, mask, lam, *, coil_chunk=8, precision=None):
    """SENSE normal operator  im -> A^H A im + lam * im  as a Pallas TPU kernel.

    csm : (B, C, H, W) complex coil sensitivities
    mask: (H, W) real sampling mask
    lam : scalar regularization weight

    Returns a jitted callable apply(im), im: (B, H, W) complex -> complex64.

    All per-operator constants (csm real/imag split, mask**2, DFT matrices and
    their sum/diff variants, coil padding) are precomputed ONCE here so that
    repeated applications inside a CG / unrolled-MoDL loop do not redo the
    per-call HBM prep passes.  H should be a multiple of 8 and W ideally a
    multiple of 128 for clean MXU/lane tiling (typical MRI sizes are).
    """
    B, C, H, W = csm.shape
    lam = float(lam)
    if precision is None:
        precision = _default_precision()

    csm_re = jnp.real(csm).astype(jnp.float32)
    csm_im = jnp.imag(csm).astype(jnp.float32)

    # A^H A applies the (real) mask in fwd AND adj -> fold into mask**2 once.
    m2 = jnp.asarray(mask, jnp.float32)
    m2 = m2 * m2                                        # (H, W); no coil tiling

    fh_re, fh_im = dft_matrix(H)
    fw_re, fw_im = dft_matrix(W)
    fh_sum, fh_dif = fh_re + fh_im, fh_re - fh_im
    fw_sum, fw_dif = fw_re + fw_im, fw_re - fw_im

    # Coil-chunk grid axis: resident VMEM is O(Cc*H*W) instead of O(C*H*W).
    Cc = max(1, min(int(coil_chunk), C))
    n_chunks = -(-C // Cc)
    Cp = n_chunks * Cc
    if Cp != C:                                         # zero coils contribute 0
        pad = ((0, 0), (0, Cp - C), (0, 0), (0, 0))
        csm_re = jnp.pad(csm_re, pad)
        csm_im = jnp.pad(csm_im, pad)

    kernel = make_ata_kernel(lam, Cc, H, W, precision)

    flops = 12 * B * Cp * H * W * (H + W)               # real-matmul flops (Karatsuba)
    bytes_accessed = 4 * (2 * B * H * W                 # im
                          + 2 * B * Cp * H * W          # csm
                          + H * W                       # mask^2
                          + 4 * H * H + 4 * W * W       # DFT matrices
                          + 2 * B * H * W)              # outputs

    # TODO(synk): single-buffer the grid-invariant operands (DFT matrices,
    # mask^2) via pipeline_mode=pl.Buffered(1) for a few extra MiB of VMEM
    # headroom once that knob is relied upon in the target jax version.
    grid_spec = pltpu.PrefetchScalarGridSpec(
        num_scalar_prefetch=0,
        grid=(B, n_chunks),
        in_specs=[
            pl.BlockSpec((1, H, W), lambda b, cc: (b, 0, 0)),          # im_re
            pl.BlockSpec((1, H, W), lambda b, cc: (b, 0, 0)),          # im_im
            pl.BlockSpec((1, Cc, H, W), lambda b, cc: (b, cc, 0, 0)),  # csm_re
            pl.BlockSpec((1, Cc, H, W), lambda b, cc: (b, cc, 0, 0)),  # csm_im
            pl.BlockSpec((H, W), lambda b, cc: (0, 0)),                # mask^2
            pl.BlockSpec((H, H), lambda b, cc: (0, 0)),                # fh_re
            pl.BlockSpec((H, H), lambda b, cc: (0, 0)),                # fh_im
            pl.BlockSpec((H, H), lambda b, cc: (0, 0)),                # fh_sum
            pl.BlockSpec((H, H), lambda b, cc: (0, 0)),                # fh_dif
            pl.BlockSpec((W, W), lambda b, cc: (0, 0)),                # fw_re
            pl.BlockSpec((W, W), lambda b, cc: (0, 0)),                # fw_im
            pl.BlockSpec((W, W), lambda b, cc: (0, 0)),                # fw_sum
            pl.BlockSpec((W, W), lambda b, cc: (0, 0)),                # fw_dif
        ],
        out_specs=[
            pl.BlockSpec((1, H, W), lambda b, cc: (b, 0, 0)),
            pl.BlockSpec((1, H, W), lambda b, cc: (b, 0, 0)),
        ],
        scratch_shapes=[
            pltpu.VMEM((Cc * H, W), jnp.float32),   # coil-stacked real
            pltpu.VMEM((Cc * H, W), jnp.float32),   # coil-stacked imag
        ],
    )

    # Batch axis parallel (megacore); coil-chunk axis arbitrary (output is a
    # running accumulator across it).
    # TODO(synk): for the B == 1 case on v7x, additionally split the coil axis
    # across the two TensorCores with per-core partial sums.
    call = pl.pallas_call(
        kernel,
        out_shape=(jax.ShapeDtypeStruct((B, H, W), jnp.float32),
                   jax.ShapeDtypeStruct((B, H, W), jnp.float32)),
        grid_spec=grid_spec,
        compiler_params=pltpu.CompilerParams(
            dimension_semantics=("parallel", "arbitrary"),
            vmem_limit_bytes=_vmem_limit_bytes()),
        cost_estimate=pl.CostEstimate(flops=flops, transcendentals=0,
                                      bytes_accessed=bytes_accessed),
    )

    @jax.jit
    def _apply(im, csm_re, csm_im, m2,
               fh_re, fh_im, fh_sum, fh_dif, fw_re, fw_im, fw_sum, fw_dif):
        im_re = jnp.real(im).astype(jnp.float32)
        im_im = jnp.imag(im).astype(jnp.float32)
        out_re, out_im = call(im_re, im_im, csm_re, csm_im, m2,
                              fh_re, fh_im, fh_sum, fh_dif,
                              fw_re, fw_im, fw_sum, fw_dif)
        return (out_re + 1j * out_im).astype(jnp.complex64)

    def apply(im):
        return _apply(im, csm_re, csm_im, m2,
                      fh_re, fh_im, fh_sum, fh_dif,
                      fw_re, fw_im, fw_sum, fw_dif)

    return apply


def my_ata(im, csm, mask, lam, *, coil_chunk=8, precision=None):
    """One-shot convenience wrapper; prefer make_my_ata() for iterative use."""
    return make_my_ata(csm, mask, lam, coil_chunk=coil_chunk,
                       precision=precision)(im)


def my_ata_ref(im, csm, mask, lam):
    """Pure-JAX reference: A^H A im + lam * im with orthonormal FFTs."""
    coil_im = csm * im[:, None]                               # (B,C,H,W)
    k = jnp.fft.fft2(coil_im, norm="ortho") * mask[None, None]
    back = jnp.fft.ifft2(k * mask[None, None], norm="ortho")
    im_u = jnp.sum(jnp.conj(csm) * back, axis=1)
    return im_u + lam * im


if __name__ == "__main__":
    B, C, H, W = 2, 4, 16, 16
    lam = 0.05

    key = jax.random.PRNGKey(0)
    k1, k2, k3, k4, k5 = jax.random.split(key, 5)

    im = (jax.random.normal(k1, (B, H, W), jnp.float32)
          + 1j * jax.random.normal(k2, (B, H, W), jnp.float32)).astype(jnp.complex64)
    csm = (jax.random.normal(k3, (B, C, H, W), jnp.float32)
           + 1j * jax.random.normal(k4, (B, C, H, W), jnp.float32)).astype(jnp.complex64)
    csm = csm / jnp.sqrt(jnp.sum(jnp.abs(csm) ** 2, axis=1, keepdims=True) + 1e-8)
    mask = (jax.random.uniform(k5, (H, W)) > 0.5).astype(jnp.float32)

    ref = my_ata_ref(im, csm, mask, lam)

    # Multi-chunk path (exercises the cross-chunk output accumulation).
    ata_chunked = make_my_ata(csm, mask, lam, coil_chunk=2)
    out = jax.block_until_ready(ata_chunked(im))
    np.testing.assert_allclose(np.asarray(out), np.asarray(ref),
                               rtol=1e-3, atol=1e-3)

    # Default (single-chunk at this C) path via the convenience wrapper.
    out2 = jax.block_until_ready(my_ata(im, csm, mask, lam))
    np.testing.assert_allclose(np.asarray(out2), np.asarray(ref),
                               rtol=1e-3, atol=1e-3)

    print("KERNEL_OK")
</pallas_src>

<mosaic_0001>
module attributes {stable_mosaic.version = 11 : i64} {
  func.func @ata_kernel(%arg0: i32, %arg1: i32, %arg2: memref<1x16x16xf32, #tpu.memory_space<vmem>>, %arg3: memref<1x16x16xf32, #tpu.memory_space<vmem>>, %arg4: memref<1x2x16x16xf32, #tpu.memory_space<vmem>>, %arg5: memref<1x2x16x16xf32, #tpu.memory_space<vmem>>, %arg6: memref<16x16xf32, #tpu.memory_space<vmem>>, %arg7: memref<16x16xf32, #tpu.memory_space<vmem>>, %arg8: memref<16x16xf32, #tpu.memory_space<vmem>>, %arg9: memref<16x16xf32, #tpu.memory_space<vmem>>, %arg10: memref<16x16xf32, #tpu.memory_space<vmem>>, %arg11: memref<16x16xf32, #tpu.memory_space<vmem>>, %arg12: memref<16x16xf32, #tpu.memory_space<vmem>>, %arg13: memref<16x16xf32, #tpu.memory_space<vmem>>, %arg14: memref<16x16xf32, #tpu.memory_space<vmem>>, %arg15: memref<1x16x16xf32, #tpu.memory_space<vmem>>, %arg16: memref<1x16x16xf32, #tpu.memory_space<vmem>>, %arg17: memref<32x16xf32, #tpu.memory_space<vmem>>, %arg18: memref<32x16xf32, #tpu.memory_space<vmem>>) attributes {dimension_semantics = [#tpu.dimension_semantics<parallel>, #tpu.dimension_semantics<arbitrary>], iteration_bounds = array<i64: 2, 2>, scalar_prefetch = 0 : i64, scratch_operands = 2 : i64, tpu.core_type = #tpu.core_type<tc>, window_params = [{transform_indices = @transform_0, window_bounds = array<i64: 1, 16, 16>}, {transform_indices = @transform_1, window_bounds = array<i64: 1, 16, 16>}, {transform_indices = @transform_2, window_bounds = array<i64: 1, 2, 16, 16>}, {transform_indices = @transform_3, window_bounds = array<i64: 1, 2, 16, 16>}, {pipeline_mode = #tpu.pipeline_mode<synchronous>, transform_indices = @transform_4, window_bounds = array<i64: 16, 16>}, {pipeline_mode = #tpu.pipeline_mode<synchronous>, transform_indices = @transform_5, window_bounds = array<i64: 16, 16>}, {pipeline_mode = #tpu.pipeline_mode<synchronous>, transform_indices = @transform_6, window_bounds = array<i64: 16, 16>}, {pipeline_mode = #tpu.pipeline_mode<synchronous>, transform_indices = @transform_7, window_bounds = array<i64: 16, 16>}, {pipeline_mode = #tpu.pipeline_mode<synchronous>, transform_indices = @transform_8, window_bounds = array<i64: 16, 16>}, {pipeline_mode = #tpu.pipeline_mode<synchronous>, transform_indices = @transform_9, window_bounds = array<i64: 16, 16>}, {pipeline_mode = #tpu.pipeline_mode<synchronous>, transform_indices = @transform_10, window_bounds = array<i64: 16, 16>}, {pipeline_mode = #tpu.pipeline_mode<synchronous>, transform_indices = @transform_11, window_bounds = array<i64: 16, 16>}, {pipeline_mode = #tpu.pipeline_mode<synchronous>, transform_indices = @transform_12, window_bounds = array<i64: 16, 16>}, {transform_indices = @transform_13, window_bounds = array<i64: 1, 16, 16>}, {transform_indices = @transform_14, window_bounds = array<i64: 1, 16, 16>}]} {
    %c0 = arith.constant 0 : index
    %c0_0 = arith.constant 0 : index
    %c0_1 = arith.constant 0 : index
    %0 = vector.load %arg2[%c0, %c0_0, %c0_1] : memref<1x16x16xf32, #tpu.memory_space<vmem>>, vector<1x16x16xf32>
    %1 = vector.shape_cast %0 : vector<1x16x16xf32> to vector<16x16xf32>
    %c0_2 = arith.constant 0 : index
    %c0_3 = arith.constant 0 : index
    %c0_4 = arith.constant 0 : index
    %2 = vector.load %arg3[%c0_2, %c0_3, %c0_4] : memref<1x16x16xf32, #tpu.memory_space<vmem>>, vector<1x16x16xf32>
    %3 = vector.shape_cast %2 : vector<1x16x16xf32> to vector<16x16xf32>
    %c0_5 = arith.constant 0 : index
    %c0_6 = arith.constant 0 : index
    %4 = vector.load %arg7[%c0_5, %c0_6] : memref<16x16xf32, #tpu.memory_space<vmem>>, vector<16x16xf32>
    %c0_7 = arith.constant 0 : index
    %c0_8 = arith.constant 0 : index
    %5 = vector.load %arg8[%c0_7, %c0_8] : memref<16x16xf32, #tpu.memory_space<vmem>>, vector<16x16xf32>
    %c0_9 = arith.constant 0 : index
    %c0_10 = arith.constant 0 : index
    %6 = vector.load %arg9[%c0_9, %c0_10] : memref<16x16xf32, #tpu.memory_space<vmem>>, vector<16x16xf32>
    %c0_11 = arith.constant 0 : index
    %c0_12 = arith.constant 0 : index
    %7 = vector.load %arg10[%c0_11, %c0_12] : memref<16x16xf32, #tpu.memory_space<vmem>>, vector<16x16xf32>
    %c0_13 = arith.constant 0 : index
    %c0_14 = arith.constant 0 : index
    %8 = vector.load %arg11[%c0_13, %c0_14] : memref<16x16xf32, #tpu.memory_space<vmem>>, vector<16x16xf32>
    %c0_15 = arith.constant 0 : index
    %c0_16 = arith.constant 0 : index
    %9 = vector.load %arg12[%c0_15, %c0_16] : memref<16x16xf32, #tpu.memory_space<vmem>>, vector<16x16xf32>
    %c0_17 = arith.constant 0 : index
    %c0_18 = arith.constant 0 : index
    %10 = vector.load %arg13[%c0_17, %c0_18] : memref<16x16xf32, #tpu.memory_space<vmem>>, vector<16x16xf32>
    %c0_19 = arith.constant 0 : index
    %c0_20 = arith.constant 0 : index
    %11 = vector.load %arg14[%c0_19, %c0_20] : memref<16x16xf32, #tpu.memory_space<vmem>>, vector<16x16xf32>
    %c0_i32 = arith.constant 0 : i32
    %12 = arith.cmpi eq, %arg1, %c0_i32 : i32
    %13 = arith.extui %12 : i1 to i32
    %c0_i32_21 = arith.constant 0 : i32
    %14 = arith.cmpi ne, %13, %c0_i32_21 : i32
    scf.if %14 {
      %cst_119 = arith.constant 5.000000e-02 : f32
      %137 = vector.broadcast %cst_119 : f32 to vector<16x16xf32>
      %138 = arith.mulf %137, %1 : vector<16x16xf32>
      %c0_120 = arith.constant 0 : index
      %c0_121 = arith.constant 0 : index
      %c0_122 = arith.constant 0 : index
      %139 = vector.load %arg15[%c0_120, %c0_121, %c0_122] : memref<1x16x16xf32, #tpu.memory_space<vmem>>, vector<1x16x16xf32>
      %140 = vector.shape_cast %139 : vector<1x16x16xf32> to vector<16x16xf32>
      %141 = vector.shape_cast %138 : vector<16x16xf32> to vector<1x16x16xf32>
      tpu.vector_store %arg15[%c0_120, %c0_121, %c0_122], %141 {strides = array<i32>} : memref<1x16x16xf32, #tpu.memory_space<vmem>>, vector<1x16x16xf32>,
      %cst_123 = arith.constant 5.000000e-02 : f32
      %142 = vector.broadcast %cst_123 : f32 to vector<16x16xf32>
      %143 = arith.mulf %142, %3 : vector<16x16xf32>
      %c0_124 = arith.constant 0 : index
      %c0_125 = arith.constant 0 : index
      %c0_126 = arith.constant 0 : index
      %144 = vector.load %arg16[%c0_124, %c0_125, %c0_126] : memref<1x16x16xf32, #tpu.memory_space<vmem>>, vector<1x16x16xf32>
      %145 = vector.shape_cast %144 : vector<1x16x16xf32> to vector<16x16xf32>
      %146 = vector.shape_cast %143 : vector<16x16xf32> to vector<1x16x16xf32>
      tpu.vector_store %arg16[%c0_124, %c0_125, %c0_126], %146 {strides = array<i32>} : memref<1x16x16xf32, #tpu.memory_space<vmem>>, vector<1x16x16xf32>,
    } else {
    }
    %c0_22 = arith.constant 0 : index
    %c0_23 = arith.constant 0 : index
    %c0_24 = arith.constant 0 : index
    %c0_25 = arith.constant 0 : index
    %15 = vector.load %arg4[%c0_22, %c0_23, %c0_24, %c0_25] : memref<1x2x16x16xf32, #tpu.memory_space<vmem>>, vector<1x1x16x16xf32>
    %16 = vector.shape_cast %15 : vector<1x1x16x16xf32> to vector<16x16xf32>
    %c0_26 = arith.constant 0 : index
    %c0_27 = arith.constant 0 : index
    %c0_28 = arith.constant 0 : index
    %c0_29 = arith.constant 0 : index
    %17 = vector.load %arg5[%c0_26, %c0_27, %c0_28, %c0_29] : memref<1x2x16x16xf32, #tpu.memory_space<vmem>>, vector<1x1x16x16xf32>
    %18 = vector.shape_cast %17 : vector<1x1x16x16xf32> to vector<16x16xf32>
    %19 = arith.mulf %16, %1 : vector<16x16xf32>
    %20 = arith.mulf %18, %3 : vector<16x16xf32>
    %21 = arith.subf %19, %20 : vector<16x16xf32>
    %22 = arith.mulf %16, %3 : vector<16x16xf32>
    %23 = arith.mulf %18, %1 : vector<16x16xf32>
    %24 = arith.addf %22, %23 : vector<16x16xf32>
    %cst = arith.constant dense<0.000000e+00> : vector<16x16xf32>
    %25 = tpu.matmul %4, %21, %cst {dimension_numbers = #tpu.dot_dimension_numbers<[1], [0], [0], [1], [0, 0, 1, 1], [], []>, precision = #tpu.contract_precision<fp32>} : vector<16x16xf32>, vector<16x16xf32>, vector<16x16xf32> -> vector<16x16xf32>
    %cst_30 = arith.constant dense<0.000000e+00> : vector<16x16xf32>
    %26 = tpu.matmul %5, %24, %cst_30 {dimension_numbers = #tpu.dot_dimension_numbers<[1], [0], [0], [1], [0, 0, 1, 1], [], []>, precision = #tpu.contract_precision<fp32>} : vector<16x16xf32>, vector<16x16xf32>, vector<16x16xf32> -> vector<16x16xf32>
    %27 = arith.addf %21, %24 : vector<16x16xf32>
    %cst_31 = arith.constant dense<0.000000e+00> : vector<16x16xf32>
    %28 = tpu.matmul %6, %27, %cst_31 {dimension_numbers = #tpu.dot_dimension_numbers<[1], [0], [0], [1], [0, 0, 1, 1], [], []>, precision = #tpu.contract_precision<fp32>} : vector<16x16xf32>, vector<16x16xf32>, vector<16x16xf32> -> vector<16x16xf32>
    %29 = arith.subf %25, %26 : vector<16x16xf32>
    %30 = arith.subf %28, %25 : vector<16x16xf32>
    %31 = arith.subf %30, %26 : vector<16x16xf32>
    %c0_32 = arith.constant 0 : index
    %c0_33 = arith.constant 0 : index
    %32 = vector.load %arg17[%c0_32, %c0_33] : memref<32x16xf32, #tpu.memory_space<vmem>>, vector<16x16xf32>
    tpu.vector_store %arg17[%c0_32, %c0_33], %29 {strides = array<i32>} : memref<32x16xf32, #tpu.memory_space<vmem>>, vector<16x16xf32>,
    %c0_34 = arith.constant 0 : index
    %c0_35 = arith.constant 0 : index
    %33 = vector.load %arg18[%c0_34, %c0_35] : memref<32x16xf32, #tpu.memory_space<vmem>>, vector<16x16xf32>
    tpu.vector_store %arg18[%c0_34, %c0_35], %31 {strides = array<i32>} : memref<32x16xf32, #tpu.memory_space<vmem>>, vector<16x16xf32>,
    %c0_36 = arith.constant 0 : index
    %c1 = arith.constant 1 : index
    %c0_37 = arith.constant 0 : index
    %c0_38 = arith.constant 0 : index
    %34 = vector.load %arg4[%c0_36, %c1, %c0_37, %c0_38] : memref<1x2x16x16xf32, #tpu.memory_space<vmem>>, vector<1x1x16x16xf32>
    %35 = vector.shape_cast %34 : vector<1x1x16x16xf32> to vector<16x16xf32>
    %c0_39 = arith.constant 0 : index
    %c1_40 = arith.constant 1 : index
    %c0_41 = arith.constant 0 : index
    %c0_42 = arith.constant 0 : index
    %36 = vector.load %arg5[%c0_39, %c1_40, %c0_41, %c0_42] : memref<1x2x16x16xf32, #tpu.memory_space<vmem>>, vector<1x1x16x16xf32>
    %37 = vector.shape_cast %36 : vector<1x1x16x16xf32> to vector<16x16xf32>
    %38 = arith.mulf %35, %1 : vector<16x16xf32>
    %39 = arith.mulf %37, %3 : vector<16x16xf32>
    %40 = arith.subf %38, %39 : vector<16x16xf32>
    %41 = arith.mulf %35, %3 : vector<16x16xf32>
    %42 = arith.mulf %37, %1 : vector<16x16xf32>
    %43 = arith.addf %41, %42 : vector<16x16xf32>
    %cst_43 = arith.constant dense<0.000000e+00> : vector<16x16xf32>
    %44 = tpu.matmul %4, %40, %cst_43 {dimension_numbers = #tpu.dot_dimension_numbers<[1], [0], [0], [1], [0, 0, 1, 1], [], []>, precision = #tpu.contract_precision<fp32>} : vector<16x16xf32>, vector<16x16xf32>, vector<16x16xf32> -> vector<16x16xf32>
    %cst_44 = arith.constant dense<0.000000e+00> : vector<16x16xf32>
    %45 = tpu.matmul %5, %43, %cst_44 {dimension_numbers = #tpu.dot_dimension_numbers<[1], [0], [0], [1], [0, 0, 1, 1], [], []>, precision = #tpu.contract_precision<fp32>} : vector<16x16xf32>, vector<16x16xf32>, vector<16x16xf32> -> vector<16x16xf32>
    %46 = arith.addf %40, %43 : vector<16x16xf32>
    %cst_45 = arith.constant dense<0.000000e+00> : vector<16x16xf32>
    %47 = tpu.matmul %6, %46, %cst_45 {dimension_numbers = #tpu.dot_dimension_numbers<[1], [0], [0], [1], [0, 0, 1, 1], [], []>, precision = #tpu.contract_precision<fp32>} : vector<16x16xf32>, vector<16x16xf32>, vector<16x16xf32> -> vector<16x16xf32>
    %48 = arith.subf %44, %45 : vector<16x16xf32>
    %49 = arith.subf %47, %44 : vector<16x16xf32>
    %50 = arith.subf %49, %45 : vector<16x16xf32>
    %c16 = arith.constant 16 : index
    %c0_46 = arith.constant 0 : index
    %51 = vector.load %arg17[%c16, %c0_46] : memref<32x16xf32, #tpu.memory_space<vmem>>, vector<16x16xf32>
    tpu.vector_store %arg17[%c16, %c0_46], %48 {strides = array<i32>} : memref<32x16xf32, #tpu.memory_space<vmem>>, vector<16x16xf32>,
    %c16_47 = arith.constant 16 : index
    %c0_48 = arith.constant 0 : index
    %52 = vector.load %arg18[%c16_47, %c0_48] : memref<32x16xf32, #tpu.memory_space<vmem>>, vector<16x16xf32>
    tpu.vector_store %arg18[%c16_47, %c0_48], %50 {strides = array<i32>} : memref<32x16xf32, #tpu.memory_space<vmem>>, vector<16x16xf32>,
    %c0_49 = arith.constant 0 : index
    %c0_50 = arith.constant 0 : index
    %53 = vector.load %arg17[%c0_49, %c0_50] : memref<32x16xf32, #tpu.memory_space<vmem>>, vector<32x16xf32>
    %c0_51 = arith.constant 0 : index
    %c0_52 = arith.constant 0 : index
    %54 = vector.load %arg18[%c0_51, %c0_52] : memref<32x16xf32, #tpu.memory_space<vmem>>, vector<32x16xf32>
    %cst_53 = arith.constant dense<0.000000e+00> : vector<32x16xf32>
    %55 = tpu.matmul %53, %8, %cst_53 {dimension_numbers = #tpu.dot_dimension_numbers<[1], [0], [0], [1], [0, 0, 1, 1], [], []>, precision = #tpu.contract_precision<fp32>} : vector<32x16xf32>, vector<16x16xf32>, vector<32x16xf32> -> vector<32x16xf32>
    %cst_54 = arith.constant dense<0.000000e+00> : vector<32x16xf32>
    %56 = tpu.matmul %54, %9, %cst_54 {dimension_numbers = #tpu.dot_dimension_numbers<[1], [0], [0], [1], [0, 0, 1, 1], [], []>, precision = #tpu.contract_precision<fp32>} : vector<32x16xf32>, vector<16x16xf32>, vector<32x16xf32> -> vector<32x16xf32>
    %57 = arith.addf %53, %54 : vector<32x16xf32>
    %cst_55 = arith.constant dense<0.000000e+00> : vector<32x16xf32>
    %58 = tpu.matmul %57, %10, %cst_55 {dimension_numbers = #tpu.dot_dimension_numbers<[1], [0], [0], [1], [0, 0, 1, 1], [], []>, precision = #tpu.contract_precision<fp32>} : vector<32x16xf32>, vector<16x16xf32>, vector<32x16xf32> -> vector<32x16xf32>
    %59 = arith.subf %55, %56 : vector<32x16xf32>
    %60 = arith.subf %58, %55 : vector<32x16xf32>
    %61 = arith.subf %60, %56 : vector<32x16xf32>
    %c0_56 = arith.constant 0 : index
    %c0_57 = arith.constant 0 : index
    %62 = vector.load %arg6[%c0_56, %c0_57] : memref<16x16xf32, #tpu.memory_space<vmem>>, vector<16x16xf32>
    %63 = tpu.concatenate %62, %62 in 0 : vector<16x16xf32>, vector<16x16xf32> -> vector<32x16xf32>
    %64 = arith.mulf %59, %63 : vector<32x16xf32>
    %65 = arith.mulf %61, %63 : vector<32x16xf32>
    %cst_58 = arith.constant dense<0.000000e+00> : vector<32x16xf32>
    %66 = tpu.matmul %64, %8, %cst_58 {dimension_numbers = #tpu.dot_dimension_numbers<[1], [0], [0], [1], [0, 0, 1, 1], [], []>, precision = #tpu.contract_precision<fp32>} : vector<32x16xf32>, vector<16x16xf32>, vector<32x16xf32> -> vector<32x16xf32>
    %cst_59 = arith.constant dense<0.000000e+00> : vector<32x16xf32>
    %67 = tpu.matmul %65, %9, %cst_59 {dimension_numbers = #tpu.dot_dimension_numbers<[1], [0], [0], [1], [0, 0, 1, 1], [], []>, precision = #tpu.contract_precision<fp32>} : vector<32x16xf32>, vector<16x16xf32>, vector<32x16xf32> -> vector<32x16xf32>
    %68 = arith.addf %64, %65 : vector<32x16xf32>
    %cst_60 = arith.constant dense<0.000000e+00> : vector<32x16xf32>
    %69 = tpu.matmul %68, %11, %cst_60 {dimension_numbers = #tpu.dot_dimension_numbers<[1], [0], [0], [1], [0, 0, 1, 1], [], []>, precision = #tpu.contract_precision<fp32>} : vector<32x16xf32>, vector<16x16xf32>, vector<32x16xf32> -> vector<32x16xf32>
    %70 = arith.addf %66, %67 : vector<32x16xf32>
    %71 = arith.subf %69, %66 : vector<32x16xf32>
    %72 = arith.addf %71, %67 : vector<32x16xf32>
    %c0_61 = arith.constant 0 : index
    %c0_62 = arith.constant 0 : index
    %73 = vector.load %arg17[%c0_61, %c0_62] : memref<32x16xf32, #tpu.memory_space<vmem>>, vector<32x16xf32>
    tpu.vector_store %arg17[%c0_61, %c0_62], %70 {strides = array<i32>} : memref<32x16xf32, #tpu.memory_space<vmem>>, vector<32x16xf32>,
    %c0_63 = arith.constant 0 : index
    %c0_64 = arith.constant 0 : index
    %74 = vector.load %arg18[%c0_63, %c0_64] : memref<32x16xf32, #tpu.memory_space<vmem>>, vector<32x16xf32>
    tpu.vector_store %arg18[%c0_63, %c0_64], %72 {strides = array<i32>} : memref<32x16xf32, #tpu.memory_space<vmem>>, vector<32x16xf32>,
    %c0_65 = arith.constant 0 : index
    %c0_66 = arith.constant 0 : index
    %75 = vector.load %arg17[%c0_65, %c0_66] : memref<32x16xf32, #tpu.memory_space<vmem>>, vector<16x16xf32>
    %c0_67 = arith.constant 0 : index
    %c0_68 = arith.constant 0 : index
    %76 = vector.load %arg18[%c0_67, %c0_68] : memref<32x16xf32, #tpu.memory_space<vmem>>, vector<16x16xf32>
    %cst_69 = arith.constant dense<0.000000e+00> : vector<16x16xf32>
    %77 = tpu.matmul %4, %75, %cst_69 {dimension_numbers = #tpu.dot_dimension_numbers<[1], [0], [0], [1], [0, 0, 1, 1], [], []>, precision = #tpu.contract_precision<fp32>} : vector<16x16xf32>, vector<16x16xf32>, vector<16x16xf32> -> vector<16x16xf32>
    %cst_70 = arith.constant dense<0.000000e+00> : vector<16x16xf32>
    %78 = tpu.matmul %5, %76, %cst_70 {dimension_numbers = #tpu.dot_dimension_numbers<[1], [0], [0], [1], [0, 0, 1, 1], [], []>, precision = #tpu.contract_precision<fp32>} : vector<16x16xf32>, vector<16x16xf32>, vector<16x16xf32> -> vector<16x16xf32>
    %79 = arith.addf %75, %76 : vector<16x16xf32>
    %cst_71 = arith.constant dense<0.000000e+00> : vector<16x16xf32>
    %80 = tpu.matmul %7, %79, %cst_71 {dimension_numbers = #tpu.dot_dimension_numbers<[1], [0], [0], [1], [0, 0, 1, 1], [], []>, precision = #tpu.contract_precision<fp32>} : vector<16x16xf32>, vector<16x16xf32>, vector<16x16xf32> -> vector<16x16xf32>
    %81 = arith.addf %77, %78 : vector<16x16xf32>
    %82 = arith.subf %80, %77 : vector<16x16xf32>
    %83 = arith.addf %82, %78 : vector<16x16xf32>
    %c0_72 = arith.constant 0 : index
    %c0_73 = arith.constant 0 : index
    %c0_74 = arith.constant 0 : index
    %c0_75 = arith.constant 0 : index
    %84 = vector.load %arg4[%c0_72, %c0_73, %c0_74, %c0_75] : memref<1x2x16x16xf32, #tpu.memory_space<vmem>>, vector<1x1x16x16xf32>
    %85 = vector.shape_cast %84 : vector<1x1x16x16xf32> to vector<16x16xf32>
    %c0_76 = arith.constant 0 : index
    %c0_77 = arith.constant 0 : index
    %c0_78 = arith.constant 0 : index
    %c0_79 = arith.constant 0 : index
    %86 = vector.load %arg5[%c0_76, %c0_77, %c0_78, %c0_79] : memref<1x2x16x16xf32, #tpu.memory_space<vmem>>, vector<1x1x16x16xf32>
    %87 = vector.shape_cast %86 : vector<1x1x16x16xf32> to vector<16x16xf32>
    %c0_80 = arith.constant 0 : index
    %c0_81 = arith.constant 0 : index
    %c0_82 = arith.constant 0 : index
    %88 = vector.load %arg15[%c0_80, %c0_81, %c0_82] : memref<1x16x16xf32, #tpu.memory_space<vmem>>, vector<1x16x16xf32>
    %89 = vector.shape_cast %88 : vector<1x16x16xf32> to vector<16x16xf32>
    %90 = arith.mulf %85, %81 : vector<16x16xf32>
    %91 = arith.mulf %87, %83 : vector<16x16xf32>
    %92 = arith.addf %90, %91 : vector<16x16xf32>
    %93 = arith.addf %89, %92 : vector<16x16xf32>
    %c0_83 = arith.constant 0 : index
    %c0_84 = arith.constant 0 : index
    %c0_85 = arith.constant 0 : index
    %94 = vector.load %arg15[%c0_83, %c0_84, %c0_85] : memref<1x16x16xf32, #tpu.memory_space<vmem>>, vector<1x16x16xf32>
    %95 = vector.shape_cast %94 : vector<1x16x16xf32> to vector<16x16xf32>
    %96 = vector.shape_cast %93 : vector<16x16xf32> to vector<1x16x16xf32>
    tpu.vector_store %arg15[%c0_83, %c0_84, %c0_85], %96 {strides = array<i32>} : memref<1x16x16xf32, #tpu.memory_space<vmem>>, vector<1x16x16xf32>,
    %c0_86 = arith.constant 0 : index
    %c0_87 = arith.constant 0 : index
    %c0_88 = arith.constant 0 : index
    %97 = vector.load %arg16[%c0_86, %c0_87, %c0_88] : memref<1x16x16xf32, #tpu.memory_space<vmem>>, vector<1x16x16xf32>
    %98 = vector.shape_cast %97 : vector<1x16x16xf32> to vector<16x16xf32>
    %99 = arith.mulf %85, %83 : vector<16x16xf32>
    %100 = arith.mulf %87, %81 : vector<16x16xf32>
    %101 = arith.subf %99, %100 : vector<16x16xf32>
    %102 = arith.addf %98, %101 : vector<16x16xf32>
    %c0_89 = arith.constant 0 : index
    %c0_90 = arith.constant 0 : index
    %c0_91 = arith.constant 0 : index
    %103 = vector.load %arg16[%c0_89, %c0_90, %c0_91] : memref<1x16x16xf32, #tpu.memory_space<vmem>>, vector<1x16x16xf32>
    %104 = vector.shape_cast %103 : vector<1x16x16xf32> to vector<16x16xf32>
    %105 = vector.shape_cast %102 : vector<16x16xf32> to vector<1x16x16xf32>
    tpu.vector_store %arg16[%c0_89, %c0_90, %c0_91], %105 {strides = array<i32>} : memref<1x16x16xf32, #tpu.memory_space<vmem>>, vector<1x16x16xf32>,
    %c16_92 = arith.constant 16 : index
    %c0_93 = arith.constant 0 : index
    %106 = vector.load %arg17[%c16_92, %c0_93] : memref<32x16xf32, #tpu.memory_space<vmem>>, vector<16x16xf32>
    %c16_94 = arith.constant 16 : index
    %c0_95 = arith.constant 0 : index
    %107 = vector.load %arg18[%c16_94, %c0_95] : memref<32x16xf32, #tpu.memory_space<vmem>>, vector<16x16xf32>
    %cst_96 = arith.constant dense<0.000000e+00> : vector<16x16xf32>
    %108 = tpu.matmul %4, %106, %cst_96 {dimension_numbers = #tpu.dot_dimension_numbers<[1], [0], [0], [1], [0, 0, 1, 1], [], []>, precision = #tpu.contract_precision<fp32>} : vector<16x16xf32>, vector<16x16xf32>, vector<16x16xf32> -> vector<16x16xf32>
    %cst_97 = arith.constant dense<0.000000e+00> : vector<16x16xf32>
    %109 = tpu.matmul %5, %107, %cst_97 {dimension_numbers = #tpu.dot_dimension_numbers<[1], [0], [0], [1], [0, 0, 1, 1], [], []>, precision = #tpu.contract_precision<fp32>} : vector<16x16xf32>, vector<16x16xf32>, vector<16x16xf32> -> vector<16x16xf32>
    %110 = arith.addf %106, %107 : vector<16x16xf32>
    %cst_98 = arith.constant dense<0.000000e+00> : vector<16x16xf32>
    %111 = tpu.matmul %7, %110, %cst_98 {dimension_numbers = #tpu.dot_dimension_numbers<[1], [0], [0], [1], [0, 0, 1, 1], [], []>, precision = #tpu.contract_precision<fp32>} : vector<16x16xf32>, vector<16x16xf32>, vector<16x16xf32> -> vector<16x16xf32>
    %112 = arith.addf %108, %109 : vector<16x16xf32>
    %113 = arith.subf %111, %108 : vector<16x16xf32>
    %114 = arith.addf %113, %109 : vector<16x16xf32>
    %c0_99 = arith.constant 0 : index
    %c1_100 = arith.constant 1 : index
    %c0_101 = arith.constant 0 : index
    %c0_102 = arith.constant 0 : index
    %115 = vector.load %arg4[%c0_99, %c1_100, %c0_101, %c0_102] : memref<1x2x16x16xf32, #tpu.memory_space<vmem>>, vector<1x1x16x16xf32>
    %116 = vector.shape_cast %115 : vector<1x1x16x16xf32> to vector<16x16xf32>
    %c0_103 = arith.constant 0 : index
    %c1_104 = arith.constant 1 : index
    %c0_105 = arith.constant 0 : index
    %c0_106 = arith.constant 0 : index
    %117 = vector.load %arg5[%c0_103, %c1_104, %c0_105, %c0_106] : memref<1x2x16x16xf32, #tpu.memory_space<vmem>>, vector<1x1x16x16xf32>
    %118 = vector.shape_cast %117 : vector<1x1x16x16xf32> to vector<16x16xf32>
    %c0_107 = arith.constant 0 : index
    %c0_108 = arith.constant 0 : index
    %c0_109 = arith.constant 0 : index
    %119 = vector.load %arg15[%c0_107, %c0_108, %c0_109] : memref<1x16x16xf32, #tpu.memory_space<vmem>>, vector<1x16x16xf32>
    %120 = vector.shape_cast %119 : vector<1x16x16xf32> to vector<16x16xf32>
    %121 = arith.mulf %116, %112 : vector<16x16xf32>
    %122 = arith.mulf %118, %114 : vector<16x16xf32>
    %123 = arith.addf %121, %122 : vector<16x16xf32>
    %124 = arith.addf %120, %123 : vector<16x16xf32>
    %c0_110 = arith.constant 0 : index
    %c0_111 = arith.constant 0 : index
    %c0_112 = arith.constant 0 : index
    %125 = vector.load %arg15[%c0_110, %c0_111, %c0_112] : memref<1x16x16xf32, #tpu.memory_space<vmem>>, vector<1x16x16xf32>
    %126 = vector.shape_cast %125 : vector<1x16x16xf32> to vector<16x16xf32>
    %127 = vector.shape_cast %124 : vector<16x16xf32> to vector<1x16x16xf32>
    tpu.vector_store %arg15[%c0_110, %c0_111, %c0_112], %127 {strides = array<i32>} : memref<1x16x16xf32, #tpu.memory_space<vmem>>, vector<1x16x16xf32>,
    %c0_113 = arith.constant 0 : index
    %c0_114 = arith.constant 0 : index
    %c0_115 = arith.constant 0 : index
    %128 = vector.load %arg16[%c0_113, %c0_114, %c0_115] : memref<1x16x16xf32, #tpu.memory_space<vmem>>, vector<1x16x16xf32>
    %129 = vector.shape_cast %128 : vector<1x16x16xf32> to vector<16x16xf32>
    %130 = arith.mulf %116, %114 : vector<16x16xf32>
    %131 = arith.mulf %118, %112 : vector<16x16xf32>
    %132 = arith.subf %130, %131 : vector<16x16xf32>
    %133 = arith.addf %129, %132 : vector<16x16xf32>
    %c0_116 = arith.constant 0 : index
    %c0_117 = arith.constant 0 : index
    %c0_118 = arith.constant 0 : index
    %134 = vector.load %arg16[%c0_116, %c0_117, %c0_118] : memref<1x16x16xf32, #tpu.memory_space<vmem>>, vector<1x16x16xf32>
    %135 = vector.shape_cast %134 : vector<1x16x16xf32> to vector<16x16xf32>
    %136 = vector.shape_cast %133 : vector<16x16xf32> to vector<1x16x16xf32>
    tpu.vector_store %arg16[%c0_116, %c0_117, %c0_118], %136 {strides = array<i32>} : memref<1x16x16xf32, #tpu.memory_space<vmem>>, vector<1x16x16xf32>,
    return
  }
  func.func @transform_0(%arg0: i32, %arg1: i32) -> (i32, i32, i32) {
    %c0_i32 = arith.constant 0 : i32
    %c0_i32_0 = arith.constant 0 : i32
    %c0_i32_1 = arith.constant 0 : i32
    return %arg0, %c0_i32, %c0_i32_0 : i32, i32, i32
  }
  func.func @transform_1(%arg0: i32, %arg1: i32) -> (i32, i32, i32) {
    %c0_i32 = arith.constant 0 : i32
    %c0_i32_0 = arith.constant 0 : i32
    %c0_i32_1 = arith.constant 0 : i32
    return %arg0, %c0_i32, %c0_i32_0 : i32, i32, i32
  }
  func.func @transform_2(%arg0: i32, %arg1: i32) -> (i32, i32, i32, i32) {
    %c0_i32 = arith.constant 0 : i32
    %c0_i32_0 = arith.constant 0 : i32
    %c0_i32_1 = arith.constant 0 : i32
    return %arg0, %arg1, %c0_i32, %c0_i32_0 : i32, i32, i32, i32
  }
  func.func @transform_3(%arg0: i32, %arg1: i32) -> (i32, i32, i32, i32) {
    %c0_i32 = arith.constant 0 : i32
    %c0_i32_0 = arith.constant 0 : i32
    %c0_i32_1 = arith.constant 0 : i32
    return %arg0, %arg1, %c0_i32, %c0_i32_0 : i32, i32, i32, i32
  }
  func.func @transform_4(%arg0: i32, %arg1: i32) -> (i32, i32) {
    %c0_i32 = arith.constant 0 : i32
    %c0_i32_0 = arith.constant 0 : i32
    %c0_i32_1 = arith.constant 0 : i32
    return %c0_i32, %c0_i32_0 : i32, i32
  }
  func.func @transform_5(%arg0: i32, %arg1: i32) -> (i32, i32) {
    %c0_i32 = arith.constant 0 : i32
    %c0_i32_0 = arith.constant 0 : i32
    %c0_i32_1 = arith.constant 0 : i32
    return %c0_i32, %c0_i32_0 : i32, i32
  }
  func.func @transform_6(%arg0: i32, %arg1: i32) -> (i32, i32) {
    %c0_i32 = arith.constant 0 : i32
    %c0_i32_0 = arith.constant 0 : i32
    %c0_i32_1 = arith.constant 0 : i32
    return %c0_i32, %c0_i32_0 : i32, i32
  }
  func.func @transform_7(%arg0: i32, %arg1: i32) -> (i32, i32) {
    %c0_i32 = arith.constant 0 : i32
    %c0_i32_0 = arith.constant 0 : i32
    %c0_i32_1 = arith.constant 0 : i32
    return %c0_i32, %c0_i32_0 : i32, i32
  }
  func.func @transform_8(%arg0: i32, %arg1: i32) -> (i32, i32) {
    %c0_i32 = arith.constant 0 : i32
    %c0_i32_0 = arith.constant 0 : i32
    %c0_i32_1 = arith.constant 0 : i32
    return %c0_i32, %c0_i32_0 : i32, i32
  }
  func.func @transform_9(%arg0: i32, %arg1: i32) -> (i32, i32) {
    %c0_i32 = arith.constant 0 : i32
    %c0_i32_0 = arith.constant 0 : i32
    %c0_i32_1 = arith.constant 0 : i32
    return %c0_i32, %c0_i32_0 : i32, i32
  }
  func.func @transform_10(%arg0: i32, %arg1: i32) -> (i32, i32) {
    %c0_i32 = arith.constant 0 : i32
    %c0_i32_0 = arith.constant 0 : i32
    %c0_i32_1 = arith.constant 0 : i32
    return %c0_i32, %c0_i32_0 : i32, i32
  }
  func.func @transform_11(%arg0: i32, %arg1: i32) -> (i32, i32) {
    %c0_i32 = arith.constant 0 : i32
    %c0_i32_0 = arith.constant 0 : i32
    %c0_i32_1 = arith.constant 0 : i32
    return %c0_i32, %c0_i32_0 : i32, i32
  }
  func.func @transform_12(%arg0: i32, %arg1: i32) -> (i32, i32) {
    %c0_i32 = arith.constant 0 : i32
    %c0_i32_0 = arith.constant 0 : i32
    %c0_i32_1 = arith.constant 0 : i32
    return %c0_i32, %c0_i32_0 : i32, i32
  }
  func.func @transform_13(%arg0: i32, %arg1: i32) -> (i32, i32, i32) {
    %c0_i32 = arith.constant 0 : i32
    %c0_i32_0 = arith.constant 0 : i32
    %c0_i32_1 = arith.constant 0 : i32
    return %arg0, %c0_i32, %c0_i32_0 : i32, i32, i32
  }
  func.func @transform_14(%arg0: i32, %arg1: i32) -> (i32, i32, i32) {
    %c0_i32 = arith.constant 0 : i32
    %c0_i32_0 = arith.constant 0 : i32
    %c0_i32_1 = arith.constant 0 : i32
    return %arg0, %c0_i32, %c0_i32_0 : i32, i32, i32
  }
}

</mosaic_0001>

<bundles_post_ra>
// kernel: custom-call.1
= control target key start
LH: loop header
LB: loop body
LE: loop exit
PB: predicated region body
PF: predicated region fallthrough
CT: control target
= control target key end

     0   :  { %s56_s0 = inlined_call_operand.hbm [shape: c64[2,16,16], index: 0, kind: input, shape index: {}]   ;;  %s57_s1 = inlined_call_operand.vmem [shape: f32[2,16,16], index: 1, kind: output, shape index: {}]  }
   0x1   :  { %s2_s8 = scalar_lea.hbm %s56_s0, 32 }
   0x2   :  { %3 = vsyncpa [#allocation0], 0  ;;  %s5_s9 = sshll.u32 %s2_s8, 4  ;;  %s7_s12 = sshll.u32 %s57_s1, 4  ;;  %s6_s9 = int_to_ptr.hbm [resolvable:$true] %s5_s9  ;;  %s8_s12 = int_to_ptr.vmem [resolvable:$true] %s7_s12 }
   0x3   :  { %10 = dma.hbm_to_vmem [thread:$0]  %s6_s9, 512, %s8_s12, [#allocation0] }
   0x4   :  { %38 = dma.done.wait [#allocation0], 512  }
   0x5   :  { %39 = vsyncadd [#allocation0], 4294966784 }
   0x6   :  { %13 = vsyncpa [#allocation0], 1 }

// kernel: custom-call
= control target key start
LH: loop header
LB: loop body
LE: loop exit
PB: predicated region body
PF: predicated region fallthrough
CT: control target
= control target key end

     0   :  { %2 = vsyncpa [#allocation0], 0  ;;  %s55_s0 = inlined_call_operand.hbm [shape: c64[2,16,16], index: 0, kind: input, shape index: {}]   ;;  %s56_s1 = inlined_call_operand.vmem [shape: f32[2,16,16], index: 1, kind: output, shape index: {}]  }
   0x1   :  { %s4_s8 = sshll.u32 %s55_s0, 4  ;;  %s6_s11 = sshll.u32 %s56_s1, 4  ;;  %s5_s8 = int_to_ptr.hbm [resolvable:$true] %s4_s8  ;;  %s7_s11 = int_to_ptr.vmem [resolvable:$true] %s6_s11 }
   0x2   :  { %9 = dma.hbm_to_vmem [thread:$0]  %s5_s8, 512, %s7_s11, [#allocation0] }
   0x3   :  { %37 = dma.done.wait [#allocation0], 512  }
   0x4   :  { %38 = vsyncadd [#allocation0], 4294966784 }
   0x5   :  { %12 = vsyncpa [#allocation0], 1 }

// kernel: custom-call.2
= control target key start
LH: loop header
LB: loop body
LE: loop exit
PB: predicated region body
PF: predicated region fallthrough
CT: control target
= control target key end

     0   :  { %s105_s0 = inlined_call_operand.vmem [shape: f32[2,16,16], index: 0, kind: input, shape index: {}]   ;;  %s106_s1 = inlined_call_operand.vmem [shape: f32[2,16,16], index: 1, kind: input, shape index: {}]   ;;  %s107_s2 = inlined_call_operand.hbm [shape: c64[2,16,16], index: 2, kind: output, shape index: {}]  }
   0x1   :  { %s3_s11 = scalar_lea.hbm %s107_s2, 32 }
   0x2   :  { %4 = vsyncpa [#allocation0], 0  ;;  %s6_s14 = sshll.u32 %s105_s0, 4  ;;  %s8_s17 = sshll.u32 %s107_s2, 4  ;;  %s7_s14 = int_to_ptr.vmem [resolvable:$true] %s6_s14  ;;  %s9_s17 = int_to_ptr.hbm [resolvable:$true] %s8_s17 }
   0x3   :  { %11 = dma.vmem_to_hbm [thread:$0]  %s7_s14, 512, %s9_s17, [#allocation0] }
   0x4   :  { %74 = dma.done.wait [#allocation0], 512  }
   0x5   :  { %75 = vsyncadd [#allocation0], 4294966784 }
   0x6   :  { %14 = vsyncpa [#allocation0], 1 }
   0x7   :  { %15 = vsyncpa [#allocation1], 0  ;;  %s17_s20 = sshll.u32 %s106_s1, 4  ;;  %s19_s21 = sshll.u32 %s3_s11, 4  ;;  %s18_s20 = int_to_ptr.vmem [resolvable:$true] %s17_s20  ;;  %s20_s21 = int_to_ptr.hbm [resolvable:$true] %s19_s21 }
   0x8   :  { %22 = dma.vmem_to_hbm [thread:$0]  %s18_s20, 512, %s20_s21, [#allocation1] }
   0x9   :  { %76 = dma.done.wait [#allocation1], 512  }
   0xa   :  { %77 = vsyncadd [#allocation1], 4294966784 }
   0xb   :  { %25 = vsyncpa [#allocation1], 1 }

// kernel: _apply.1
= control target key start
LH: loop header
LB: loop body
LE: loop exit
PB: predicated region body
PF: predicated region fallthrough
CT: control target
= control target key end

     0   :  { %s7036_s0 = inlined_call_operand.vmem [shape: f32[2,16,16], index: 0, kind: input, shape index: {}]   ;;  %s7037_s1 = inlined_call_operand.vmem [shape: f32[2,16,16], index: 1, kind: input, shape index: {}]   ;;  %s7038_s2 = inlined_call_operand.hbm [shape: f32[2,4,16,16], index: 2, kind: input, shape index: {}]   ;;  %s7039_s3 = inlined_call_operand.hbm [shape: f32[2,4,16,16], index: 3, kind: input, shape index: {}]   ;;  %s7040_s4 = inlined_call_operand.hbm [shape: f32[16,16], index: 4, kind: input, shape index: {}]   ;;  %s7041_s5 = inlined_call_operand.hbm [shape: f32[16,16], index: 5, kind: input, shape index: {}]   ;;  %s7042_s6 = inlined_call_operand.hbm [shape: f32[16,16], index: 6, kind: input, shape index: {}]   ;;  %s7043_s7 = inlined_call_operand.hbm [shape: f32[16,16], index: 7, kind: input, shape index: {}]   ;;  %s7044_s8 = inlined_call_operand.hbm [shape: f32[16,16], index: 8, kind: input, shape index: {}]   ;;  %s7045_s9 = inlined_call_operand.hbm [shape: f32[16,16], index: 9, kind: input, shape index: {}]   ;;  %s7046_s10 = inlined_call_operand.hbm [shape: f32[16,16], index: 10, kind: input, shape index: {}]   ;;  %s7047_s11 = inlined_call_operand.hbm [shape: f32[16,16], index: 11, kind: input, shape index: {}]   ;;  %s7048_s12 = inlined_call_operand.hbm [shape: f32[16,16], index: 12, kind: input, shape index: {}]   ;;  %s7049_s13 = inlined_call_operand.vmem [shape: f32[2,16,16], index: 13, kind: output, shape index: {0}]   ;;  %s7050_s14 = inlined_call_operand.vmem [shape: f32[2,16,16], index: 14, kind: output, shape index: {1}]  }
   0x1   :  { %7076 = sst [smem:[#allocation42_spill]] %s7036_s0 }
   0x2   :  { %7077 = sst [smem:[#allocation43_spill]] %s7037_s1 }
   0x3   :  { %7078 = sst [smem:[#allocation44_spill]] %s7040_s4 }
   0x4   :  { %7079 = sst [smem:[#allocation45_spill]] %s7041_s5 }
   0x5   :  { %7080 = sst [smem:[#allocation46_spill]] %s7042_s6 }
   0x6   :  { %7081 = sst [smem:[#allocation47_spill]] %s7043_s7 }
   0x7   :  { %7082 = sst [smem:[#allocation48_spill]] %s7044_s8 }
   0x8   :  { %7083 = sst [smem:[#allocation49_spill]] %s7045_s9 }
   0x9   :  { %7084 = sst [smem:[#allocation50_spill]] %s7046_s10 }
   0xa   :  { %7085 = sst [smem:[#allocation51_spill]] %s7047_s11 }
   0xb   :  { %7086 = sst [smem:[#allocation52_spill]] %s7049_s13 }
   0xc   :  { %7087 = sst [smem:[#allocation53_spill]] %s7050_s14 }
   0xd   :  { %20 = vsyncpa [#allocation5], 0 }
   0xe   :  { %22 = vsyncpa [#allocation5 + $0x1], 0 }
   0xf   :  { %23 = vsyncpa [#allocation7], 0 }
  0x10   :  { %25 = vsyncpa [#allocation7 + $0x1], 0 }
  0x11   :  { %26 = vsyncpa [#allocation10], 0 }
  0x12   :  { %27 = vsyncpa [#allocation13], 0 }
  0x13   :  { %28 = vsyncpa [#allocation16], 0 }
  0x14   :  { %29 = vsyncpa [#allocation19], 0  ;;  %s5861_s29 = smov 0   ;;  %s5863_s30 = smov 0  }
  0x15   :  { %s5865_s15 = smov 0   ;;  %s5867_s16 = smov 0  }
  0x16   :  { %s5869_s17 = smov 0   ;;  %s5871_s18 = smov 0  }
  0x17   :  { %s5873_s19 = smov 0   ;;  %s5875_s20 = smov 0  }
  0x18 LB: > { %7088 = sst [smem:[#allocation28_spill]] %s5757_s16  ;;  %s7051_s21 = sadd.s32 4294967295, %s5773_s20   ;;  %s5773_s20 = sphi %s5875_s20, %s35_s20   ;;  %s5769_s19 = sphi %s5873_s19, %s7142_s19   ;;  %s5765_s18 = sphi %s5871_s18, %s7141_s18   ;;  %s5761_s17 = sphi %s5869_s17, %s7140_s17   ;;  %s5757_s16 = sphi %s5867_s16, %s7139_s16   ;;  %s5753_s15 = sphi %s5865_s15, %s7138_s15   ;;  %s5749_s30 = sphi %s5863_s30, %s7137_s30   ;;  %s5745_s29 = sphi %s5861_s29, %s7136_s29  }
  0x19   : > { %7089 = sst [smem:[#allocation29_spill]] %s5761_s17  ;;  %p5126_p0 = scmp.ge.s32.totalorder %s5773_s20, 1 }
  0x1a   : > { %p5905_p1 = scmp.eq.s32.totalorder %s7051_s21, 0  ;;  %p401_p2 = scmp.lt.s32.totalorder %s5773_s20, 5 }
  0x1b   : > { %s7091_s4 = sld [smem:[#allocation44_spill]]  ;;  %s5775_s27 = smov [#allocation8]  }
  0x1c   : > { %p5913_p3 = pnand %p5126_p0, %p401_p2  ;;  %s414_s28 = sshll.u32 %s5775_s27, 4  ;;  %s415_s28 = int_to_ptr.vmem [resolvable:$true] %s414_s28 }
  0x1d   : > { %s7095_s5 = sld [smem:[#allocation45_spill]]  ;;  %s7054_s24 = smov 128  }
  0x1e   : > { %s7092_s26 = scalar_select %p5913_p3, 1, 0 }
  0x1f   : > { %p5224_p4 = pneg %p5913_p3  ;;  %s5778_s27 = smov [#allocation9]  }
  0x20   : > { %7093 = sst [smem:[#allocation30_spill]] %s7092_s26  ;;  %s428_s13 = sshll.u32 %s5778_s27, 4  ;;  %s429_s13 = int_to_ptr.vmem [resolvable:$true] %s428_s13 }
  0x21   : > { %s412_s25 = sshll.u32 %s7091_s4, 4  ;;  %p5921_p5 = pnand %p5224_p4, %p5905_p1  ;;  %s413_s25 = int_to_ptr.hbm [resolvable:$true] %s412_s25 }
  0x22   : > { %s7056_s4 = smov 8   ;;  %s7096_s7 = sld [smem:[#allocation47_spill]] }
  0x23   : > { %s426_s23 = sshll.u32 %s7095_s5, 4  ;;  %s7097_s9 = sld [smem:[#allocation49_spill]]  ;;  %s427_s23 = int_to_ptr.hbm [resolvable:$true] %s426_s23 }
  0x24   : > { %5227 = dma.hbm_to_vmem [thread:$0]  (!%p5921_p5), %s413_s25, 256, %s415_s28, [#allocation7], %s7054_s24, %s7054_s24, %s7056_s4  }
  0x25   : > { %5230 = dma.hbm_to_vmem [thread:$0]  (!%p5921_p5), %s427_s23, 256, %s429_s13, [#allocation10], %s7054_s24, %s7054_s24, %s7056_s4  }
  0x26   : > { %s5779_s26 = smov [#allocation12]   ;;  %s5780_s0 = smov [#allocation15]  }
  0x27   : > { %s456_s25 = sshll.u32 %s5779_s26, 4  ;;  %s484_s1 = sshll.u32 %s5780_s0, 4  ;;  %s457_s25 = int_to_ptr.vmem [resolvable:$true] %s456_s25  ;;  %s485_s1 = int_to_ptr.vmem [resolvable:$true] %s484_s1 }
  0x28   : > { %s454_s17 = sshll.u32 %s7096_s7, 4  ;;  %s7098_s11 = sld [smem:[#allocation51_spill]]  ;;  %s455_s17 = int_to_ptr.hbm [resolvable:$true] %s454_s17 }
  0x29   : > { %s482_s5 = sshll.u32 %s7097_s9, 4  ;;  %s7099_s6 = sld [smem:[#allocation46_spill]]  ;;  %s483_s5 = int_to_ptr.hbm [resolvable:$true] %s482_s5 }
  0x2a   : > { %5236 = dma.hbm_to_vmem [thread:$0]  (!%p5921_p5), %s455_s17, 256, %s457_s25, [#allocation13], %s7054_s24, %s7054_s24, %s7056_s4  }
  0x2b   : > { %5242 = dma.hbm_to_vmem [thread:$0]  (!%p5921_p5), %s483_s5, 256, %s485_s1, [#allocation16], %s7054_s24, %s7054_s24, %s7056_s4  }
  0x2c   : > { %s5781_s16 = smov [#allocation18]   ;;  %s5782_s25 = smov [#allocation11]  }
  0x2d   : > { %s512_s17 = sshll.u32 %s5781_s16, 4  ;;  %s442_s0 = sshll.u32 %s5782_s25, 4  ;;  %s513_s17 = int_to_ptr.vmem [resolvable:$true] %s512_s17  ;;  %s443_s0 = int_to_ptr.vmem [resolvable:$true] %s442_s0 }
  0x2e   : > { %s510_s13 = sshll.u32 %s7098_s11, 4  ;;  %s7100_s8 = sld [smem:[#allocation48_spill]]  ;;  %s511_s13 = int_to_ptr.hbm [resolvable:$true] %s510_s13 }
  0x2f   : > { %s440_s14 = sshll.u32 %s7099_s6, 4  ;;  %s7101_s10 = sld [smem:[#allocation50_spill]]  ;;  %s441_s14 = int_to_ptr.hbm [resolvable:$true] %s440_s14 }
  0x30   : > { %5248 = dma.hbm_to_vmem [thread:$0]  (!%p5921_p5), %s511_s13, 256, %s513_s17, [#allocation19], %s7054_s24, %s7054_s24, %s7056_s4  }
  0x31   : > { %5233 = dma.hbm_to_vmem [thread:$0]  (!%p5921_p5), %s441_s14, 256, %s443_s0, [#allocation10], %s7054_s24, %s7054_s24, %s7056_s4  }
  0x32   : > { %s5783_s13 = smov [#allocation14]   ;;  %s5784_s14 = smov [#allocation17]  }
  0x33   : > { %s470_s16 = sshll.u32 %s5783_s13, 4  ;;  %s498_s17 = sshll.u32 %s5784_s14, 4  ;;  %s471_s16 = int_to_ptr.vmem [resolvable:$true] %s470_s16  ;;  %s499_s17 = int_to_ptr.vmem [resolvable:$true] %s498_s17 }
  0x34   : > { %s468_s5 = sshll.u32 %s7100_s8, 4  ;;  %s524_s28 = sshll.u32 %s7048_s12, 4  ;;  %s469_s5 = int_to_ptr.hbm [resolvable:$true] %s468_s5  ;;  %s525_s28 = int_to_ptr.hbm [resolvable:$true] %s524_s28 }
  0x35   : > { %s496_s23 = sshll.u32 %s7101_s10, 4  ;;  %s5785_s27 = smov [#allocation20]   ;;  %s497_s23 = int_to_ptr.hbm [resolvable:$true] %s496_s23 }
  0x36   : > { %5239 = dma.hbm_to_vmem [thread:$0]  (!%p5921_p5), %s469_s5, 256, %s471_s16, [#allocation13], %s7054_s24, %s7054_s24, %s7056_s4  }
  0x37   : > { %5245 = dma.hbm_to_vmem [thread:$0]  (!%p5921_p5), %s497_s23, 256, %s499_s17, [#allocation16], %s7054_s24, %s7054_s24, %s7056_s4  }
  0x38   : > { %s526_s5 = sshll.u32 %s5785_s27, 4  ;;  %s44_s1 = sadd.s32 1, %s5765_s18  ;;  %s527_s5 = int_to_ptr.vmem [resolvable:$true] %s526_s5 }
  0x39   : > { %5251 = dma.hbm_to_vmem [thread:$0]  (!%p5921_p5), %s525_s28, 256, %s527_s5, [#allocation19], %s7054_s24, %s7054_s24, %s7056_s4  }
  0x3a   : > { %p45_p6 = scmp.ge.s32.totalorder %s44_s1, 2  ;;  %s47_s26 = sadd.s32 1, %s5769_s19 }
  0x3b   : > { %s108_s13 = sadd.s32 1, %s5753_s15  ;;  %p115_p7 = scmp.ne.s32.totalorder %s5753_s15, %s5749_s30 }
  0x3c   : > { %s7144_s1 = smov (%p45_p6, %s44_s1), 0  ;;  %s7146_s26 = smov (!%p45_p6, %s47_s26), %s5769_s19 }
  0x3d   : > { %s104_s21 = ssub.s32 %s5765_s18, %s7144_s1  ;;  %p116_p8 = scmp.eq.s32.totalorder %s5773_s20, 0 }
  0x3e   : > { %p49_p9 = scmp.ge.s32.totalorder %s7146_s26, 2  ;;  %p121_p10 = scmp.ne.s32.totalorder %s5749_s30, %s5745_s29 }
  0x3f   : > { %p6007_p11 = por %p116_p8, %p115_p7  ;;  %p5268_p12 = scmp.lt.s32.totalorder %s5773_s20, 4 }
  0x40   : > { %s7148_s26 = smov (%p49_p9, %s7146_s26), 0  ;;  %p6016_p13 = por %p5905_p1, %p121_p10 }
  0x41   : > { %s556_s14 = sand.u32 1, %s5753_s15   ;;  %s103_s17 = ssub.s32 %s5769_s19, %s7148_s26 }
  0x42   : > { %s105_s25 = sor.u32 %s104_s21, %s103_s17  ;;  %s5137_s0 = sshll.u32 %s556_s14, 5 }
  0x43   : > { %p106_p0 = scmp.eq.s32.totalorder %s105_s25, 0  ;;  %s5178_s29 = sshll.u32 %s5765_s18, 2 }
  0x44   : > { %s5140_s28 = sshll.u32 %s5769_s19, 3  ;;  %s560_s24 = scalar_lea.vmem [#allocation4], %s5137_s0 }
  0x45   : > { %s6026_s27 = scalar_select %p106_p0, %s5753_s15, %s108_s13  }
  0x46   : > { %s566_s5 = sadd.s32 %s5178_s29, %s5140_s28  ;;  %s571_s4 = sshll.u32 %s560_s24, 4  ;;  %s572_s4 = int_to_ptr.vmem [resolvable:$true] %s571_s4 }
  0x47   : > { %s5141_s6 = sshll.u32 %s566_s5, 3  ;;  %p5253_p2 = pnand %p5268_p12, %p6007_p11 }
  0x48   : > { %s568_s9 = scalar_lea.hbm %s7038_s2, %s5141_s6  ;;  %s557_s17 = scalar_lea.sflag [#allocation5], %s556_s14 }
  0x49   : > { %s569_s21 = sshll.u32 %s568_s9, 4  ;;  %s7104_s25 = smov 8   ;;  %s570_s21 = int_to_ptr.hbm [resolvable:$true] %s569_s21 }
  0x4a   : > { %s7105_s10 = smov 128   ;;  %s593_s24 = scalar_lea.hbm %s7039_s3, %s5141_s6 }
  0x4b   : > { %5255 = dma.hbm_to_vmem [thread:$0]  (!%p5253_p2), %s570_s21, 512, %s572_s4, %s557_s17, %s7105_s10, %s7105_s10, %s7104_s25  }
  0x4c   : > { %s585_s28 = scalar_lea.vmem [#allocation6], %s5137_s0  ;;  %s594_s11 = sshll.u32 %s593_s24, 4  ;;  %s595_s11 = int_to_ptr.hbm [resolvable:$true] %s594_s11 }
  0x4d   : > { %s596_s5 = sshll.u32 %s585_s28, 4  ;;  %s581_s7 = sand.u32 1, %s5773_s20   ;;  %s597_s5 = int_to_ptr.vmem [resolvable:$true] %s596_s5 }
  0x4e   : > { %s582_s8 = scalar_lea.sflag [#allocation7], %s581_s7  ;;  %608 = sbr.rel (%p5913_p3) target bundleno = 1172 (0x494), region = 72 }
  0x4f   : > { %5258 = dma.hbm_to_vmem [thread:$0]  (!%p5253_p2), %s595_s11, 512, %s597_s5, %s582_s8, %s7105_s10, %s7105_s10, %s7104_s25  }
  0x53   : > { %s610_s4 = sand.u32 1, %s5749_s30  }
  0x54   : > { %s5148_s23 = sshll.u32 %s610_s4, 5  ;;  %s611_s14 = scalar_lea.sflag [#allocation5], %s610_s4 }
  0x55   : > { %s6048_s6 = scalar_lea.vmem [#allocation4], %s5148_s23 }
  0x56   : > { %5716 = dma.done.wait (%p6016_p13), %s611_s14, 512  }
  0x57   : > { %5718 = vsyncadd (%p6016_p13), %s611_s14, 4294966784  ;;  %s7107_s0 = sadd.s32 4294967295, %s5773_s20   ;;  %s6056_s11 = scalar_lea.vmem [#allocation6], %s5148_s23 }
  0x58   : > { %s620_s21 = sand.u32 1, %s7107_s0  }
  0x59   : > { %s621_s10 = scalar_lea.sflag [#allocation7], %s620_s21 }
  0x5a   : > { %5720 = dma.done.wait (%p6016_p13), %s621_s10, 512  }
  0x5b   : > { %5722 = vsyncadd (%p6016_p13), %s621_s10, 4294966784 }
  0x5c   : > { %5724 = dma.done.wait (%p5905_p1), [#allocation7], 256  }
  0x5d   : > { %5726 = vsyncadd (%p5905_p1), [#allocation7], 4294967040 }
  0x5e   : > { %5728 = dma.done.wait (%p5905_p1), [#allocation10], 512  }
  0x5f   : > { %5730 = vsyncadd (%p5905_p1), [#allocation10], 4294966784 }
  0x60   : > { %5732 = dma.done.wait (%p5905_p1), [#allocation13], 512  }
  0x61   : > { %5734 = vsyncadd (%p5905_p1), [#allocation13], 4294966784 }
  0x62   : > { %5736 = dma.done.wait (%p5905_p1), [#allocation16], 512  }
  0x63   : > { %5738 = vsyncadd (%p5905_p1), [#allocation16], 4294966784 }
  0x64   : > { %5740 = dma.done.wait (%p5905_p1), [#allocation19], 512  }
  0x65   : > { %5742 = vsyncadd (%p5905_p1), [#allocation19], 4294966784  ;;  %s7108_s16 = sld [smem:[#allocation29_spill]]  ;;  %v761_v4 = vld [vmem:[#allocation9] sm:$0xff]  ;;  %v762_v5 = vld [vmem:[#allocation9 + $0x8] sm:$0xff] }
  0x66   : > { %s7109_s29 = sld [smem:[#allocation42_spill]]  ;;  %v763_v6 = vld [vmem:[#allocation11] sm:$0xff]  ;;  %v6108_v7 = vld [vmem:[#allocation11 + $0x8] sm:$0xff]  ;;  %v6110_v8 = vld [vmem:[#allocation12] sm:$0xff] }
  0x67   : > { %s7110_s7 = sld [smem:[#allocation43_spill]]  ;;  %v6112_v9 = vld [vmem:[#allocation12 + $0x8] sm:$0xff]  ;;  %v6114_v10 = vld [vmem:[#allocation14] sm:$0xff]  ;;  %v6116_v11 = vld [vmem:[#allocation14 + $0x8] sm:$0xff] }
  0x68   : > { %s7111_s23 = sld [smem:[#allocation52_spill]]  ;;  %7113 = vst [vmem:[#allocation31_spill] sm:$0xff] %v6114_v10  ;;  %v6118_v12 = vld [vmem:[#allocation15] sm:$0xff]  ;;  %v6120_v13 = vld [vmem:[#allocation15 + $0x8] sm:$0xff]  ;;  %v6122_v14 = vld [vmem:[#allocation17] sm:$0xff] }
  0x69   : > { %s7112_s21 = sld [smem:[#allocation53_spill]]  ;;  %7114 = vst [vmem:[#allocation32_spill] sm:$0xff] %v6116_v11  ;;  %v6124_v15 = vld [vmem:[#allocation17 + $0x8] sm:$0xff]  ;;  %v6126_v16 = vld [vmem:[#allocation18] sm:$0xff]  ;;  %v6128_v17 = vld [vmem:[#allocation18 + $0x8] sm:$0xff] }
  0x6a   : > { %v6130_v18 = vld [vmem:[#allocation20] sm:$0xff]  ;;  %v6132_v19 = vld [vmem:[#allocation20 + $0x8] sm:$0xff] }
  0x6b   : > { %p735_p3 = scmp.lt.s32.totalorder %s7108_s16, 1 }
  0x6d   : > { %s7150_s16 = smov (!%p735_p3, %s7108_s16), 1 }
  0x6e   : > { %s5180_s17 = sshll.u32 %s7150_s16, 4  ;;  %s7115_s16 = sld [smem:[#allocation28_spill]] }
  0x6f   : > { %s739_s24 = scalar_lea.vmem %s7109_s29, %s5180_s17  ;;  %s744_s8 = scalar_lea.vmem %s7110_s7, %s5180_s17 }
  0x70   : > { %s6093_s14 = scalar_lea.vmem %s7111_s23, %s5180_s17  ;;  %s6098_s10 = scalar_lea.vmem %s7112_s21, %s5180_s17  ;;  %v6100_v0 = vld [vmem:[%s739_s24] sm:$0xff]  ;;  %v6102_v1 = vld [vmem:[%s739_s24 + $0x8] sm:$0xff] }
  0x71   : > { %v6104_v2 = vld [vmem:[%s744_s8] sm:$0xff]  ;;  %v6106_v3 = vld [vmem:[%s744_s8 + $0x8] sm:$0xff] }
  0x74   : > { %p5167_p1 = scmp.ne.s32.totalorder %s7115_s16, 0 }
  0x76   : > { %780 = sbr.rel (%p5167_p1) target bundleno = 129 (0x81), region = 120 }
  0x7b   : > { %v781_v20 = vmul.f32 0.05, %v6100_v0  ;;  %vm783_vm0 = vcmask 130048   ;;  %v782_v21 = vmul.f32 0.05, %v6102_v1 }
  0x7c   : > { %v786_v22 = vmul.f32 0.05, %v6104_v2  ;;  %v787_v23 = vmul.f32 0.05, %v6106_v3 }
  0x7d   : > { %784 = vst.msk [vmem:[%s6093_s14] sm:$0xff] %vm783_vm0, %v781_v20 }
  0x7e   : > { %785 = vst.msk [vmem:[%s6093_s14 + $0x8] sm:$0xff] %vm783_vm0, %v782_v21 }
  0x7f   : > { %788 = vst.msk [vmem:[%s6098_s10] sm:$0xff] %vm783_vm0, %v786_v22 }
  0x80   : > { %789 = vst.msk [vmem:[%s6098_s10 + $0x8] sm:$0xff] %vm783_vm0, %v787_v23 }
  0x81 PF: > { %v791_v24 = vld [vmem:[%s6048_s6 + $0x8] sm:$0xff]  ;;  %v790_v26 = vld [vmem:[%s6048_s6] sm:$0xff]  ;;  %vm806_vm1 = vcmask 130048  }
  0x82   : > { %v793_v25 = vld [vmem:[%s6056_s11 + $0x8] sm:$0xff]  ;;  %v795_v27 = vmul.f32 %v791_v24, %v6102_v1  ;;  %v792_v29 = vld [vmem:[%s6056_s11] sm:$0xff]  ;;  %v794_v30 = vmul.f32 %v790_v26, %v6100_v0  ;;  %v808_v31 = vsel %vm806_vm1, %v761_v4, 0  ;;  %v811_v34 = vsel %vm806_vm1, %v762_v5, 0 }
  0x83   : > { %v797_v28 = vmul.f32 %v793_v25, %v6106_v3  ;;  %v796_v32 = vmul.f32 %v792_v29, %v6104_v2  ;;  %v6152_v33 = vand.u32 4294901760, %v808_v31  ;;  %v801_v35 = vmul.f32 %v791_v24, %v6106_v3 }
  0x84   : > { %v6158_v37 = vand.u32 4294901760, %v811_v34  ;;  %v803_v38 = vmul.f32 %v793_v25, %v6102_v1  ;;  %v800_v39 = vmul.f32 %v790_v26, %v6104_v2  ;;  %v802_v42 = vmul.f32 %v792_v29, %v6100_v0 }
  0x85   : > { %v6156_v36 = vsub.f32 %v795_v27, %v797_v28  ;;  %v6162_v40 = vsub.f32 %v794_v30, %v796_v32  ;;  %v6165_v41 = vsub.f32 %v808_v31, %v6152_v33  ;;  %v1004_v43 = vsel %vm806_vm1, %v763_v6, 0 }
  0x86   : > { %7116 = vst [vmem:[#allocation33_spill] sm:$0xff] %v6158_v37  ;;  %v6171_v45 = vsub.f32 %v811_v34, %v6158_v37  ;;  %v805_v46 = vadd.f32 %v803_v38, %v801_v35  ;;  %v804_v49 = vadd.f32 %v802_v42, %v800_v39  ;;  %v6178_v52 = vand.u32 4294901760, %v1004_v43 }
  0x87   : > { %v827_v44 = vand.u32 4294901760, %v6156_v36  ;;  %v829_v47 = vand.u32 4294901760, %v6162_v40  ;;  %v6175_v48 = vand.u32 4294901760, %v6165_v41  ;;  %v1007_v23 = vsel %vm806_vm1, %v6108_v7, 0 }
  0x88   : > { %v1023_v51 = vand.u32 4294901760, %v805_v46  ;;  %7117 = vst [vmem:[#allocation34_spill] sm:$0xff] %v6178_v52  ;;  %v6184_v55 = vand.u32 4294901760, %v6171_v45  ;;  %v1025_v56 = vand.u32 4294901760, %v804_v49  ;;  %v6194_v6 = vsub.f32 %v1004_v43, %v6178_v52 }
  0x89   : > { %828 = vmatpush.msra.mxu0 %v827_v44  ;;  %v863_v50 = vsub.f32 %v6156_v36, %v827_v44  ;;  %929 = vmatpush.msra.mxu3 %v827_v44  ;;  %v834_v53 = vsub.f32 %v6165_v41, %v6175_v48  ;;  %v869_v54 = vsub.f32 %v6162_v40, %v829_v47  ;;  %v6203_v29 = vand.u32 4294901760, %v1007_v23 }
  0x8a   : > { %v1059_v58 = vsub.f32 %v805_v46, %v1023_v51  ;;  %v1065_v61 = vsub.f32 %v804_v49, %v1025_v56  ;;  %v842_v5 = vsub.f32 %v6171_v45, %v6184_v55  ;;  %7118 = vst [vmem:[#allocation35_spill] sm:$0xff] %v6194_v6  ;;  %v6201_v28 = vand.u32 4294901760, %v6194_v6 }
  0x8b   : > { %830 = vmatpush.msra.mxu0 %v829_v47  ;;  %899 = vmatpush.msra.mxu2 %v863_v50  ;;  %v864_v57 = vand.u32 4294901760, %v863_v50  ;;  %v6186_v59 = vand.u32 4294901760, %v834_v53  ;;  %v870_v60 = vand.u32 4294901760, %v869_v54  ;;  %7120 = vst [vmem:[#allocation37_spill] sm:$0xff] %v6203_v29  ;;  %v1200_v7 = vadd.f32 %v805_v46, %v6156_v36 }
  0x8c   : > { %931 = vmatpush.msra.mxu3 %v829_v47  ;;  %v1060_v63 = vand.u32 4294901760, %v1059_v58  ;;  %v1066_v20 = vand.u32 4294901760, %v1065_v61  ;;  %v6198_v27 = vand.u32 4294901760, %v842_v5  ;;  %7119 = vst [vmem:[#allocation36_spill] sm:$0xff] %v6201_v28  ;;  %v1030_v31 = vsub.f32 %v6194_v6, %v6201_v28 }
  0x8d   : > { %902 = vmatpush.msra.mxu2 %v869_v54  ;;  %v865_v62 = vsub.f32 %v863_v50, %v864_v57  ;;  %935 = vmatmul.f32.vlgmr.msra.gmra.mxu3 %v6175_v48  ;;  %v871_v4 = vsub.f32 %v869_v54, %v870_v60  ;;  %v6213_v32 = vsub.f32 %v1007_v23, %v6203_v29  ;;  %v6215_v34 = vand.u32 4294901760, %v1200_v7  ;;  %v6236_v50 = vld [vmem:[%s6048_s6 + $0x18] sm:$0xff] }
  0x8e   : > { %836 = vmatmul.f32.vlgmr.msra.gmra.mxu0 %v6186_v59  ;;  %905 = vmatmul.f32.vlgmr.msra.gmra.mxu2 %v6165_v41  ;;  %v1061_v22 = vsub.f32 %v1059_v58, %v1060_v63  ;;  %v1067_v25 = vsub.f32 %v1065_v61, %v1066_v20  ;;  %v1199_v35 = vadd.f32 %v804_v49, %v6162_v40  ;;  %v6221_v39 = vand.u32 4294901760, %v1030_v31 }
  0x8f   : > { %v866_v21 = vand.u32 4294901760, %v865_v62  ;;  %962 = vmatpush.msrb.mxu0 %v864_v57  ;;  %1024 = vmatpush.msrb.mxu2 %v1023_v51  ;;  %v872_v24 = vand.u32 4294901760, %v871_v4  ;;  %7121 = vst [vmem:[#allocation38_spill] sm:$0xff] %v6213_v32  ;;  %v1257_v38 = vsub.f32 %v1200_v7, %v6215_v34  ;;  %v6224_v42 = vand.u32 4294901760, %v6213_v32 }
  0x90   : > { %v1062_v26 = vand.u32 4294901760, %v1061_v22  ;;  %v1068_v30 = vand.u32 4294901760, %v1067_v25  ;;  %v6218_v36 = vand.u32 4294901760, %v1199_v35  ;;  %7122 = vst [vmem:[#allocation39_spill] sm:$0xff] %v6221_v39  ;;  %v1414_v54 = vmul.f32 %v6236_v50, %v6102_v1 }
  0x91   : > { %867 = vmatpush.msra.mxu1 %v866_v21  ;;  %966 = vmatpush.msrb.mxu0 %v870_v60  ;;  %7123 = vst [vmem:[#allocation40_spill] sm:$0xff] %v6224_v42  ;;  %v1258_v40 = vand.u32 4294901760, %v1257_v38  ;;  %v6253_v60 = vld [vmem:[%s6056_s11 + $0x10] sm:$0xff]  ;;  %v1202_v21 = vsel %vm806_vm1, %v6110_v8, 0 }
  0x92   : > { %1026 = vmatpush.msrb.mxu2 %v1025_v56  ;;  %1063 = vmatpush.msrb.mxu3 %v1062_v26  ;;  %v1263_v43 = vsub.f32 %v1199_v35, %v6218_v36  ;;  %v1415_v4 = vmul.f32 %v6253_v60, %v6104_v2  ;;  %v6273_v26 = vand.u32 4294901760, %v1202_v21 }
  0x93   : > { %1095 = vmatpush.msra.mxu0 %v1059_v58  ;;  %873 = vmatpush.msra.mxu1 %v872_v24  ;;  %v6250_v58 = vld [vmem:[%s6048_s6 + $0x10] sm:$0xff] }
  0x94   : > { %875 = vmatmul.f32.vlgmr.msra.gmra.mxu1 %v6152_v33  ;;  %1069 = vmatpush.msrb.mxu3 %v1068_v30  ;;  %v1264_v46 = vand.u32 4294901760, %v1263_v43  ;;  %v6280_v8 = vsub.f32 %v1202_v21, %v6273_v26 }
  0x95   : > { %1098 = vmatpush.msra.mxu0 %v1065_v61  ;;  %941 = vmatmul.f32.gmra.mxu3 %v6184_v55 }
  0x96   : > { %991 = vmatpush.msrb.mxu1 %v827_v44  ;;  %844 = vmatmul.f32.gmra.mxu0 %v6198_v27  ;;  %v1259_v44 = vsub.f32 %v1257_v38, %v1258_v40  ;;  %v1265_v49 = vsub.f32 %v1263_v43, %v1264_v46 }
  0x97   : > { %910 = vmatmul.f32.gmra.mxu2 %v6171_v45  ;;  %1187 = vmatpush.msra.mxu3 %v1023_v51 }
  0x98   : > { %993 = vmatpush.msrb.mxu1 %v829_v47  ;;  %1158 = vmatpush.msra.mxu2 %v1060_v63  ;;  %v1038_v47 = vsub.f32 %v6213_v32, %v6224_v42  ;;  %v1260_v53 = vand.u32 4294901760, %v1259_v44  ;;  %v1266_v61 = vand.u32 4294901760, %v1265_v49  ;;  %v1413_v63 = vmul.f32 %v6250_v58, %v6100_v0 }
  0x99   : > { %1189 = vmatpush.msra.mxu3 %v1025_v56  ;;  %v6285_v44 = vand.u32 4294901760, %v6280_v8 }
  0x9a   : > { %1125 = vmatpush.msra.mxu1 %v1023_v51  ;;  %1162 = vmatpush.msra.mxu2 %v1066_v20  ;;  %v6239_v51 = vld [vmem:[%s6056_s11 + $0x18] sm:$0xff]  ;;  %v6246_v57 = vand.u32 4294901760, %v1038_v47  ;;  %v6264_v20 = vsub.f32 %v1413_v63, %v1415_v4  ;;  %v1421_v63 = vmul.f32 %v6253_v60, %v6100_v0 }
  0x9c   : > { %1127 = vmatpush.msra.mxu1 %v1025_v56  ;;  %v1416_v56 = vmul.f32 %v6239_v51, %v6106_v3  ;;  %7124 = vst [vmem:[#allocation41_spill] sm:$0xff] %v6246_v57  ;;  %v1441_v22 = vand.u32 4294901760, %v6264_v20 }
  0x9d   : > { %879 = vmatmul.f32.gmra.mxu1 %v6158_v37  ;;  %1071 = vmatmul.f32.vlgmr.msrb.gmra.mxu3 %v6178_v52 }
  0x9e   : > { %968 = vmatmul.f32.vlgmr.msrb.gmra.mxu0 %v6152_v33  ;;  %1323 = vmatpush.msrb.mxu3 %v6215_v34  ;;  %v6255_v62 = vsub.f32 %v1414_v54, %v1416_v56  ;;  %v1481_v25 = vsub.f32 %v6264_v20, %v1441_v22  ;;  %v1422_v54 = vmul.f32 %v6239_v51, %v6102_v1 }
  0x9f   : > { %1032 = vmatmul.f32.vlgmr.msrb.gmra.mxu2 %v6221_v39  ;;  %1222 = vmatpush.msrb.mxu0 %v6215_v34 }
  0xa0   : > { %1293 = vmatpush.msrb.mxu2 %v1257_v38  ;;  %1325 = vmatpush.msrb.mxu3 %v6218_v36  ;;  %v1439_v5 = vand.u32 4294901760, %v6255_v62  ;;  %v1482_v7 = vand.u32 4294901760, %v1481_v25  ;;  %v1205_v38 = vsel %vm806_vm1, %v6112_v9, 0  ;;  %v1228_v9 = vsub.f32 %v6280_v8, %v6285_v44 }
  0xa1   : > { %1224 = vmatpush.msrb.mxu0 %v6218_v36  ;;  %v6287_v47 = vand.u32 4294901760, %v1205_v38 }
  0xa2   : > { %1296 = vmatpush.msrb.mxu2 %v1263_v43  ;;  %v1475_v23 = vsub.f32 %v6255_v62, %v1439_v5  ;;  %v1483_v35 = vsub.f32 %v1481_v25, %v1482_v7 }
  0xa4   : > { %v1476_v24 = vand.u32 4294901760, %v1475_v23  ;;  %v1484_v43 = vand.u32 4294901760, %v1483_v35 }
  0xa5   : > { %995 = vmatmul.f32.vlgmr.msrb.gmra.mxu1 %v6152_v33  ;;  %1075 = vmatmul.f32.gmra.mxu3 %v6203_v29 }
  0xa6   : > { %1261 = vmatpush.msrb.mxu1 %v1260_v53  ;;  %972 = vmatmul.f32.gmra.mxu0 %v6158_v37  ;;  %v1477_v30 = vsub.f32 %v1475_v23, %v1476_v24  ;;  %v1420_v53 = vmul.f32 %v6236_v50, %v6106_v3 }
  0xa7   : > { %1040 = vmatmul.f32.gmra.mxu2 %v6246_v57 }
  0xa8   : > { %1267 = vmatpush.msrb.mxu1 %v1266_v61  ;;  %v1478_v31 = vand.u32 4294901760, %v1477_v30  ;;  %v1424_v56 = vadd.f32 %v1422_v54, %v1420_v53  ;;  %v1419_v61 = vmul.f32 %v6250_v58, %v6104_v2 }
  0xaa   : > { %v1629_v3 = vand.u32 4294901760, %v1424_v56  ;;  %v1423_v50 = vadd.f32 %v1421_v63, %v1419_v61  ;;  %v6375_v63 = vand.u32 4294901760, %v6118_v12 }
  0xac   : > { %v1631_v1 = vand.u32 4294901760, %v1423_v50  ;;  %v1665_v51 = vsub.f32 %v1424_v56, %v1629_v3 }
  0xad   : > { %999 = vmatmul.f32.gmra.mxu1 %v6158_v37  ;;  %1191 = vmatmul.f32.vlgmr.msra.gmra.mxu3 %v6178_v52 }
  0xae   : > { %1101 = vmatmul.f32.vlgmr.msra.gmra.mxu0 %v6194_v6  ;;  %1479 = vmatpush.msra.mxu3 %v1478_v31  ;;  %v1671_v4 = vsub.f32 %v1423_v50, %v1631_v1  ;;  %v1666_v21 = vand.u32 4294901760, %v1665_v51 }
  0xaf   : > { %1164 = vmatmul.f32.vlgmr.msra.gmra.mxu2 %v6178_v52  ;;  %1356 = vmatpush.msra.mxu0 %v1258_v40  ;;  %v6297_v40 = vsub.f32 %v1205_v38, %v6287_v47 }
  0xb0   : > { %1440 = vmatpush.msra.mxu2 %v1439_v5  ;;  %1485 = vmatpush.msra.mxu3 %v1484_v43  ;;  %v1672_v2 = vand.u32 4294901760, %v1671_v4 }
  0xb1   : > { %1360 = vmatpush.msra.mxu0 %v1264_v46  ;;  %v6300_v46 = vand.u32 4294901760, %v1228_v9  ;;  %v6303_v49 = vand.u32 4294901760, %v6297_v40 }
  0xb2   : > { %1442 = vmatpush.msra.mxu2 %v1441_v22  ;;  %v1673_v0 = vsub.f32 %v1671_v4, %v1672_v2 }
  0xb4   : > { %v1674_v60 = vand.u32 4294901760, %v1673_v0 }
  0xb5   : > { %1131 = vmatmul.f32.vlgmr.msra.gmra.mxu1 %v6201_v28  ;;  %1195 = vmatmul.f32.gmra.mxu3 %v6203_v29 }
  0xb6   : > { %1385 = vmatpush.msra.mxu1 %v6215_v34  ;;  %1106 = vmatmul.f32.gmra.mxu0 %v6213_v32  ;;  %v1236_v34 = vsub.f32 %v6297_v40, %v6303_v49 }
  0xb7   : > { %1168 = vmatmul.f32.gmra.mxu2 %v6203_v29 }
  0xb8   : > { %1387 = vmatpush.msra.mxu1 %v6218_v36  ;;  %v6311_v36 = vand.u32 4294901760, %v1236_v34 }
  0xbd   : > { %1137 = vmatmul.f32.gmra.mxu1 %v6224_v42  ;;  %1329 = vmatmul.f32.vlgmr.msrb.gmra.mxu3 %v6285_v44 }
  0xbe   : > { %1230 = vmatmul.f32.vlgmr.msrb.gmra.mxu0 %v6300_v46  ;;  %1603 = vmatpush.msrb.mxu3 %v1439_v5 }
  0xbf   : > { %1299 = vmatmul.f32.vlgmr.msrb.gmra.mxu2 %v6280_v8  ;;  %1511 = vmatpush.msrb.mxu0 %v1475_v23 }
  0xc0   : > { %1574 = vmatpush.msrb.mxu2 %v1476_v24  ;;  %1605 = vmatpush.msrb.mxu3 %v1441_v22  ;;  %v1805_v24 = vadd.f32 %v1423_v50, %v6264_v20 }
  0xc1   : > { %1514 = vmatpush.msrb.mxu0 %v1481_v25 }
  0xc2   : > { %1578 = vmatpush.msrb.mxu2 %v1482_v7  ;;  %v1823_v30 = vand.u32 4294901760, %v1805_v24 }
  0xc4   : > { %v1863_v31 = vsub.f32 %v1805_v24, %v1823_v30 }
  0xc5   : > { %1269 = vmatmul.f32.vlgmr.msrb.gmra.mxu1 %v6273_v26  ;;  %1335 = vmatmul.f32.gmra.mxu3 %v6303_v49 }
  0xc6   : > { %1541 = vmatpush.msrb.mxu1 %v1439_v5  ;;  %1238 = vmatmul.f32.gmra.mxu0 %v6311_v36  ;;  %v1667_v5 = vsub.f32 %v1665_v51, %v1666_v21  ;;  %v1864_v38 = vand.u32 4294901760, %v1863_v31 }
  0xc7   : > { %1304 = vmatmul.f32.gmra.mxu2 %v6297_v40 }
  0xc8   : > { %1543 = vmatpush.msrb.mxu1 %v1441_v22  ;;  %v1668_v58 = vand.u32 4294901760, %v1667_v5  ;;  %v1806_v22 = vadd.f32 %v1424_v56, %v6255_v62  ;;  %v1865_v43 = vsub.f32 %v1863_v31, %v1864_v38  ;;  %v6368_v56 = vand.u32 4294901760, %v6120_v13 }
  0xca   : > { %v1821_v23 = vand.u32 4294901760, %v1806_v22  ;;  %v1866_v20 = vand.u32 4294901760, %v1865_v43 }
  0xcc   : > { %v1857_v25 = vsub.f32 %v1806_v22, %v1821_v23 }
  0xcd   : > { %1273 = vmatmul.f32.gmra.mxu1 %v6287_v47  ;;  %1487 = vmatmul.f32.vlgmr.msra.gmra.mxu3 %v6152_v33 }
  0xce   : > { %1362 = vmatmul.f32.vlgmr.msra.gmra.mxu0 %v6273_v26  ;;  %1731 = vmatpush.msra.mxu3 %v1629_v3  ;;  %v1858_v7 = vand.u32 4294901760, %v1857_v25 }
  0xcf   : > { %1448 = vmatmul.f32.vlgmr.msra.gmra.mxu2 %v6186_v59  ;;  %1630 = vmatpush.msra.mxu0 %v1629_v3 }
  0xd0   : > { %1701 = vmatpush.msra.mxu2 %v1665_v51  ;;  %1733 = vmatpush.msra.mxu3 %v1631_v1  ;;  %v1859_v35 = vsub.f32 %v1857_v25, %v1858_v7 }
  0xd1   : > { %1632 = vmatpush.msra.mxu0 %v1631_v1 }
  0xd2   : > { %1704 = vmatpush.msra.mxu2 %v1671_v4  ;;  %v1860_v62 = vand.u32 4294901760, %v1859_v35 }
  0xd5   : > { %1389 = vmatmul.f32.vlgmr.msra.gmra.mxu1 %v6273_v26  ;;  %1491 = vmatmul.f32.gmra.mxu3 %v6158_v37 }
  0xd6   : > { %1669 = vmatpush.msra.mxu1 %v1668_v58  ;;  %1366 = vmatmul.f32.gmra.mxu0 %v6287_v47 }
  0xd7   : > { %1456 = vmatmul.f32.gmra.mxu2 %v6198_v27 }
  0xd8   : > { %1675 = vmatpush.msra.mxu1 %v1674_v60 }
  0xdd   : > { %1393 = vmatmul.f32.gmra.mxu1 %v6287_v47  ;;  %1607 = vmatmul.f32.vlgmr.msrb.gmra.mxu3 %v6152_v33 }
  0xde   : > { %1517 = vmatmul.f32.vlgmr.msrb.gmra.mxu0 %v6165_v41  ;;  %1861 = vmatpush.msrb.mxu3 %v1860_v62 }
  0xdf   : > { %1580 = vmatmul.f32.vlgmr.msrb.gmra.mxu2 %v6152_v33  ;;  %1764 = vmatpush.msrb.mxu0 %v1666_v21 }
  0xe0   : > { %1822 = vmatpush.msrb.mxu2 %v1821_v23  ;;  %1867 = vmatpush.msrb.mxu3 %v1866_v20 }
  0xe1   : > { %1768 = vmatpush.msrb.mxu0 %v1672_v2 }
  0xe2   : > { %1824 = vmatpush.msrb.mxu2 %v1823_v30 }
  0xe5   : > { %1547 = vmatmul.f32.vlgmr.msrb.gmra.mxu1 %v6175_v48  ;;  %1611 = vmatmul.f32.gmra.mxu3 %v6158_v37 }
  0xe6   : > { %1793 = vmatpush.msrb.mxu1 %v1629_v3  ;;  %1522 = vmatmul.f32.gmra.mxu0 %v6171_v45 }
  0xe7   : > { %1584 = vmatmul.f32.gmra.mxu2 %v6158_v37  ;;  %v6614_v37 = vld [vmem:[#allocation8] sm:$0xff] }
  0xe8   : > { %1795 = vmatpush.msrb.mxu1 %v1631_v1 }
  0xed   : > { %1553 = vmatmul.f32.gmra.mxu1 %v6184_v55  ;;  %1737 = vmatmul.f32.vlgmr.msra.gmra.mxu3 %v6201_v28 }
  0xee   : > { %1638 = vmatmul.f32.vlgmr.msra.gmra.mxu0 %v6221_v39  ;;  %1985 = vmatpush.msra.mxu3 %v1821_v23 }
  0xef   : > { %1707 = vmatmul.f32.vlgmr.msra.gmra.mxu2 %v6194_v6  ;;  %1893 = vmatpush.msra.mxu0 %v1857_v25 }
  0xf0   : > { %1956 = vmatpush.msra.mxu2 %v1858_v7  ;;  %1987 = vmatpush.msra.mxu3 %v1823_v30 }
  0xf1   : > { %1896 = vmatpush.msra.mxu0 %v1863_v31 }
  0xf2   : > { %1960 = vmatpush.msra.mxu2 %v1864_v38 }
  0xf5   : > { %1677 = vmatmul.f32.vlgmr.msra.gmra.mxu1 %v6178_v52  ;;  %1743 = vmatmul.f32.gmra.mxu3 %v6224_v42 }
  0xf6   : > { %1923 = vmatpush.msra.mxu1 %v1821_v23  ;;  %1646 = vmatmul.f32.gmra.mxu0 %v6246_v57 }
  0xf7   : > { %1712 = vmatmul.f32.gmra.mxu2 %v6213_v32 }
  0xf8   : > { %1925 = vmatpush.msra.mxu1 %v1823_v30 }
  0xfd   : > { %1681 = vmatmul.f32.gmra.mxu1 %v6203_v29  ;;  %1869 = vmatmul.f32.vlgmr.msrb.gmra.mxu3 %v6273_v26 }
  0xfe   : > { %1770 = vmatmul.f32.vlgmr.msrb.gmra.mxu0 %v6178_v52  ;;  %2177 = vmatpush.msrb.mxu3 %v6368_v56 }
  0xff   : > { %1830 = vmatmul.f32.vlgmr.msrb.gmra.mxu2 %v6300_v46  ;;  %2042 = vmatpush.msrb.mxu0 %v6368_v56 }
 0x100   : > { %2179 = vmatpush.msrb.mxu3 %v6375_v63 }
 0x101   : > { %2044 = vmatpush.msrb.mxu0 %v6375_v63 }
 0x105   : > { %1797 = vmatmul.f32.vlgmr.msrb.gmra.mxu1 %v6178_v52  ;;  %1873 = vmatmul.f32.gmra.mxu3 %v6287_v47 }
 0x106   : > { %1774 = vmatmul.f32.gmra.mxu0 %v6203_v29 }
 0x107   : > { %1838 = vmatmul.f32.gmra.mxu2 %v6311_v36 }
 0x10b   : > { %v837_v9 = vpop.f32.mrf.mxu0 }
 0x10d   : > { %1801 = vmatmul.f32.gmra.mxu1 %v6203_v29  ;;  %1989 = vmatmul.f32.vlgmr.msra.gmra.mxu3 %v6273_v26 }
 0x10e   : > { %1899 = vmatmul.f32.vlgmr.msra.gmra.mxu0 %v6280_v8 }
 0x10f   : > { %1962 = vmatmul.f32.vlgmr.msra.gmra.mxu2 %v6273_v26  ;;  %v6372_v26 = vsub.f32 %v6120_v13, %v6368_v56 }
 0x110   : > { %v936_v34 = vpop.f32.mrf.mxu3 }
 0x111   : > { %v876_v53 = vpop.f32.mrf.mxu1  ;;  %v906_v46 = vpop.f32.mrf.mxu2  ;;  %2137 = vmatpush.msrb.mxu2 %v6372_v26 }
 0x112   : > { %v877_v58 = vadd.f32 %v876_v53, %v837_v9 }
 0x113   : > { %v845_v54 = vpop.f32.mrf.mxu0 }
 0x114   : > { %v907_v23 = vadd.f32 %v906_v46, %v877_v58 }
 0x115   : > { %1929 = vmatmul.f32.vlgmr.msra.gmra.mxu1 %v6285_v44  ;;  %1993 = vmatmul.f32.gmra.mxu3 %v6287_v47 }
 0x116   : > { %1904 = vmatmul.f32.gmra.mxu0 %v6297_v40  ;;  %v6385_v40 = vsub.f32 %v6118_v12, %v6375_v63  ;;  %v937_v31 = vadd.f32 %v936_v34, %v907_v23 }
 0x117   : > { %1966 = vmatmul.f32.gmra.mxu2 %v6287_v47  ;;  %v6381_v47 = vand.u32 4294901760, %v6372_v26 }
 0x118   : > { %v942_v36 = vpop.f32.mrf.mxu3  ;;  %v6393_v3 = vand.u32 4294901760, %v6385_v40  ;;  %2140 = vmatpush.msrb.mxu2 %v6385_v40 }
 0x119   : > { %v2095_v13 = vsub.f32 %v6372_v26, %v6381_v47  ;;  %2222 = vmatpush.msra.mxu0 %v6381_v47 }
 0x11a   : > { %v880_v61 = vpop.f32.mrf.mxu1  ;;  %v911_v8 = vpop.f32.mrf.mxu2  ;;  %v2101_v12 = vsub.f32 %v6385_v40, %v6393_v3 }
 0x11b   : > { %v969_v44 = vpop.f32.mrf.mxu0  ;;  %v6397_v50 = vand.u32 4294901760, %v2095_v13  ;;  %2226 = vmatpush.msra.mxu0 %v6393_v3  ;;  %v881_v35 = vadd.f32 %v880_v61, %v845_v54 }
 0x11c   : > { %v6403_v4 = vand.u32 4294901760, %v2101_v12  ;;  %v970_v43 = vadd.f32 %v969_v44, %v937_v31 }
 0x11d   : > { %1935 = vmatmul.f32.gmra.mxu1 %v6303_v49  ;;  %v912_v12 = vadd.f32 %v911_v8, %v881_v35 }
 0x11e   : > { %2097 = vmatpush.msrb.mxu1 %v6397_v50 }
 0x11f   : > { %v943_v46 = vadd.f32 %v942_v36, %v912_v12 }
 0x120   : > { %v1072_v49 = vpop.f32.mrf.mxu3  ;;  %2103 = vmatpush.msrb.mxu1 %v6403_v4 }
 0x122   : > { %v996_v1 = vpop.f32.mrf.mxu1  ;;  %v1033_v51 = vpop.f32.mrf.mxu2  ;;  %2259 = vmatpush.msra.mxu1 %v6368_v56 }
 0x123   : > { %v973_v21 = vpop.f32.mrf.mxu0  ;;  %v1073_v22 = vadd.f32 %v1072_v49, %v1033_v51  ;;  %v997_v29 = vadd.f32 %v996_v1, %v970_v43 }
 0x124   : > { %2261 = vmatpush.msra.mxu1 %v6375_v63  ;;  %v974_v34 = vadd.f32 %v973_v21, %v943_v46 }
 0x128   : > { %v1076_v5 = vpop.f32.mrf.mxu3 }
 0x12a   : > { %v1000_v2 = vpop.f32.mrf.mxu1  ;;  %v1041_v0 = vpop.f32.mrf.mxu2 }
 0x12b   : > { %v1102_v60 = vpop.f32.mrf.mxu0  ;;  %v1077_v20 = vadd.f32 %v1076_v5, %v1041_v0  ;;  %v1001_v61 = vadd.f32 %v1000_v2, %v974_v34 }
 0x12c   : > { %v1103_v24 = vadd.f32 %v1102_v60, %v1073_v22 }
 0x130   : > { %v1192_v25 = vpop.f32.mrf.mxu3 }
 0x132   : > { %v1132_v30 = vpop.f32.mrf.mxu1  ;;  %v1165_v7 = vpop.f32.mrf.mxu2 }
 0x133   : > { %v1133_v38 = vadd.f32 %v1132_v30, %v1103_v24  ;;  %v1107_v62 = vpop.f32.mrf.mxu0 }
 0x134   : > { %v1108_v42 = vadd.f32 %v1107_v62, %v1077_v20 }
 0x135   : > { %v1166_v13 = vadd.f32 %v1165_v7, %v1133_v38 }
 0x137   : > { %v1193_v32 = vadd.f32 %v1192_v25, %v1166_v13 }
 0x138   : > { %v1196_v9 = vpop.f32.mrf.mxu3 }
 0x139   : > { %v1397_v52 = vsub.f32 %v997_v29, %v1193_v32 }
 0x13a   : > { %v1138_v53 = vpop.f32.mrf.mxu1  ;;  %v1169_v49 = vpop.f32.mrf.mxu2 }
 0x13b   : > { %1403 = vst.msk [vmem:[#allocation2] sm:$0xff] %vm806_vm1, %v1397_v52  ;;  %v1139_v51 = vadd.f32 %v1138_v53, %v1108_v42  ;;  %v1231_v58 = vpop.f32.mrf.mxu0 }
 0x13d   : > { %v1170_v54 = vadd.f32 %v1169_v49, %v1139_v51 }
 0x13f   : > { %v1197_v60 = vadd.f32 %v1196_v9, %v1170_v54 }
 0x140   : > { %v1330_v5 = vpop.f32.mrf.mxu3 }
 0x141   : > { %v1398_v44 = vsub.f32 %v1001_v61, %v1197_v60 }
 0x142   : > { %v1270_v0 = vpop.f32.mrf.mxu1  ;;  %v1300_v8 = vpop.f32.mrf.mxu2  ;;  %v6409_v1 = vld [vmem:[#allocation2] sm:$0xff] }
 0x143   : > { %1404 = vst.msk [vmem:[#allocation2 + $0x8] sm:$0xff] %vm806_vm1, %v1398_v44  ;;  %v2016_v22 = vsel %vm806_vm1, %v6409_v1, 0  ;;  %v1239_v36 = vpop.f32.mrf.mxu0  ;;  %v1271_v42 = vadd.f32 %v1270_v0, %v1231_v58 }
 0x144   : > { %v6414_v23 = vand.u32 4294901760, %v2016_v22 }
 0x145   : > { %v1301_v31 = vadd.f32 %v1300_v8, %v1271_v42 }
 0x146   : > { %2105 = vmatmul.f32.vlgmr.msrb.gmra.mxu1 %v6414_v23  ;;  %v2046_v52 = vsub.f32 %v2016_v22, %v6414_v23 }
 0x147   : > { %v1331_v13 = vadd.f32 %v1330_v5, %v1301_v31 }
 0x148   : > { %2143 = vmatmul.f32.vlgmr.msrb.gmra.mxu2 %v2046_v52  ;;  %v2047_v21 = vand.u32 4294901760, %v2046_v52  ;;  %v1336_v2 = vpop.f32.mrf.mxu3 }
 0x14a   : > { %v1274_v24 = vpop.f32.mrf.mxu1  ;;  %2183 = vmatmul.f32.vlgmr.msrb.gmra.mxu3 %v2047_v21  ;;  %v1305_v25 = vpop.f32.mrf.mxu2  ;;  %v2048_v30 = vsub.f32 %v2046_v52, %v2047_v21  ;;  %v6418_v7 = vld [vmem:[#allocation2 + $0x8] sm:$0xff] }
 0x14b   : > { %v2019_v35 = vsel %vm806_vm1, %v6418_v7, 0  ;;  %v1363_v38 = vpop.f32.mrf.mxu0  ;;  %v1275_v12 = vadd.f32 %v1274_v24, %v1239_v36 }
 0x14c   : > { %v2049_v62 = vand.u32 4294901760, %v2048_v30  ;;  %v6422_v43 = vand.u32 4294901760, %v2019_v35  ;;  %v1364_v53 = vadd.f32 %v1363_v38, %v1331_v13 }
 0x14d   : > { %v1306_v34 = vadd.f32 %v1305_v25, %v1275_v12 }
 0x14e   : > { %2050 = vmatmul.f32.vlgmr.msrb.gmra.mxu0 %v2049_v62  ;;  %2109 = vmatmul.f32.gmra.mxu1 %v6422_v43  ;;  %v2054_v20 = vsub.f32 %v2019_v35, %v6422_v43 }
 0x14f   : > { %v1337_v22 = vadd.f32 %v1336_v2, %v1306_v34  ;;  %v6429_v34 = vand.u32 4294901760, %v6124_v15 }
 0x150   : > { %2148 = vmatmul.f32.gmra.mxu2 %v2054_v20  ;;  %v2055_v9 = vand.u32 4294901760, %v2054_v20  ;;  %v1488_v49 = vpop.f32.mrf.mxu3 }
 0x151   : > { %2306 = vmatpush.msra.mxu2 %v6429_v34  ;;  %2441 = vmatpush.msrb.mxu1 %v6429_v34 }
 0x152   : > { %v1390_v46 = vpop.f32.mrf.mxu1  ;;  %2189 = vmatmul.f32.gmra.mxu3 %v2055_v9  ;;  %v1449_v51 = vpop.f32.mrf.mxu2  ;;  %v2056_v58 = vsub.f32 %v2054_v20, %v2055_v9 }
 0x153   : > { %v1391_v54 = vadd.f32 %v1390_v46, %v1364_v53  ;;  %v1367_v44 = vpop.f32.mrf.mxu0  ;;  %v1489_v46 = vadd.f32 %v1488_v49, %v1449_v51  ;;  %v6438_v49 = vand.u32 4294901760, %v6122_v14 }
 0x154   : > { %v2057_v0 = vand.u32 4294901760, %v2056_v58  ;;  %v1368_v5 = vadd.f32 %v1367_v44, %v1337_v22 }
 0x155   : > { %v1399_v8 = vsub.f32 %v1391_v54, %v997_v29  ;;  %2308 = vmatpush.msra.mxu2 %v6438_v49  ;;  %2443 = vmatpush.msrb.mxu1 %v6438_v49 }
 0x156   : > { %2058 = vmatmul.f32.gmra.mxu0 %v2057_v0 }
 0x157   : > { %v1401_v52 = vsub.f32 %v1399_v8, %v1193_v32 }
 0x158   : > { %v1492_v36 = vpop.f32.mrf.mxu3 }
 0x159   : > { %1405 = vst.msk [vmem:[#allocation3] sm:$0xff] %vm806_vm1, %v1401_v52  ;;  %v6435_v52 = vsub.f32 %v6124_v15, %v6429_v34 }
 0x15a   : > { %v1394_v42 = vpop.f32.mrf.mxu1  ;;  %v1457_v21 = vpop.f32.mrf.mxu2 }
 0x15b   : > { %v1395_v24 = vadd.f32 %v1394_v42, %v1368_v5  ;;  %v1518_v30 = vpop.f32.mrf.mxu0  ;;  %v1493_v5 = vadd.f32 %v1492_v36, %v1457_v21  ;;  %v6441_v42 = vand.u32 4294901760, %v6435_v52  ;;  %2401 = vmatpush.msrb.mxu0 %v6435_v52 }
 0x15d   : > { %v1400_v31 = vsub.f32 %v1395_v24, %v1001_v61  ;;  %v6446_v24 = vsub.f32 %v6122_v14, %v6438_v49  ;;  %2486 = vmatpush.msrb.mxu2 %v6441_v42 }
 0x15f   : > { %v1402_v35 = vsub.f32 %v1400_v31, %v1197_v60  ;;  %v1519_v60 = vadd.f32 %v1518_v30, %v1489_v46  ;;  %v6453_v36 = vand.u32 4294901760, %v6446_v24  ;;  %2404 = vmatpush.msrb.mxu0 %v6446_v24 }
 0x160   : > { %v1608_v25 = vpop.f32.mrf.mxu3 }
 0x161   : > { %1406 = vst.msk [vmem:[#allocation3 + $0x8] sm:$0xff] %vm806_vm1, %v1402_v35  ;;  %v2359_v35 = vsub.f32 %v6435_v52, %v6441_v42  ;;  %2490 = vmatpush.msrb.mxu2 %v6453_v36 }
 0x162   : > { %v1548_v38 = vpop.f32.mrf.mxu1  ;;  %v1581_v62 = vpop.f32.mrf.mxu2 }
 0x163   : > { %v1523_v20 = vpop.f32.mrf.mxu0  ;;  %v1549_v44 = vadd.f32 %v1548_v38, %v1519_v60 }
 0x164   : > { %v1524_v21 = vadd.f32 %v1523_v20, %v1493_v5 }
 0x165   : > { %v1582_v30 = vadd.f32 %v1581_v62, %v1549_v44  ;;  %v2365_v62 = vsub.f32 %v6446_v24, %v6453_v36 }
 0x167   : > { %v6465_v60 = vand.u32 4294901760, %v2365_v62 }
 0x168   : > { %v1612_v29 = vpop.f32.mrf.mxu3 }
 0x16a   : > { %v1554_v13 = vpop.f32.mrf.mxu1  ;;  %v1585_v2 = vpop.f32.mrf.mxu2 }
 0x16b   : > { %v1639_v32 = vpop.f32.mrf.mxu0  ;;  %v1555_v46 = vadd.f32 %v1554_v13, %v1524_v21 }
 0x170   : > { %v1738_v12 = vpop.f32.mrf.mxu3 }
 0x172   : > { %v1678_v9 = vpop.f32.mrf.mxu1  ;;  %v1708_v53 = vpop.f32.mrf.mxu2 }
 0x173   : > { %v1647_v58 = vpop.f32.mrf.mxu0  ;;  %v1679_v61 = vadd.f32 %v1678_v9, %v1639_v32  ;;  %v6457_v32 = vand.u32 4294901760, %v2359_v35 }
 0x175   : > { %v1709_v22 = vadd.f32 %v1708_v53, %v1679_v61  ;;  %2361 = vmatpush.msra.mxu3 %v6457_v32 }
 0x177   : > { %v1739_v15 = vadd.f32 %v1738_v12, %v1709_v22  ;;  %v6462_v12 = vadd.f32 %v1608_v25, %v1582_v30  ;;  %2367 = vmatpush.msra.mxu3 %v6465_v60 }
 0x178   : > { %v1744_v54 = vpop.f32.mrf.mxu3 }
 0x179   : > { %2523 = vmatpush.msrb.mxu3 %v6429_v34 }
 0x17a   : > { %v1682_v0 = vpop.f32.mrf.mxu1  ;;  %v1713_v8 = vpop.f32.mrf.mxu2 }
 0x17b   : > { %v1771_v51 = vpop.f32.mrf.mxu0  ;;  %v1683_v31 = vadd.f32 %v1682_v0, %v1647_v58  ;;  %v1586_v0 = vadd.f32 %v1585_v2, %v1555_v46  ;;  %2525 = vmatpush.msrb.mxu3 %v6438_v49 }
 0x17c   : > { %v1772_v14 = vadd.f32 %v1771_v51, %v1739_v15 }
 0x17d   : > { %v1714_v58 = vadd.f32 %v1713_v8, %v1683_v31  ;;  %v1613_v5 = vadd.f32 %v1612_v29, %v1586_v0  ;;  %v6472_v31 = vld [vmem:[#allocation3] sm:$0xff]  ;;  %v6487_v0 = vld [vmem:[#allocation3 + $0x8] sm:$0xff] }
 0x17f   : > { %v1745_v22 = vadd.f32 %v1744_v54, %v1714_v58  ;;  %v2280_v54 = vsel %vm806_vm1, %v6472_v31, 0 }
 0x180   : > { %v1870_v38 = vpop.f32.mrf.mxu3 }
 0x182   : > { %v1798_v9 = vpop.f32.mrf.mxu1  ;;  %v1831_v53 = vpop.f32.mrf.mxu2 }
 0x183   : > { %v1799_v61 = vadd.f32 %v1798_v9, %v1772_v14  ;;  %v1775_v20 = vpop.f32.mrf.mxu0  ;;  %v1871_v35 = vadd.f32 %v1870_v38, %v1831_v53  ;;  %v6485_v53 = vand.u32 4294901760, %v2280_v54 }
 0x184   : > { %v1776_v25 = vadd.f32 %v1775_v20, %v1745_v22 }
 0x185   : > { %v1997_v44 = vsub.f32 %v6462_v12, %v1799_v61 }
 0x187   : > { %2003 = vst.msk [vmem:[#allocation2 + $0x10] sm:$0xff] %vm806_vm1, %v1997_v44 }
 0x188   : > { %v1874_v13 = vpop.f32.mrf.mxu3 }
 0x18a   : > { %v1802_v8 = vpop.f32.mrf.mxu1  ;;  %v1839_v51 = vpop.f32.mrf.mxu2 }
 0x18b   : > { %v1803_v30 = vadd.f32 %v1802_v8, %v1776_v25  ;;  %v1900_v15 = vpop.f32.mrf.mxu0  ;;  %v1875_v22 = vadd.f32 %v1874_v13, %v1839_v51 }
 0x18c   : > { %v1901_v9 = vadd.f32 %v1900_v15, %v1871_v35  ;;  %v6492_v35 = vsub.f32 %v2280_v54, %v6485_v53 }
 0x18d   : > { %v1998_v21 = vsub.f32 %v1613_v5, %v1803_v30 }
 0x18e   : > { %v6474_v14 = vld [vmem:[#allocation2 + $0x10] sm:$0xff] }
 0x18f   : > { %2004 = vst.msk [vmem:[#allocation2 + $0x18] sm:$0xff] %vm806_vm1, %v1998_v21  ;;  %v2022_v2 = vsel %vm806_vm1, %v6474_v14, 0 }
 0x190   : > { %v6481_v62 = vand.u32 4294901760, %v2022_v2  ;;  %v1990_v29 = vpop.f32.mrf.mxu3 }
 0x192   : > { %v1930_v46 = vpop.f32.mrf.mxu1  ;;  %2113 = vmatmul.f32.gmra.mxu1 %v6481_v62  ;;  %v1963_v58 = vpop.f32.mrf.mxu2  ;;  %v2062_v38 = vsub.f32 %v2022_v2, %v6481_v62 }
 0x193   : > { %v1931_v20 = vadd.f32 %v1930_v46, %v1901_v9  ;;  %v1905_v8 = vpop.f32.mrf.mxu0  ;;  %v2283_v9 = vsel %vm806_vm1, %v6487_v0, 0 }
 0x194   : > { %2153 = vmatmul.f32.gmra.mxu2 %v2062_v38  ;;  %v2063_v44 = vand.u32 4294901760, %v2062_v38  ;;  %v1906_v13 = vadd.f32 %v1905_v8, %v1875_v22 }
 0x195   : > { %v1964_v25 = vadd.f32 %v1963_v58, %v1931_v20  ;;  %v6504_v20 = vand.u32 4294901760, %v2283_v9 }
 0x196   : > { %2195 = vmatmul.f32.gmra.mxu3 %v2063_v44  ;;  %v2064_v21 = vsub.f32 %v2062_v38, %v2063_v44  ;;  %v6489_v15 = vld [vmem:[#allocation2 + $0x18] sm:$0xff] }
 0x197   : > { %v1991_v57 = vadd.f32 %v1990_v29, %v1964_v25  ;;  %v2025_v2 = vsel %vm806_vm1, %v6489_v15, 0  ;;  %v2311_v29 = vand.u32 4294901760, %v6492_v35  ;;  %v6511_v8 = vsub.f32 %v2283_v9, %v6504_v20 }
 0x198   : > { %v2065_v46 = vand.u32 4294901760, %v2064_v21  ;;  %v6498_v11 = vand.u32 4294901760, %v2025_v2  ;;  %v1994_v21 = vpop.f32.mrf.mxu3 }
 0x199   : > { %v1999_v51 = vsub.f32 %v1991_v57, %v6462_v12  ;;  %v2312_v12 = vsub.f32 %v6492_v35, %v2311_v29 }
 0x19a   : > { %v1936_v58 = vpop.f32.mrf.mxu1  ;;  %2066 = vmatmul.f32.gmra.mxu0 %v2065_v46  ;;  %2117 = vmatmul.f32.gmra.mxu1 %v6498_v11  ;;  %v1967_v38 = vpop.f32.mrf.mxu2  ;;  %v2070_v54 = vsub.f32 %v2025_v2, %v6498_v11 }
 0x19b   : > { %v2001_v44 = vsub.f32 %v1999_v51, %v1799_v61  ;;  %v1937_v25 = vadd.f32 %v1936_v58, %v1906_v13  ;;  %v2313_v61 = vand.u32 4294901760, %v2312_v12  ;;  %v2319_v13 = vand.u32 4294901760, %v6511_v8 }
 0x19c   : > { %2158 = vmatmul.f32.gmra.mxu2 %v2070_v54  ;;  %v2071_v6 = vand.u32 4294901760, %v2070_v54 }
 0x19d   : > { %2005 = vst.msk [vmem:[#allocation3 + $0x10] sm:$0xff] %vm806_vm1, %v2001_v44  ;;  %v1968_v22 = vadd.f32 %v1967_v38, %v1937_v25  ;;  %v2320_v9 = vsub.f32 %v6511_v8, %v2319_v13 }
 0x19e   : > { %2201 = vmatmul.f32.gmra.mxu3 %v2071_v6  ;;  %v2072_v57 = vsub.f32 %v2070_v54, %v2071_v6 }
 0x19f   : > { %v1995_v2 = vadd.f32 %v1994_v21, %v1968_v22 }
 0x1a0   : > { %v2073_v46 = vand.u32 4294901760, %v2072_v57 }
 0x1a1   : > { %v2000_v28 = vsub.f32 %v1995_v2, %v1613_v5  ;;  %v2573_v2 = vand.u32 4294901760, %v6128_v17 }
 0x1a2   : > { %2074 = vmatmul.f32.gmra.mxu0 %v2073_v46  ;;  %2263 = vmatmul.f32.vlgmr.msra.gmra.mxu1 %v6414_v23 }
 0x1a3   : > { %v2002_v51 = vsub.f32 %v2000_v28, %v1803_v30  ;;  %v2321_v28 = vand.u32 4294901760, %v2320_v9  ;;  %v2625_v46 = vsub.f32 %v6128_v17, %v2573_v2 }
 0x1a4   : > { %2314 = vmatmul.f32.vlgmr.msra.gmra.mxu2 %v2313_v61  ;;  %v6515_v58 = vld [vmem:[#allocation3 + $0x10] sm:$0xff]  ;;  %v2575_v61 = vand.u32 4294901760, %v6126_v16 }
 0x1a5   : > { %2006 = vst.msk [vmem:[#allocation3 + $0x18] sm:$0xff] %vm806_vm1, %v2002_v51  ;;  %v2286_v6 = vsel %vm806_vm1, %v6515_v58, 0  ;;  %v2626_v51 = vand.u32 4294901760, %v2625_v46  ;;  %2669 = vmatpush.msra.mxu2 %v2625_v46 }
 0x1a6   : > { %2369 = vmatmul.f32.vlgmr.msra.gmra.mxu3 %v6485_v53  ;;  %v6522_v5 = vand.u32 4294901760, %v2286_v6 }
 0x1a7   : > { %2709 = vmatpush.msra.mxu3 %v2573_v2  ;;  %v2627_v9 = vsub.f32 %v2625_v46, %v2626_v51 }
 0x1a8   : > { %v6525_v38 = vsub.f32 %v2286_v6, %v6522_v5  ;;  %v2631_v6 = vsub.f32 %v6126_v16, %v2575_v61 }
 0x1a9   : > { %2711 = vmatpush.msra.mxu3 %v2575_v61  ;;  %v2628_v17 = vand.u32 4294901760, %v2627_v9 }
 0x1aa   : > { %2228 = vmatmul.f32.vlgmr.msra.gmra.mxu0 %v6414_v23  ;;  %2267 = vmatmul.f32.gmra.mxu1 %v6422_v43  ;;  %v2327_v30 = vand.u32 4294901760, %v6525_v38 }
 0x1ab   : > { %2574 = vmatpush.msra.mxu0 %v2573_v2  ;;  %2672 = vmatpush.msra.mxu2 %v2631_v6 }
 0x1ac   : > { %2322 = vmatmul.f32.gmra.mxu2 %v2321_v28  ;;  %v6530_v54 = vld [vmem:[#allocation3 + $0x18] sm:$0xff]  ;;  %v2328_v25 = vsub.f32 %v6525_v38, %v2327_v30  ;;  %v2632_v28 = vand.u32 4294901760, %v2631_v6  ;;  %2629 = vmatpush.msra.mxu1 %v2628_v17 }
 0x1ad   : > { %v2289_v44 = vsel %vm806_vm1, %v6530_v54, 0  ;;  %2576 = vmatpush.msra.mxu0 %v2575_v61 }
 0x1ae   : > { %2373 = vmatmul.f32.gmra.mxu3 %v6504_v20  ;;  %v2333_v21 = vand.u32 4294901760, %v2289_v44  ;;  %v2329_v23 = vand.u32 4294901760, %v2328_v25 }
 0x1b0   : > { %v6536_v22 = vsub.f32 %v2289_v44, %v2333_v21  ;;  %v2633_v44 = vsub.f32 %v2631_v6, %v2632_v28 }
 0x1b2   : > { %2232 = vmatmul.f32.gmra.mxu0 %v6422_v43  ;;  %2271 = vmatmul.f32.gmra.mxu1 %v6481_v62  ;;  %v2335_v57 = vand.u32 4294901760, %v6536_v22  ;;  %v2634_v25 = vand.u32 4294901760, %v2633_v44 }
 0x1b4   : > { %2330 = vmatmul.f32.gmra.mxu2 %v2329_v23  ;;  %v2336_v12 = vsub.f32 %v6536_v22, %v2335_v57  ;;  %2635 = vmatpush.msra.mxu1 %v2634_v25 }
 0x1b6   : > { %2377 = vmatmul.f32.gmra.mxu3 %v6522_v5  ;;  %v2337_v43 = vand.u32 4294901760, %v2336_v12 }
 0x1ba   : > { %2236 = vmatmul.f32.gmra.mxu0 %v6481_v62  ;;  %2275 = vmatmul.f32.gmra.mxu1 %v6498_v11 }
 0x1bc   : > { %2338 = vmatmul.f32.gmra.mxu2 %v2337_v43 }
 0x1be   : > { %2381 = vmatmul.f32.gmra.mxu3 %v2333_v21 }
 0x1c2   : > { %2240 = vmatmul.f32.gmra.mxu0 %v6498_v11  ;;  %2447 = vmatmul.f32.vlgmr.msrb.gmra.mxu1 %v2311_v29  ;;  %v2543_v11 = vadd.f32 %v6472_v31, %v6409_v1 }
 0x1c3   : > { %2791 = vmatpush.msrb.mxu1 %v2573_v2 }
 0x1c4   : > { %2492 = vmatmul.f32.vlgmr.msrb.gmra.mxu2 %v6485_v53  ;;  %v2548_v16 = vsel %vm806_vm1, %v2543_v11, 0 }
 0x1c5   : > { %2860 = vmatpush.msrb.mxu2 %v6368_v56  ;;  %2793 = vmatpush.msrb.mxu1 %v2575_v61 }
 0x1c6   : > { %2527 = vmatmul.f32.vlgmr.msrb.gmra.mxu3 %v6485_v53 }
 0x1c7   : > { %2915 = vmatpush.msrb.mxu3 %v6397_v50  ;;  %2862 = vmatpush.msrb.mxu2 %v6375_v63  ;;  %v2577_v50 = vand.u32 4294901760, %v2548_v16 }
 0x1c9   : > { %2921 = vmatpush.msrb.mxu3 %v6403_v4  ;;  %v2544_v4 = vadd.f32 %v6487_v0, %v6418_v7  ;;  %v2578_v62 = vsub.f32 %v2548_v16, %v2577_v50 }
 0x1ca   : > { %2407 = vmatmul.f32.vlgmr.msrb.gmra.mxu0 %v6492_v35  ;;  %2453 = vmatmul.f32.gmra.mxu1 %v2319_v13  ;;  %v2545_v35 = vadd.f32 %v6515_v58, %v6474_v14  ;;  %v2546_v13 = vadd.f32 %v6530_v54, %v6489_v15 }
 0x1cb   : > { %2754 = vmatpush.msrb.mxu0 %v2626_v51  ;;  %v2551_v1 = vsel %vm806_vm1, %v2544_v4, 0  ;;  %v2579_v31 = vand.u32 4294901760, %v2578_v62  ;;  %v2144_v23 = vpop.f32.mrf.mxu2 }
 0x1cc   : > { %2496 = vmatmul.f32.gmra.mxu2 %v6504_v20  ;;  %v2585_v53 = vand.u32 4294901760, %v2551_v1  ;;  %v2554_v29 = vsel %vm806_vm1, %v2545_v35, 0 }
 0x1cd   : > { %2758 = vmatpush.msrb.mxu0 %v2632_v28  ;;  %v2580_v7 = vsub.f32 %v2578_v62, %v2579_v31  ;;  %v2184_v12 = vpop.f32.mrf.mxu3 }
 0x1ce   : > { %2531 = vmatmul.f32.gmra.mxu3 %v6504_v20  ;;  %v2586_v0 = vsub.f32 %v2551_v1, %v2585_v53 }
 0x1cf   : > { %v2581_v14 = vand.u32 4294901760, %v2580_v7 }
 0x1d0   : > { %v2587_v20 = vand.u32 4294901760, %v2586_v0 }
 0x1d2   : > { %2412 = vmatmul.f32.gmra.mxu0 %v6511_v8  ;;  %2459 = vmatmul.f32.gmra.mxu1 %v2327_v30  ;;  %v2593_v8 = vand.u32 4294901760, %v2554_v29  ;;  %v2588_v58 = vsub.f32 %v2586_v0, %v2587_v20 }
 0x1d3   : > { %v2149_v61 = vpop.f32.mrf.mxu2 }
 0x1d4   : > { %2500 = vmatmul.f32.gmra.mxu2 %v6522_v5 }
 0x1d5   : > { %v2190_v43 = vpop.f32.mrf.mxu3 }
 0x1d6   : > { %2535 = vmatmul.f32.gmra.mxu3 %v6522_v5  ;;  %v2557_v5 = vsel %vm806_vm1, %v2546_v13, 0 }
 0x1da   : > { %2417 = vmatmul.f32.gmra.mxu0 %v6525_v38  ;;  %2465 = vmatmul.f32.gmra.mxu1 %v2335_v57  ;;  %v2601_v38 = vand.u32 4294901760, %v2557_v5 }
 0x1dc   : > { %2504 = vmatmul.f32.gmra.mxu2 %v2333_v21 }
 0x1de   : > { %2539 = vmatmul.f32.gmra.mxu3 %v2333_v21  ;;  %v2106_v21 = vpop.f32.mrf.mxu1 }
 0x1e2   : > { %2422 = vmatmul.f32.gmra.mxu0 %v6536_v22  ;;  %2637 = vmatmul.f32.vlgmr.msra.gmra.mxu1 %v2577_v50 }
 0x1e3   : > { %2995 = vmatpush.msra.mxu1 %v6368_v56 }
 0x1e4   : > { %2675 = vmatmul.f32.vlgmr.msra.gmra.mxu2 %v2578_v62 }
 0x1e5   : > { %2997 = vmatpush.msra.mxu1 %v6375_v63  ;;  %3040 = vmatpush.msra.mxu2 %v6381_v47  ;;  %v2594_v47 = vsub.f32 %v2554_v29, %v2593_v8 }
 0x1e6   : > { %2715 = vmatmul.f32.vlgmr.msra.gmra.mxu3 %v2579_v31  ;;  %v2110_v57 = vpop.f32.mrf.mxu1 }
 0x1e7   : > { %3077 = vmatpush.msra.mxu3 %v6368_v56  ;;  %3044 = vmatpush.msra.mxu2 %v6393_v3  ;;  %v2589_v56 = vand.u32 4294901760, %v2588_v58  ;;  %v2595_v3 = vand.u32 4294901760, %v2594_v47 }
 0x1e9   : > { %3079 = vmatpush.msra.mxu3 %v6375_v63  ;;  %v2596_v15 = vsub.f32 %v2594_v47, %v2595_v3  ;;  %v2602_v63 = vsub.f32 %v2557_v5, %v2601_v38 }
 0x1ea   : > { %2582 = vmatmul.f32.vlgmr.msra.gmra.mxu0 %v2581_v14  ;;  %2641 = vmatmul.f32.gmra.mxu1 %v2585_v53 }
 0x1eb   : > { %2955 = vmatpush.msra.mxu0 %v6372_v26  ;;  %v2597_v30 = vand.u32 4294901760, %v2596_v15  ;;  %v2603_v54 = vand.u32 4294901760, %v2602_v63 }
 0x1ec   : > { %2680 = vmatmul.f32.gmra.mxu2 %v2586_v0 }
 0x1ed   : > { %2958 = vmatpush.msra.mxu0 %v6385_v40  ;;  %v2604_v26 = vsub.f32 %v2602_v63, %v2603_v54  ;;  %v2051_v40 = vpop.f32.mrf.mxu0 }
 0x1ee   : > { %2721 = vmatmul.f32.gmra.mxu3 %v2587_v20  ;;  %v2107_v20 = vadd.f32 %v2106_v21, %v2051_v40 }
 0x1ef   : > { %v2605_v22 = vand.u32 4294901760, %v2604_v26 }
 0x1f0   : > { %v2145_v58 = vadd.f32 %v2144_v23, %v2107_v20 }
 0x1f2   : > { %2590 = vmatmul.f32.gmra.mxu0 %v2589_v56  ;;  %2645 = vmatmul.f32.gmra.mxu1 %v2593_v8 }
 0x1f4   : > { %2685 = vmatmul.f32.gmra.mxu2 %v2594_v47 }
 0x1f5   : > { %v2059_v2 = vpop.f32.mrf.mxu0 }
 0x1f6   : > { %2727 = vmatmul.f32.gmra.mxu3 %v2595_v3  ;;  %v2185_v3 = vadd.f32 %v2184_v12, %v2145_v58 }
 0x1fa   : > { %2598 = vmatmul.f32.gmra.mxu0 %v2597_v30  ;;  %2649 = vmatmul.f32.gmra.mxu1 %v2601_v38 }
 0x1fc   : > { %2690 = vmatmul.f32.gmra.mxu2 %v2602_v63 }
 0x1fe   : > { %2733 = vmatmul.f32.gmra.mxu3 %v2603_v54 }
 0x202   : > { %2606 = vmatmul.f32.gmra.mxu0 %v2605_v22  ;;  %2795 = vmatmul.f32.vlgmr.msrb.gmra.mxu1 %v2577_v50 }
 0x203   : > { %3179 = vmatpush.msrb.mxu1 %v6457_v32 }
 0x205   : > { %3185 = vmatpush.msrb.mxu1 %v6465_v60 }
 0x20a   : > { %2760 = vmatmul.f32.vlgmr.msrb.gmra.mxu0 %v2577_v50  ;;  %2799 = vmatmul.f32.gmra.mxu1 %v2585_v53 }
 0x20b   : > { %3124 = vmatpush.msrb.mxu0 %v6429_v34 }
 0x20d   : > { %3126 = vmatpush.msrb.mxu0 %v6438_v49 }
 0x20f   : > { %v2114_v46 = vpop.f32.mrf.mxu1 }
 0x212   : > { %2764 = vmatmul.f32.gmra.mxu0 %v2585_v53  ;;  %2803 = vmatmul.f32.gmra.mxu1 %v2593_v8 }
 0x217   : > { %v2067_v51 = vpop.f32.mrf.mxu0  ;;  %v6590_v32 = vpop.f32.mrf.mxu1 }
 0x218   : > { %v2154_v6 = vpop.f32.mrf.mxu2  ;;  %v2115_v20 = vadd.f32 %v2114_v46, %v2067_v51 }
 0x219   : > { %v6592_v60 = vpop.f32.mrf.mxu3 }
 0x21a   : > { %2768 = vmatmul.f32.gmra.mxu0 %v2593_v8  ;;  %2807 = vmatmul.f32.gmra.mxu1 %v2601_v38 }
 0x21f   : > { %v6594_v9 = vpop.f32.mrf.mxu0  ;;  %v2264_v28 = vpop.f32.mrf.mxu1 }
 0x220   : > { %v6596_v17 = vpop.f32.mrf.mxu2 }
 0x221   : > { %v6598_v44 = vpop.f32.mrf.mxu3 }
 0x222   : > { %2772 = vmatmul.f32.gmra.mxu0 %v2601_v38  ;;  %v2111_v38 = vadd.f32 %v2110_v57, %v2059_v2 }
 0x224   : > { %v2150_v22 = vadd.f32 %v2149_v61, %v2111_v38 }
 0x227   : > { %v2229_v25 = vpop.f32.mrf.mxu0  ;;  %v2268_v11 = vpop.f32.mrf.mxu1 }
 0x228   : > { %v2315_v16 = vpop.f32.mrf.mxu2  ;;  %v2230_v54 = vadd.f32 %v2229_v25, %v2185_v3 }
 0x229   : > { %v2370_v50 = vpop.f32.mrf.mxu3 }
 0x22a   : > { %v2371_v47 = vadd.f32 %v2370_v50, %v2315_v16  ;;  %v6610_v10 = vadd.f32 %v2264_v28, %v2230_v54  ;;  %v2191_v50 = vadd.f32 %v2190_v43, %v2150_v22 }
 0x22f   : > { %v2233_v4 = vpop.f32.mrf.mxu0  ;;  %v6600_v62 = vpop.f32.mrf.mxu1 }
 0x230   : > { %v2323_v1 = vpop.f32.mrf.mxu2 }
 0x231   : > { %v2374_v31 = vpop.f32.mrf.mxu3 }
 0x232   : > { %v2375_v21 = vadd.f32 %v2374_v31, %v2323_v1  ;;  %v2155_v1 = vadd.f32 %v2154_v6, %v2115_v20 }
 0x234   : > { %v2197_v6 = vadd.f32 %v6592_v60, %v2155_v1 }
 0x237   : > { %v2237_v53 = vpop.f32.mrf.mxu0  ;;  %v6602_v35 = vpop.f32.mrf.mxu1 }
 0x238   : > { %v2331_v7 = vpop.f32.mrf.mxu2 }
 0x239   : > { %v2378_v0 = vpop.f32.mrf.mxu3 }
 0x23a   : > { %v2379_v46 = vadd.f32 %v2378_v0, %v2331_v7 }
 0x23f   : > { %v6604_v29 = vpop.f32.mrf.mxu0  ;;  %v2448_v14 = vpop.f32.mrf.mxu1 }
 0x240   : > { %v6606_v8 = vpop.f32.mrf.mxu2 }
 0x241   : > { %v6608_v13 = vpop.f32.mrf.mxu3 }
 0x247   : > { %v2408_v5 = vpop.f32.mrf.mxu0  ;;  %v2454_v56 = vpop.f32.mrf.mxu1 }
 0x248   : > { %v2409_v15 = vadd.f32 %v2408_v5, %v2371_v47  ;;  %v2493_v63 = vpop.f32.mrf.mxu2  ;;  %v6630_v5 = vld [vmem:[#allocation8 + $0x8] sm:$0xff] }
 0x249   : > { %v2528_v30 = vpop.f32.mrf.mxu3 }
 0x24a   : > { %v2449_v26 = vadd.f32 %v2448_v14, %v2409_v15  ;;  %v2234_v14 = vadd.f32 %v2233_v4, %v2191_v50  ;;  %v2238_v15 = vadd.f32 %v2237_v53, %v2197_v6 }
 0x24c   : > { %v2494_v39 = vadd.f32 %v2493_v63, %v2449_v26  ;;  %v6625_v43 = vadd.f32 %v2268_v11, %v2234_v14 }
 0x24e   : > { %v6612_v40 = vadd.f32 %v2528_v30, %v2494_v39 }
 0x24f   : > { %v2413_v23 = vpop.f32.mrf.mxu0  ;;  %v2460_v16 = vpop.f32.mrf.mxu1 }
 0x250   : > { %v2811_v57 = vsub.f32 %v6610_v10, %v6612_v40  ;;  %v2414_v12 = vadd.f32 %v2413_v23, %v2375_v21  ;;  %v2497_v2 = vpop.f32.mrf.mxu2  ;;  %v6652_v21 = vadd.f32 %v6600_v62, %v2238_v15 }
 0x251   : > { %v2532_v25 = vpop.f32.mrf.mxu3 }
 0x252   : > { %v6619_v61 = vmul.f32 %v6614_v37, %v2811_v57  ;;  %v2455_v28 = vadd.f32 %v2454_v56, %v2414_v12  ;;  %v2119_v56 = vadd.f32 %v6590_v32, %v6594_v9 }
 0x254   : > { %v2834_v39 = vsel %vm806_vm1, %v6619_v61, 0  ;;  %v2498_v31 = vadd.f32 %v2497_v2, %v2455_v28  ;;  %v2160_v9 = vadd.f32 %v6596_v17, %v2119_v56 }
 0x255   : > { %v6623_v58 = vand.u32 4294901760, %v2834_v39 }
 0x256   : > { %v6627_v51 = vadd.f32 %v2532_v25, %v2498_v31 }
 0x257   : > { %v2864_v47 = vsub.f32 %v2834_v39, %v6623_v58  ;;  %v2418_v4 = vpop.f32.mrf.mxu0  ;;  %v2466_v3 = vpop.f32.mrf.mxu1  ;;  %2923 = vmatmul.f32.vlgmr.msrb.gmra.mxu3 %v6623_v58 }
 0x258   : > { %v2812_v11 = vsub.f32 %v6625_v43, %v6627_v51  ;;  %v2419_v38 = vadd.f32 %v2418_v4, %v2379_v46  ;;  %3259 = vmatpush.msrb.mxu3 %v6429_v34  ;;  %v2501_v7 = vpop.f32.mrf.mxu2 }
 0x259   : > { %2961 = vmatmul.f32.vlgmr.msra.gmra.mxu0 %v2864_v47  ;;  %v2865_v0 = vand.u32 4294901760, %v2864_v47  ;;  %v2536_v60 = vpop.f32.mrf.mxu3 }
 0x25a   : > { %v6640_v63 = vmul.f32 %v6630_v5, %v2812_v11  ;;  %v2461_v30 = vadd.f32 %v2460_v16, %v2419_v38  ;;  %3261 = vmatpush.msrb.mxu3 %v6438_v49  ;;  %3304 = vmatpush.msra.mxu0 %v6441_v42  ;;  %v2383_v42 = vadd.f32 %v6608_v13, %v6606_v8 }
 0x25b   : > { %3001 = vmatmul.f32.vlgmr.msra.gmra.mxu1 %v2865_v0  ;;  %v2866_v32 = vsub.f32 %v2864_v47, %v2865_v0 }
 0x25c   : > { %v2837_v54 = vsel %vm806_vm1, %v6640_v63, 0  ;;  %v2502_v26 = vadd.f32 %v2501_v7, %v2461_v30  ;;  %3341 = vmatpush.msra.mxu1 %v6429_v34  ;;  %3308 = vmatpush.msra.mxu0 %v6453_v36  ;;  %v2203_v36 = vadd.f32 %v6598_v44, %v2160_v9 }
 0x25d   : > { %v2867_v53 = vand.u32 4294901760, %v2866_v32  ;;  %v6649_v22 = vand.u32 4294901760, %v2837_v54 }
 0x25e   : > { %v6656_v23 = vadd.f32 %v2536_v60, %v2502_v26  ;;  %3343 = vmatpush.msra.mxu1 %v6438_v49  ;;  %v2242_v13 = vadd.f32 %v6604_v29, %v2203_v36 }
 0x25f   : > { %v2423_v17 = vpop.f32.mrf.mxu0  ;;  %v2638_v16 = vpop.f32.mrf.mxu1  ;;  %2868 = vmatmul.f32.vlgmr.msrb.gmra.mxu2 %v2867_v53  ;;  %2927 = vmatmul.f32.gmra.mxu3 %v6649_v22  ;;  %v2872_v34 = vsub.f32 %v2837_v54, %v6649_v22 }
 0x260   : > { %v2813_v62 = vsub.f32 %v6652_v21, %v6656_v23  ;;  %v2424_v50 = vadd.f32 %v2423_v17, %v2383_v42  ;;  %3219 = vmatpush.msrb.mxu2 %v6435_v52  ;;  %v2505_v57 = vpop.f32.mrf.mxu2  ;;  %v6673_v28 = vadd.f32 %v6602_v35, %v2242_v13  ;;  %v3391_v13 = vand.u32 4294901760, %v6132_v19 }
 0x261   : > { %2966 = vmatmul.f32.gmra.mxu0 %v2872_v34  ;;  %v2873_v8 = vand.u32 4294901760, %v2872_v34  ;;  %v2540_v25 = vpop.f32.mrf.mxu3 }
 0x262   : > { %v6667_v49 = vmul.f32 %v6614_v37, %v2813_v62  ;;  %v2467_v20 = vadd.f32 %v2466_v3, %v2424_v50  ;;  %3222 = vmatpush.msrb.mxu2 %v6446_v24 }
 0x263   : > { %3007 = vmatmul.f32.gmra.mxu1 %v2873_v8  ;;  %v2874_v12 = vsub.f32 %v2872_v34, %v2873_v8 }
 0x264   : > { %v2840_v44 = vsel %vm806_vm1, %v6667_v49, 0  ;;  %v2506_v2 = vadd.f32 %v2505_v57, %v2467_v20 }
 0x265   : > { %v2875_v14 = vand.u32 4294901760, %v2874_v12  ;;  %v2879_v52 = vand.u32 4294901760, %v2840_v44  ;;  %v6695_v12 = vsub.f32 %v6132_v19, %v3391_v13 }
 0x266   : > { %v6675_v29 = vadd.f32 %v2540_v25, %v2506_v2 }
 0x267   : > { %v2583_v1 = vpop.f32.mrf.mxu0  ;;  %v2642_v39 = vpop.f32.mrf.mxu1  ;;  %2876 = vmatmul.f32.gmra.mxu2 %v2875_v14  ;;  %2931 = vmatmul.f32.gmra.mxu3 %v2879_v52  ;;  %v2880_v24 = vsub.f32 %v2840_v44, %v2879_v52 }
 0x268   : > { %v2814_v31 = vsub.f32 %v6673_v28, %v6675_v29  ;;  %v2676_v32 = vpop.f32.mrf.mxu2  ;;  %v2639_v9 = vadd.f32 %v2638_v16, %v2583_v1  ;;  %v3444_v1 = vand.u32 4294901760, %v6695_v12 }
 0x269   : > { %2971 = vmatmul.f32.gmra.mxu0 %v2880_v24  ;;  %v2881_v46 = vand.u32 4294901760, %v2880_v24  ;;  %v2716_v54 = vpop.f32.mrf.mxu3 }
 0x26a   : > { %v6680_v47 = vmul.f32 %v6630_v5, %v2814_v31  ;;  %v2677_v53 = vadd.f32 %v2676_v32, %v2639_v9  ;;  %v3445_v19 = vsub.f32 %v6695_v12, %v3444_v1 }
 0x26b   : > { %3013 = vmatmul.f32.gmra.mxu1 %v2881_v46  ;;  %v2882_v4 = vsub.f32 %v2880_v24, %v2881_v46 }
 0x26c   : > { %v2843_v35 = vsel %vm806_vm1, %v6680_v47, 0  ;;  %v2717_v34 = vadd.f32 %v2716_v54, %v2677_v53 }
 0x26d   : > { %v2883_v3 = vand.u32 4294901760, %v2882_v4  ;;  %v6684_v6 = vand.u32 4294901760, %v2843_v35 }
 0x26f   : > { %v2591_v56 = vpop.f32.mrf.mxu0  ;;  %v2646_v11 = vpop.f32.mrf.mxu1  ;;  %2884 = vmatmul.f32.gmra.mxu2 %v2883_v3  ;;  %2935 = vmatmul.f32.gmra.mxu3 %v6684_v6  ;;  %v2888_v38 = vsub.f32 %v2843_v35, %v6684_v6  ;;  %v3446_v3 = vand.u32 4294901760, %v3445_v19 }
 0x270   : > { %v2681_v17 = vpop.f32.mrf.mxu2  ;;  %v2643_v36 = vadd.f32 %v2642_v39, %v2591_v56  ;;  %v3393_v39 = vand.u32 4294901760, %v6130_v18 }
 0x271   : > { %2976 = vmatmul.f32.gmra.mxu0 %v2888_v38  ;;  %v2889_v7 = vand.u32 4294901760, %v2888_v38  ;;  %v2722_v8 = vpop.f32.mrf.mxu3 }
 0x272   : > { %v2682_v16 = vadd.f32 %v2681_v17, %v2643_v36  ;;  %v3449_v31 = vsub.f32 %v6130_v18, %v3393_v39 }
 0x273   : > { %3019 = vmatmul.f32.gmra.mxu1 %v2889_v7  ;;  %v2890_v0 = vsub.f32 %v2888_v38, %v2889_v7 }
 0x274   : > { %v2723_v44 = vadd.f32 %v2722_v8, %v2682_v16  ;;  %v3450_v56 = vand.u32 4294901760, %v3449_v31 }
 0x275   : > { %v2891_v15 = vand.u32 4294901760, %v2890_v0 }
 0x276   : > { %v3451_v7 = vsub.f32 %v3449_v31, %v3450_v56 }
 0x277   : > { %v2599_v30 = vpop.f32.mrf.mxu0  ;;  %2892 = vmatmul.f32.gmra.mxu2 %v2891_v15  ;;  %3081 = vmatmul.f32.vlgmr.msra.gmra.mxu3 %v6623_v58  ;;  %v2650_v60 = vpop.f32.mrf.mxu1 }
 0x278   : > { %v2647_v2 = vadd.f32 %v2646_v11, %v2599_v30  ;;  %v2686_v14 = vpop.f32.mrf.mxu2  ;;  %3447 = vmatpush.msra.mxu3 %v3446_v3  ;;  %v3452_v54 = vand.u32 4294901760, %v3451_v7 }
 0x279   : > { %v2728_v4 = vpop.f32.mrf.mxu3 }
 0x27a   : > { %v2687_v46 = vadd.f32 %v2686_v14, %v2647_v2  ;;  %3453 = vmatpush.msra.mxu3 %v3452_v54 }
 0x27c   : > { %v2729_v18 = vadd.f32 %v2728_v4, %v2687_v46 }
 0x27f   : > { %v2607_v26 = vpop.f32.mrf.mxu0  ;;  %3046 = vmatmul.f32.vlgmr.msra.gmra.mxu2 %v6623_v58  ;;  %3085 = vmatmul.f32.gmra.mxu3 %v6649_v22  ;;  %v2796_v42 = vpop.f32.mrf.mxu1 }
 0x280   : > { %3392 = vmatpush.msra.mxu2 %v3391_v13  ;;  %v2651_v0 = vadd.f32 %v2650_v60, %v2607_v26 }
 0x282   : > { %3394 = vmatpush.msra.mxu2 %v3393_v39 }
 0x287   : > { %v2761_v62 = vpop.f32.mrf.mxu0  ;;  %3050 = vmatmul.f32.gmra.mxu2 %v6649_v22  ;;  %3089 = vmatmul.f32.gmra.mxu3 %v2879_v52  ;;  %v2800_v57 = vpop.f32.mrf.mxu1 }
 0x288   : > { %v2762_v50 = vadd.f32 %v2761_v62, %v2717_v34  ;;  %v2734_v62 = vpop.f32.mrf.mxu3 }
 0x28a   : > { %v2797_v20 = vadd.f32 %v2796_v42, %v2762_v50  ;;  %v2691_v42 = vpop.f32.mrf.mxu2 }
 0x28b   : > { %v2692_v34 = vadd.f32 %v2691_v42, %v2651_v0 }
 0x28c   : > { %v2815_v58 = vsub.f32 %v2797_v20, %v6610_v10 }
 0x28d   : > { %v2735_v8 = vadd.f32 %v2734_v62, %v2692_v34 }
 0x28e   : > { %v2819_v25 = vsub.f32 %v2815_v58, %v6612_v40 }
 0x28f   : > { %v2765_v22 = vpop.f32.mrf.mxu0  ;;  %3054 = vmatmul.f32.gmra.mxu2 %v2879_v52  ;;  %3093 = vmatmul.f32.gmra.mxu3 %v6684_v6  ;;  %v2804_v30 = vpop.f32.mrf.mxu1 }
 0x290   : > { %v6702_v24 = vmul.f32 %v6614_v37, %v2819_v25  ;;  %v2766_v10 = vadd.f32 %v2765_v22, %v2723_v44 }
 0x292   : > { %v3098_v40 = vsel %vm806_vm1, %v6702_v24, 0  ;;  %v2801_v52 = vadd.f32 %v2800_v57, %v2766_v10 }
 0x293   : > { %v6708_v35 = vand.u32 4294901760, %v3098_v40 }
 0x294   : > { %v2816_v11 = vsub.f32 %v2801_v52, %v6625_v43 }
 0x295   : > { %3187 = vmatmul.f32.vlgmr.msrb.gmra.mxu1 %v6708_v35  ;;  %v3128_v38 = vsub.f32 %v3098_v40, %v6708_v35 }
 0x296   : > { %v2820_v15 = vsub.f32 %v2816_v11, %v6627_v51  ;;  %3527 = vmatpush.msrb.mxu1 %v3391_v13 }
 0x297   : > { %v2769_v32 = vpop.f32.mrf.mxu0  ;;  %3058 = vmatmul.f32.gmra.mxu2 %v6684_v6  ;;  %v3129_v9 = vand.u32 4294901760, %v3128_v38 }
 0x298   : > { %v2830_v53 = vmul.f32 %v6630_v5, %v2820_v15  ;;  %v2770_v43 = vadd.f32 %v2769_v32, %v2729_v18  ;;  %3529 = vmatpush.msrb.mxu1 %v3393_v39 }
 0x299   : > { %3265 = vmatmul.f32.vlgmr.msrb.gmra.mxu3 %v3129_v9  ;;  %v3130_v17 = vsub.f32 %v3128_v38, %v3129_v9 }
 0x29a   : > { %v2805_v36 = vadd.f32 %v2804_v30, %v2770_v43  ;;  %v3101_v60 = vsel %vm806_vm1, %v2830_v53, 0  ;;  %3609 = vmatpush.msrb.mxu3 %v3391_v13 }
 0x29b   : > { %v3131_v51 = vand.u32 4294901760, %v3130_v17  ;;  %v6717_v26 = vand.u32 4294901760, %v3101_v60 }
 0x29c   : > { %v2817_v6 = vsub.f32 %v2805_v36, %v6652_v21  ;;  %3611 = vmatpush.msrb.mxu3 %v3393_v39  ;;  %v2808_v21 = vpop.f32.mrf.mxu1 }
 0x29d   : > { %3132 = vmatmul.f32.vlgmr.msrb.gmra.mxu0 %v3131_v51  ;;  %3191 = vmatmul.f32.gmra.mxu1 %v6717_v26  ;;  %v3136_v50 = vsub.f32 %v3101_v60, %v6717_v26 }
 0x29e   : > { %v2821_v16 = vsub.f32 %v2817_v6, %v6656_v23  ;;  %3487 = vmatpush.msrb.mxu0 %v6695_v12 }
 0x29f   : > { %v2773_v20 = vpop.f32.mrf.mxu0  ;;  %3225 = vmatmul.f32.vlgmr.msrb.gmra.mxu2 %v3128_v38  ;;  %v3137_v58 = vand.u32 4294901760, %v3136_v50 }
 0x2a0   : > { %v2831_v57 = vmul.f32 %v6614_v37, %v2821_v16  ;;  %v2774_v13 = vadd.f32 %v2773_v20, %v2735_v8  ;;  %3572 = vmatpush.msrb.mxu2 %v3444_v1  ;;  %3490 = vmatpush.msrb.mxu0 %v3449_v31  ;;  %v3361_v37 = vadd.f32 %v6702_v24, %v6619_v61 }
 0x2a1   : > { %3271 = vmatmul.f32.gmra.mxu3 %v3137_v58  ;;  %v3138_v44 = vsub.f32 %v3136_v50, %v3137_v58  ;;  %v3362_v61 = vadd.f32 %v2830_v53, %v6640_v63 }
 0x2a2   : > { %v2809_v2 = vadd.f32 %v2808_v21, %v2774_v13  ;;  %v3104_v25 = vsel %vm806_vm1, %v2831_v57, 0  ;;  %3576 = vmatpush.msrb.mxu2 %v3450_v56  ;;  %v3366_v46 = vsel %vm806_vm1, %v3361_v37, 0  ;;  %v3363_v7 = vadd.f32 %v2831_v57, %v6667_v49 }
 0x2a3   : > { %v3139_v14 = vand.u32 4294901760, %v3138_v44  ;;  %v3143_v23 = vand.u32 4294901760, %v3104_v25  ;;  %v3395_v4 = vand.u32 4294901760, %v3366_v46 }
 0x2a4   : > { %v2818_v12 = vsub.f32 %v2809_v2, %v6673_v28  ;;  %v3372_v63 = vsel %vm806_vm1, %v3363_v7, 0 }
 0x2a5   : > { %3140 = vmatmul.f32.gmra.mxu0 %v3139_v14  ;;  %3195 = vmatmul.f32.gmra.mxu1 %v3143_v23  ;;  %v3144_v22 = vsub.f32 %v3104_v25, %v3143_v23  ;;  %v3396_v3 = vsub.f32 %v3366_v46, %v3395_v4  ;;  %v3411_v32 = vand.u32 4294901760, %v3372_v63 }
 0x2a6   : > { %v2822_v1 = vsub.f32 %v2818_v12, %v6675_v29 }
 0x2a7   : > { %3230 = vmatmul.f32.gmra.mxu2 %v3136_v50  ;;  %v3145_v39 = vand.u32 4294901760, %v3144_v22  ;;  %v3397_v11 = vand.u32 4294901760, %v3396_v3  ;;  %v3412_v53 = vsub.f32 %v3372_v63, %v3411_v32 }
 0x2a8   : > { %v2832_v10 = vmul.f32 %v6630_v5, %v2822_v1  ;;  %v3369_v5 = vsel %vm806_vm1, %v3362_v61, 0 }
 0x2a9   : > { %3277 = vmatmul.f32.gmra.mxu3 %v3145_v39  ;;  %v3146_v19 = vsub.f32 %v3144_v22, %v3145_v39  ;;  %v3403_v38 = vand.u32 4294901760, %v3369_v5  ;;  %v3398_v18 = vsub.f32 %v3396_v3, %v3397_v11  ;;  %v3413_v42 = vand.u32 4294901760, %v3412_v53 }
 0x2aa   : > { %v3107_v31 = vsel %vm806_vm1, %v2832_v10, 0  ;;  %v3364_v9 = vadd.f32 %v2832_v10, %v6680_v47 }
 0x2ab   : > { %v3147_v40 = vand.u32 4294901760, %v3146_v19  ;;  %v3151_v28 = vand.u32 4294901760, %v3107_v31  ;;  %v3404_v0 = vsub.f32 %v3369_v5, %v3403_v38  ;;  %v3399_v15 = vand.u32 4294901760, %v3398_v18 }
 0x2ac   : > { %v3375_v49 = vsel %vm806_vm1, %v3364_v9, 0 }
 0x2ad   : > { %3148 = vmatmul.f32.gmra.mxu0 %v3147_v40  ;;  %3199 = vmatmul.f32.gmra.mxu1 %v3151_v28  ;;  %v3152_v52 = vsub.f32 %v3107_v31, %v3151_v28  ;;  %v3405_v30 = vand.u32 4294901760, %v3404_v0  ;;  %v3419_v17 = vand.u32 4294901760, %v3375_v49 }
 0x2af   : > { %3235 = vmatmul.f32.gmra.mxu2 %v3144_v22  ;;  %v3153_v29 = vand.u32 4294901760, %v3152_v52  ;;  %v3406_v54 = vsub.f32 %v3404_v0, %v3405_v30  ;;  %v3420_v34 = vsub.f32 %v3375_v49, %v3419_v17 }
 0x2b1   : > { %3283 = vmatmul.f32.gmra.mxu3 %v3153_v29  ;;  %v3154_v24 = vsub.f32 %v3152_v52, %v3153_v29  ;;  %v3407_v43 = vand.u32 4294901760, %v3406_v54  ;;  %v3421_v47 = vand.u32 4294901760, %v3420_v34 }
 0x2b3   : > { %v3155_v56 = vand.u32 4294901760, %v3154_v24  ;;  %v3422_v60 = vsub.f32 %v3420_v34, %v3421_v47 }
 0x2b5   : > { %3156 = vmatmul.f32.gmra.mxu0 %v3155_v56  ;;  %3345 = vmatmul.f32.vlgmr.msra.gmra.mxu1 %v6708_v35  ;;  %v3423_v51 = vand.u32 4294901760, %v3422_v60 }
 0x2b7   : > { %3240 = vmatmul.f32.gmra.mxu2 %v3152_v52 }
 0x2b9   : > { %3455 = vmatmul.f32.vlgmr.msra.gmra.mxu3 %v3395_v4 }
 0x2bd   : > { %3310 = vmatmul.f32.vlgmr.msra.gmra.mxu0 %v6708_v35  ;;  %3349 = vmatmul.f32.gmra.mxu1 %v6717_v26  ;;  %v3414_v35 = vsub.f32 %v3412_v53, %v3413_v42 }
 0x2bf   : > { %3400 = vmatmul.f32.vlgmr.msra.gmra.mxu2 %v3399_v15  ;;  %v3415_v36 = vand.u32 4294901760, %v3414_v35 }
 0x2c1   : > { %3459 = vmatmul.f32.gmra.mxu3 %v3403_v38 }
 0x2c5   : > { %3314 = vmatmul.f32.gmra.mxu0 %v6717_v26  ;;  %3353 = vmatmul.f32.gmra.mxu1 %v3143_v23 }
 0x2c7   : > { %3408 = vmatmul.f32.gmra.mxu2 %v3407_v43 }
 0x2c9   : > { %3463 = vmatmul.f32.gmra.mxu3 %v3411_v32 }
 0x2cd   : > { %3318 = vmatmul.f32.gmra.mxu0 %v3143_v23  ;;  %3357 = vmatmul.f32.gmra.mxu1 %v3151_v28 }
 0x2cf   : > { %3416 = vmatmul.f32.gmra.mxu2 %v3415_v36 }
 0x2d1   : > { %3467 = vmatmul.f32.gmra.mxu3 %v3419_v17 }
 0x2d5   : > { %3322 = vmatmul.f32.gmra.mxu0 %v3151_v28  ;;  %3533 = vmatmul.f32.vlgmr.msrb.gmra.mxu1 %v3397_v11 }
 0x2d6   : > { %v2962_v57 = vpop.f32.mrf.mxu0 }
 0x2d7   : > { %3424 = vmatmul.f32.gmra.mxu2 %v3423_v51 }
 0x2d8   : > { %v3002_v16 = vpop.f32.mrf.mxu1 }
 0x2d9   : > { %3613 = vmatmul.f32.vlgmr.msrb.gmra.mxu3 %v3395_v4 }
 0x2da   : > { %v2924_v26 = vpop.f32.mrf.mxu3 }
 0x2dd   : > { %3493 = vmatmul.f32.vlgmr.msrb.gmra.mxu0 %v3396_v3  ;;  %3539 = vmatmul.f32.gmra.mxu1 %v3405_v30 }
 0x2de   : > { %v2967_v2 = vpop.f32.mrf.mxu0 }
 0x2df   : > { %3578 = vmatmul.f32.vlgmr.msrb.gmra.mxu2 %v3395_v4 }
 0x2e0   : > { %v3008_v13 = vpop.f32.mrf.mxu1 }
 0x2e1   : > { %3617 = vmatmul.f32.gmra.mxu3 %v3403_v38 }
 0x2e2   : > { %v2869_v6 = vpop.f32.mrf.mxu2  ;;  %v2928_v62 = vpop.f32.mrf.mxu3 }
 0x2e5   : > { %3498 = vmatmul.f32.gmra.mxu0 %v3404_v0  ;;  %3545 = vmatmul.f32.gmra.mxu1 %v3413_v42 }
 0x2e6   : > { %v2972_v12 = vpop.f32.mrf.mxu0 }
 0x2e7   : > { %3582 = vmatmul.f32.gmra.mxu2 %v3403_v38  ;;  %v2925_v38 = vadd.f32 %v2924_v26, %v2869_v6 }
 0x2e8   : > { %v3014_v25 = vpop.f32.mrf.mxu1 }
 0x2e9   : > { %3621 = vmatmul.f32.gmra.mxu3 %v3411_v32  ;;  %v2963_v0 = vadd.f32 %v2962_v57, %v2925_v38 }
 0x2ea   : > { %v2877_v50 = vpop.f32.mrf.mxu2  ;;  %v2932_v8 = vpop.f32.mrf.mxu3 }
 0x2eb   : > { %v2929_v9 = vadd.f32 %v2928_v62, %v2877_v50  ;;  %v3003_v54 = vadd.f32 %v3002_v16, %v2963_v0 }
 0x2ed   : > { %3503 = vmatmul.f32.gmra.mxu0 %v3412_v53  ;;  %3551 = vmatmul.f32.gmra.mxu1 %v3421_v47 }
 0x2ee   : > { %v6751_v39 = vpop.f32.mrf.mxu0 }
 0x2ef   : > { %3586 = vmatmul.f32.gmra.mxu2 %v3411_v32 }
 0x2f0   : > { %v6749_v1 = vpop.f32.mrf.mxu1 }
 0x2f1   : > { %3625 = vmatmul.f32.gmra.mxu3 %v3419_v17 }
 0x2f2   : > { %v2885_v20 = vpop.f32.mrf.mxu2  ;;  %v6743_v58 = vpop.f32.mrf.mxu3 }
 0x2f3   : > { %v2933_v6 = vadd.f32 %v2932_v8, %v2885_v20 }
 0x2f5   : > { %3508 = vmatmul.f32.gmra.mxu0 %v3420_v34 }
 0x2f7   : > { %3590 = vmatmul.f32.gmra.mxu2 %v3419_v17  ;;  %v2968_v17 = vadd.f32 %v2967_v2, %v2929_v9 }
 0x2f9   : > { %v3009_v57 = vadd.f32 %v3008_v13, %v2968_v17 }
 0x2fa   : > { %v6745_v21 = vpop.f32.mrf.mxu2  ;;  %v3082_v44 = vpop.f32.mrf.mxu3 }
 0x2fb   : > { %v2937_v13 = vadd.f32 %v6743_v58, %v6745_v21 }
 0x302   : > { %v3047_v14 = vpop.f32.mrf.mxu2  ;;  %v3086_v23 = vpop.f32.mrf.mxu3 }
 0x303   : > { %v3048_v53 = vadd.f32 %v3047_v14, %v3003_v54 }
 0x305   : > { %v6759_v60 = vadd.f32 %v3082_v44, %v3048_v53 }
 0x30a   : > { %v3051_v22 = vpop.f32.mrf.mxu2  ;;  %v6747_v37 = vpop.f32.mrf.mxu3 }
 0x30b   : > { %v3052_v50 = vadd.f32 %v3051_v22, %v3009_v57 }
 0x312   : > { %v3055_v10 = vpop.f32.mrf.mxu2  ;;  %v3188_v19 = vpop.f32.mrf.mxu1 }
 0x313   : > { %v6753_v31 = vpop.f32.mrf.mxu3 }
 0x31a   : > { %v6755_v46 = vpop.f32.mrf.mxu2  ;;  %v3133_v40 = vpop.f32.mrf.mxu0 }
 0x31b   : > { %v3192_v28 = vpop.f32.mrf.mxu1  ;;  %v3189_v63 = vadd.f32 %v3188_v19, %v3133_v40  ;;  %v2973_v19 = vadd.f32 %v2972_v12, %v2933_v6 }
 0x31c   : > { %v3266_v52 = vpop.f32.mrf.mxu3 }
 0x31d   : > { %v3015_v22 = vadd.f32 %v3014_v25, %v2973_v19 }
 0x31f   : > { %v3056_v12 = vadd.f32 %v3055_v10, %v3015_v22 }
 0x321   : > { %v6786_v58 = vadd.f32 %v6747_v37, %v3056_v12 }
 0x322   : > { %v3141_v4 = vpop.f32.mrf.mxu0  ;;  %v3226_v61 = vpop.f32.mrf.mxu2 }
 0x323   : > { %v3196_v29 = vpop.f32.mrf.mxu1  ;;  %v3227_v32 = vadd.f32 %v3226_v61, %v3189_v63  ;;  %v3193_v35 = vadd.f32 %v3192_v28, %v3141_v4 }
 0x324   : > { %v3272_v24 = vpop.f32.mrf.mxu3 }
 0x325   : > { %v3267_v49 = vadd.f32 %v3266_v52, %v3227_v32  ;;  %v6770_v52 = vadd.f32 %v3086_v23, %v3052_v50 }
 0x32a   : > { %v3149_v3 = vpop.f32.mrf.mxu0  ;;  %v3231_v5 = vpop.f32.mrf.mxu2 }
 0x32b   : > { %v3200_v56 = vpop.f32.mrf.mxu1  ;;  %v3232_v51 = vadd.f32 %v3231_v5, %v3193_v35  ;;  %v3197_v40 = vadd.f32 %v3196_v29, %v3149_v3  ;;  %v2978_v5 = vadd.f32 %v6751_v39, %v2937_v13 }
 0x32c   : > { %v3278_v11 = vpop.f32.mrf.mxu3 }
 0x32d   : > { %v3273_v16 = vadd.f32 %v3272_v24, %v3232_v51  ;;  %v3021_v10 = vadd.f32 %v6749_v1, %v2978_v5 }
 0x332   : > { %v3157_v7 = vpop.f32.mrf.mxu0  ;;  %v3236_v18 = vpop.f32.mrf.mxu2 }
 0x333   : > { %v3346_v15 = vpop.f32.mrf.mxu1  ;;  %v3237_v4 = vadd.f32 %v3236_v18, %v3197_v40  ;;  %v3201_v38 = vadd.f32 %v3200_v56, %v3157_v7  ;;  %v3060_v7 = vadd.f32 %v6755_v46, %v3021_v10 }
 0x334   : > { %v3284_v30 = vpop.f32.mrf.mxu3 }
 0x335   : > { %v3279_v29 = vadd.f32 %v3278_v11, %v3237_v4 }
 0x33a   : > { %v3241_v43 = vpop.f32.mrf.mxu2  ;;  %v3311_v42 = vpop.f32.mrf.mxu0 }
 0x33b   : > { %v3312_v34 = vadd.f32 %v3311_v42, %v3267_v49  ;;  %v3350_v36 = vpop.f32.mrf.mxu1  ;;  %v3242_v21 = vadd.f32 %v3241_v43, %v3201_v38  ;;  %v6803_v42 = vadd.f32 %v6753_v31, %v3060_v7 }
 0x33c   : > { %v6757_v47 = vpop.f32.mrf.mxu3 }
 0x33d   : > { %v6761_v26 = vadd.f32 %v3346_v15, %v3312_v34  ;;  %v3285_v32 = vadd.f32 %v3284_v30, %v3242_v21 }
 0x33f   : > { %v3629_v62 = vadd.f32 %v6761_v26, %v6759_v60 }
 0x341   : > { %3641 = vst.msk [vmem:[#allocation2] sm:$0xff] %vm806_vm1, %v3629_v62 }
 0x342   : > { %v3315_v2 = vpop.f32.mrf.mxu0  ;;  %v6766_v14 = vpop.f32.mrf.mxu2 }
 0x343   : > { %v3316_v28 = vadd.f32 %v3315_v2, %v3273_v16  ;;  %v3354_v20 = vpop.f32.mrf.mxu1  ;;  %v3457_v57 = vadd.f32 %v6757_v47, %v6766_v14 }
 0x344   : > { %v6768_v44 = vpop.f32.mrf.mxu3 }
 0x345   : > { %v6772_v8 = vadd.f32 %v3350_v36, %v3316_v28 }
 0x347   : > { %v3630_v61 = vadd.f32 %v6772_v8, %v6770_v52 }
 0x348   : > { %v6778_v24 = vld [vmem:[#allocation2] sm:$0xff] }
 0x349   : > { %3642 = vst.msk [vmem:[#allocation2 + $0x8] sm:$0xff] %vm806_vm1, %v3630_v61  ;;  %v3669_v0 = vand.u32 4294901760, %v6778_v24  ;;  %v7125_v61 = vld [vmem:[#allocation33_spill] sm:$0xff] }
 0x34a   : > { %v3319_v3 = vpop.f32.mrf.mxu0  ;;  %v3409_v23 = vpop.f32.mrf.mxu2 }
 0x34b   : > { %v3320_v18 = vadd.f32 %v3319_v3, %v3279_v29  ;;  %v3358_v15 = vpop.f32.mrf.mxu1  ;;  %v3709_v39 = vsub.f32 %v6778_v24, %v3669_v0  ;;  %v3461_v47 = vadd.f32 %v6768_v44, %v3409_v23 }
 0x34c   : > { %v6783_v63 = vpop.f32.mrf.mxu3 }
 0x34d   : > { %v6788_v25 = vadd.f32 %v3354_v20, %v3320_v18  ;;  %v3710_v49 = vand.u32 4294901760, %v3709_v39 }
 0x34f   : > { %v3631_v11 = vadd.f32 %v6788_v25, %v6786_v58  ;;  %v3711_v34 = vsub.f32 %v3709_v39, %v3710_v49 }
 0x350   : > { %v6794_v56 = vld [vmem:[#allocation2 + $0x8] sm:$0xff] }
 0x351   : > { %3643 = vst.msk [vmem:[#allocation2 + $0x10] sm:$0xff] %vm806_vm1, %v3631_v11  ;;  %v3667_v37 = vand.u32 4294901760, %v6794_v56  ;;  %v3712_v62 = vand.u32 4294901760, %v3711_v34 }
 0x352   : > { %v3323_v9 = vpop.f32.mrf.mxu0  ;;  %v3417_v54 = vpop.f32.mrf.mxu2 }
 0x353   : > { %v3324_v53 = vadd.f32 %v3323_v9, %v3285_v32  ;;  %3668 = vmatpush.msra.mxu0 %v3667_v37  ;;  %3769 = vmatpush.msra.mxu3 %v3667_v37  ;;  %v3703_v1 = vsub.f32 %v6794_v56, %v3667_v37  ;;  %v3534_v31 = vpop.f32.mrf.mxu1  ;;  %v3465_v38 = vadd.f32 %v6783_v63, %v3417_v54 }
 0x354   : > { %v6800_v43 = vpop.f32.mrf.mxu3 }
 0x355   : > { %v6805_v17 = vadd.f32 %v3358_v15, %v3324_v53  ;;  %3670 = vmatpush.msra.mxu0 %v3669_v0  ;;  %3739 = vmatpush.msra.mxu2 %v3703_v1  ;;  %v3704_v46 = vand.u32 4294901760, %v3703_v1 }
 0x356   : > { %3771 = vmatpush.msra.mxu3 %v3669_v0  ;;  %3676 = vmatmul.f32.vlgmr.msra.gmra.mxu0 %v6186_v59 }
 0x357   : > { %v3632_v30 = vadd.f32 %v6805_v17, %v6803_v42  ;;  %3742 = vmatpush.msra.mxu2 %v3709_v39  ;;  %3802 = vmatpush.msrb.mxu0 %v3704_v46  ;;  %v3705_v35 = vsub.f32 %v3703_v1, %v3704_v46 }
 0x358   : > { %3745 = vmatmul.f32.vlgmr.msra.gmra.mxu2 %v6165_v41  ;;  %3775 = vmatmul.f32.vlgmr.msra.gmra.mxu3 %v6175_v48 }
 0x359   : > { %3644 = vst.msk [vmem:[#allocation2 + $0x18] sm:$0xff] %vm806_vm1, %v3632_v30  ;;  %3806 = vmatpush.msrb.mxu0 %v3710_v49  ;;  %v3706_v36 = vand.u32 4294901760, %v3705_v35 }
 0x35a   : > { %v3425_v51 = vpop.f32.mrf.mxu2  ;;  %v3494_v6 = vpop.f32.mrf.mxu0 }
 0x35b   : > { %3707 = vmatpush.msra.mxu1 %v3706_v36  ;;  %v3495_v50 = vadd.f32 %v3494_v6, %v3457_v57  ;;  %v3540_v28 = vpop.f32.mrf.mxu1  ;;  %v3469_v63 = vadd.f32 %v6800_v43, %v3425_v51 }
 0x35c   : > { %v3614_v16 = vpop.f32.mrf.mxu3 }
 0x35d   : > { %3713 = vmatpush.msra.mxu1 %v3712_v62  ;;  %v3535_v2 = vadd.f32 %v3534_v31, %v3495_v50 }
 0x35e   : > { %3684 = vmatmul.f32.gmra.mxu0 %v6198_v27  ;;  %3715 = vmatmul.f32.vlgmr.msra.gmra.mxu1 %v6152_v33 }
 0x35f   : > { %3831 = vmatpush.msrb.mxu1 %v3667_v37 }
 0x360   : > { %3750 = vmatmul.f32.gmra.mxu2 %v6171_v45  ;;  %3781 = vmatmul.f32.gmra.mxu3 %v6184_v55 }
 0x361   : > { %3833 = vmatpush.msrb.mxu1 %v3669_v0 }
 0x362   : > { %v3499_v19 = vpop.f32.mrf.mxu0  ;;  %v3579_v40 = vpop.f32.mrf.mxu2 }
 0x363   : > { %v3580_v14 = vadd.f32 %v3579_v40, %v3535_v2  ;;  %v3500_v4 = vadd.f32 %v3499_v19, %v3461_v47  ;;  %v3546_v0 = vpop.f32.mrf.mxu1  ;;  %v7127_v19 = vld [vmem:[#allocation39_spill] sm:$0xff]  ;;  %v7128_v47 = vld [vmem:[#allocation36_spill] sm:$0xff] }
 0x364   : > { %v3618_v22 = vpop.f32.mrf.mxu3 }
 0x365   : > { %v3615_v20 = vadd.f32 %v3614_v16, %v3580_v14  ;;  %v3541_v29 = vadd.f32 %v3540_v28, %v3500_v4 }
 0x366   : > { %3808 = vmatmul.f32.vlgmr.msrb.gmra.mxu0 %v6152_v33  ;;  %3719 = vmatmul.f32.gmra.mxu1 %v7125_v61 }
 0x367   : > { %v3633_v13 = vsub.f32 %v3615_v20, %v6759_v60 }
 0x369   : > { %v3637_v12 = vadd.f32 %v3633_v13, %v6761_v26 }
 0x36a   : > { %v3504_v3 = vpop.f32.mrf.mxu0  ;;  %v3583_v5 = vpop.f32.mrf.mxu2 }
 0x36b   : > { %3645 = vst.msk [vmem:[#allocation3] sm:$0xff] %vm806_vm1, %v3637_v12  ;;  %v3584_v44 = vadd.f32 %v3583_v5, %v3541_v29  ;;  %v3505_v23 = vadd.f32 %v3504_v3, %v3465_v38  ;;  %v6862_v38 = vld [vmem:[#allocation2 + $0x18] sm:$0xff] }
 0x36c   : > { %v3622_v26 = vpop.f32.mrf.mxu3 }
 0x36d   : > { %v3619_v18 = vadd.f32 %v3618_v22, %v3584_v44  ;;  %v3547_v10 = vadd.f32 %v3546_v0, %v3505_v23 }
 0x36e   : > { %3812 = vmatmul.f32.gmra.mxu0 %v7125_v61  ;;  %3835 = vmatmul.f32.vlgmr.msrb.gmra.mxu1 %v6152_v33 }
 0x36f   : > { %v3634_v60 = vsub.f32 %v3619_v18, %v6770_v52  ;;  %v6867_v18 = vld [vmem:[#allocation2 + $0x10] sm:$0xff] }
 0x371   : > { %v3638_v21 = vadd.f32 %v3634_v60, %v6772_v8  ;;  %v3552_v8 = vpop.f32.mrf.mxu1  ;;  %v6872_v60 = vand.u32 4294901760, %v6862_v38 }
 0x372   : > { %v3509_v11 = vpop.f32.mrf.mxu0  ;;  %v3587_v15 = vpop.f32.mrf.mxu2  ;;  %v3651_v39 = vld [vmem:[#allocation3] sm:$0xff] }
 0x373   : > { %3646 = vst.msk [vmem:[#allocation3 + $0x8] sm:$0xff] %vm806_vm1, %v3638_v21  ;;  %v3588_v7 = vadd.f32 %v3587_v15, %v3547_v10  ;;  %v3510_v32 = vadd.f32 %v3509_v11, %v3469_v63  ;;  %v4033_v9 = vadd.f32 %v3651_v39, %v6778_v24  ;;  %v6833_v54 = vand.u32 4294901760, %v3651_v39  ;;  %v7131_v21 = vld [vmem:[#allocation41_spill] sm:$0xff]  ;;  %v7133_v11 = vld [vmem:[#allocation40_spill] sm:$0xff] }
 0x374   : > { %v3626_v31 = vpop.f32.mrf.mxu3  ;;  %v6878_v15 = vand.u32 4294901760, %v6867_v18 }
 0x375   : > { %v3623_v37 = vadd.f32 %v3622_v26, %v3588_v7  ;;  %v3553_v1 = vadd.f32 %v3552_v8, %v3510_v32  ;;  %v6838_v49 = vand.u32 4294901760, %v4033_v9  ;;  %v3899_v30 = vsub.f32 %v3651_v39, %v6833_v54  ;;  %v7132_v26 = vld [vmem:[#allocation34_spill] sm:$0xff] }
 0x376   : > { %3839 = vmatmul.f32.gmra.mxu1 %v7125_v61  ;;  %v7134_v39 = vld [vmem:[#allocation38_spill] sm:$0xff]  ;;  %v4319_v32 = vsub.f32 %v6862_v38, %v6872_v60 }
 0x377   : > { %v3635_v52 = vsub.f32 %v3623_v37, %v6786_v58  ;;  %v7126_v58 = vld [vmem:[#allocation31_spill] sm:$0xff]  ;;  %v4097_v57 = vsub.f32 %v4033_v9, %v6838_v49  ;;  %v3900_v62 = vand.u32 4294901760, %v3899_v30  ;;  %v4325_v37 = vsub.f32 %v6867_v18, %v6878_v15 }
 0x378   : > { %v4036_v36 = vsel %vm806_vm1, %v7126_v58, 0 }
 0x379   : > { %v3639_v53 = vadd.f32 %v3635_v52, %v6788_v25  ;;  %v4098_v4 = vand.u32 4294901760, %v4097_v57  ;;  %v3901_v20 = vsub.f32 %v3899_v30, %v3900_v62 }
 0x37a   : > { %v3591_v43 = vpop.f32.mrf.mxu2  ;;  %v3652_v46 = vld [vmem:[#allocation3 + $0x8] sm:$0xff] }
 0x37b   : > { %3647 = vst.msk [vmem:[#allocation3 + $0x10] sm:$0xff] %vm806_vm1, %v3639_v53  ;;  %v3592_v35 = vadd.f32 %v3591_v43, %v3553_v1  ;;  %v3857_v24 = vand.u32 4294901760, %v3652_v46  ;;  %v4034_v34 = vadd.f32 %v3652_v46, %v6794_v56  ;;  %v6848_v56 = vand.u32 4294901760, %v4036_v36  ;;  %v7135_v1 = vld [vmem:[#allocation37_spill] sm:$0xff] }
 0x37c   : > { %v4099_v5 = vsub.f32 %v4097_v57, %v4098_v4  ;;  %v3902_v44 = vand.u32 4294901760, %v3901_v20 }
 0x37d   : > { %v3627_v51 = vadd.f32 %v3626_v31, %v3592_v35  ;;  %3858 = vmatpush.msrb.mxu2 %v3857_v24  ;;  %3959 = vmatpush.msra.mxu1 %v3857_v24  ;;  %v3893_v25 = vsub.f32 %v3652_v46, %v3857_v24  ;;  %v4055_v6 = vand.u32 4294901760, %v4034_v34  ;;  %v6857_v12 = vsub.f32 %v4036_v36, %v6848_v56 }
 0x37e   : > { %v4100_v10 = vand.u32 4294901760, %v4099_v5  ;;  %v4326_v46 = vand.u32 4294901760, %v4325_v37 }
 0x37f   : > { %v3636_v50 = vsub.f32 %v3627_v51, %v6803_v42  ;;  %3860 = vmatpush.msrb.mxu2 %v6833_v54  ;;  %3929 = vmatpush.msra.mxu0 %v3893_v25  ;;  %v3894_v16 = vand.u32 4294901760, %v3893_v25  ;;  %v4091_v2 = vsub.f32 %v4034_v34, %v4055_v6  ;;  %v7129_v42 = vld [vmem:[#allocation35_spill] sm:$0xff]  ;;  %v6865_v23 = vand.u32 4294901760, %v6857_v12 }
 0x380   : > { %3961 = vmatpush.msra.mxu1 %v6833_v54  ;;  %3866 = vmatmul.f32.vlgmr.msrb.gmra.mxu2 %v7127_v19  ;;  %v4327_v34 = vsub.f32 %v4325_v37, %v4326_v46 }
 0x381   : > { %v3640_v40 = vadd.f32 %v3636_v50, %v6805_v17  ;;  %3965 = vmatmul.f32.vlgmr.msra.gmra.mxu1 %v7128_v47  ;;  %3932 = vmatpush.msra.mxu0 %v3899_v30  ;;  %v3895_v14 = vsub.f32 %v3893_v25, %v3894_v16  ;;  %v4092_v28 = vand.u32 4294901760, %v4091_v2  ;;  %v7130_v17 = vld [vmem:[#allocation32_spill] sm:$0xff]  ;;  %v4062_v63 = vsub.f32 %v6857_v12, %v6865_v23 }
 0x382   : > { %3992 = vmatpush.msra.mxu2 %v3894_v16  ;;  %3935 = vmatmul.f32.vlgmr.msra.gmra.mxu0 %v7129_v42  ;;  %v4039_v29 = vsel %vm806_vm1, %v7130_v17, 0  ;;  %v4267_v53 = vld [vmem:[#allocation3 + $0x10] sm:$0xff]  ;;  %v4328_v25 = vand.u32 4294901760, %v4327_v34 }
 0x383   : > { %3648 = vst.msk [vmem:[#allocation3 + $0x18] sm:$0xff] %vm806_vm1, %v3640_v40  ;;  %4056 = vmatpush.msrb.mxu0 %v4055_v6  ;;  %v3896_v13 = vand.u32 4294901760, %v3895_v14  ;;  %v4093_v22 = vsub.f32 %v4091_v2, %v4092_v28  ;;  %v6869_v0 = vand.u32 4294901760, %v4039_v29  ;;  %v6895_v52 = vand.u32 4294901760, %v4062_v63 }
 0x384   : > { %3996 = vmatpush.msra.mxu2 %v3900_v62  ;;  %v4475_v30 = vand.u32 4294901760, %v4267_v53  ;;  %v4649_v40 = vadd.f32 %v4267_v53, %v6867_v18 }
 0x385   : > { %4058 = vmatpush.msrb.mxu0 %v6838_v49  ;;  %v4094_v3 = vand.u32 4294901760, %v4093_v22  ;;  %3897 = vmatpush.msrb.mxu3 %v3896_v13  ;;  %v6884_v7 = vsub.f32 %v4039_v29, %v6869_v0 }
 0x386   : > { %4127 = vmatpush.msrb.mxu2 %v4091_v2  ;;  %v4515_v58 = vsub.f32 %v4267_v53, %v4475_v30 }
 0x387   : > { %4190 = vmatpush.msra.mxu0 %v4092_v28  ;;  %4095 = vmatpush.msrb.mxu1 %v4094_v3  ;;  %v6898_v8 = vand.u32 4294901760, %v6884_v7 }
 0x388   : > { %4130 = vmatpush.msrb.mxu2 %v4097_v57  ;;  %3903 = vmatpush.msrb.mxu3 %v3902_v44 }
 0x389   : > { %4194 = vmatpush.msra.mxu0 %v4098_v4  ;;  %3874 = vmatmul.f32.gmra.mxu2 %v7131_v21 }
 0x38a   : > { %3905 = vmatmul.f32.vlgmr.msrb.gmra.mxu3 %v7132_v26  ;;  %3971 = vmatmul.f32.gmra.mxu1 %v7133_v11  ;;  %v6892_v9 = vld [vmem:[#allocation3 + $0x18] sm:$0xff] }
 0x38b   : > { %4021 = vmatpush.msra.mxu3 %v3857_v24  ;;  %4101 = vmatpush.msrb.mxu1 %v4100_v10  ;;  %v4473_v43 = vand.u32 4294901760, %v6892_v9  ;;  %v4650_v2 = vadd.f32 %v6892_v9, %v6862_v38 }
 0x38c   : > { %3940 = vmatmul.f32.gmra.mxu0 %v7134_v39 }
 0x38d   : > { %4023 = vmatpush.msra.mxu3 %v6833_v54  ;;  %4219 = vmatpush.msra.mxu1 %v4055_v6  ;;  %v4320_v54 = vand.u32 4294901760, %v4319_v32  ;;  %v4509_v24 = vsub.f32 %v6892_v9, %v4473_v43  ;;  %v4665_v14 = vand.u32 4294901760, %v4650_v2 }
 0x38f   : > { %4157 = vmatpush.msrb.mxu3 %v4055_v6  ;;  %4221 = vmatpush.msra.mxu1 %v6838_v49  ;;  %v4321_v35 = vsub.f32 %v4319_v32, %v4320_v54  ;;  %v4510_v51 = vand.u32 4294901760, %v4509_v24  ;;  %v4516_v6 = vand.u32 4294901760, %v4515_v58 }
 0x391   : > { %4159 = vmatpush.msrb.mxu3 %v6838_v49  ;;  %3998 = vmatmul.f32.vlgmr.msra.gmra.mxu2 %v7132_v26  ;;  %v4070_v49 = vsub.f32 %v6884_v7, %v6898_v8  ;;  %v4322_v36 = vand.u32 4294901760, %v4321_v35  ;;  %v4511_v57 = vsub.f32 %v4509_v24, %v4510_v51  ;;  %v4517_v62 = vsub.f32 %v4515_v58, %v4516_v6 }
 0x392   : > { %3909 = vmatmul.f32.gmra.mxu3 %v7135_v1  ;;  %4103 = vmatmul.f32.vlgmr.msrb.gmra.mxu1 %v6848_v56 }
 0x393   : > { %4284 = vmatpush.msra.mxu2 %v6872_v60  ;;  %4385 = vmatpush.msrb.mxu1 %v6872_v60  ;;  %v6912_v31 = vand.u32 4294901760, %v4070_v49  ;;  %v4512_v50 = vand.u32 4294901760, %v4511_v57  ;;  %v4518_v16 = vand.u32 4294901760, %v4517_v62 }
 0x394   : > { %4064 = vmatmul.f32.vlgmr.msrb.gmra.mxu0 %v6895_v52 }
 0x395   : > { %4286 = vmatpush.msra.mxu2 %v6878_v15  ;;  %4355 = vmatpush.msrb.mxu0 %v4319_v32 }
 0x396   : > { %4387 = vmatpush.msrb.mxu1 %v6878_v15 }
 0x397   : > { %4358 = vmatpush.msrb.mxu0 %v4325_v37 }
 0x399   : > { %4002 = vmatmul.f32.gmra.mxu2 %v7135_v1 }
 0x39a   : > { %4025 = vmatmul.f32.vlgmr.msra.gmra.mxu3 %v7132_v26  ;;  %4107 = vmatmul.f32.gmra.mxu1 %v6869_v0 }
 0x39b   : > { %4323 = vmatpush.msra.mxu3 %v4322_v36 }
 0x39c   : > { %4072 = vmatmul.f32.gmra.mxu0 %v6912_v31 }
 0x39d   : > { %4329 = vmatpush.msra.mxu3 %v4328_v25 }
 0x3a1   : > { %4133 = vmatmul.f32.vlgmr.msrb.gmra.mxu2 %v6857_v12 }
 0x3a2   : > { %4029 = vmatmul.f32.gmra.mxu3 %v7135_v1  ;;  %4223 = vmatmul.f32.vlgmr.msra.gmra.mxu1 %v6848_v56 }
 0x3a3   : > { %4418 = vmatpush.msrb.mxu2 %v4320_v54  ;;  %4513 = vmatpush.msra.mxu1 %v4512_v50 }
 0x3a4   : > { %4196 = vmatmul.f32.vlgmr.msra.gmra.mxu0 %v6848_v56 }
 0x3a5   : > { %4422 = vmatpush.msrb.mxu2 %v4326_v46  ;;  %4474 = vmatpush.msra.mxu0 %v4473_v43 }
 0x3a6   : > { %4519 = vmatpush.msra.mxu1 %v4518_v16 }
 0x3a7   : > { %4476 = vmatpush.msra.mxu0 %v4475_v30 }
 0x3a9   : > { %4138 = vmatmul.f32.gmra.mxu2 %v6884_v7 }
 0x3aa   : > { %4163 = vmatmul.f32.vlgmr.msrb.gmra.mxu3 %v6865_v23  ;;  %4227 = vmatmul.f32.gmra.mxu1 %v6869_v0 }
 0x3ab   : > { %4447 = vmatpush.msrb.mxu3 %v6872_v60 }
 0x3ac   : > { %4200 = vmatmul.f32.gmra.mxu0 %v6869_v0 }
 0x3ad   : > { %4449 = vmatpush.msrb.mxu3 %v6878_v15 }
 0x3b1   : > { %4292 = vmatmul.f32.vlgmr.msra.gmra.mxu2 %v6186_v59 }
 0x3b2   : > { %4169 = vmatmul.f32.gmra.mxu3 %v6898_v8  ;;  %4391 = vmatmul.f32.vlgmr.msrb.gmra.mxu1 %v6175_v48  ;;  %v4667_v48 = vand.u32 4294901760, %v4649_v40 }
 0x3b3   : > { %4545 = vmatpush.msra.mxu2 %v4509_v24  ;;  %4637 = vmatpush.msrb.mxu1 %v4473_v43 }
 0x3b4   : > { %4361 = vmatmul.f32.vlgmr.msrb.gmra.mxu0 %v6165_v41  ;;  %v4701_v41 = vsub.f32 %v4650_v2, %v4665_v14  ;;  %v4707_v59 = vsub.f32 %v4649_v40, %v4667_v48 }
 0x3b5   : > { %4548 = vmatpush.msra.mxu2 %v4515_v58  ;;  %4608 = vmatpush.msrb.mxu0 %v4510_v51 }
 0x3b6   : > { %4639 = vmatpush.msrb.mxu1 %v4475_v30  ;;  %v4702_v28 = vand.u32 4294901760, %v4701_v41 }
 0x3b7   : > { %4612 = vmatpush.msrb.mxu0 %v4516_v6 }
 0x3b9   : > { %4300 = vmatmul.f32.gmra.mxu2 %v6198_v27  ;;  %v4708_v27 = vand.u32 4294901760, %v4707_v59 }
 0x3ba   : > { %4331 = vmatmul.f32.vlgmr.msra.gmra.mxu3 %v6152_v33  ;;  %4397 = vmatmul.f32.gmra.mxu1 %v6184_v55  ;;  %v4703_v55 = vsub.f32 %v4701_v41, %v4702_v28 }
 0x3bb   : > { %4575 = vmatpush.msra.mxu3 %v4473_v43 }
 0x3bc   : > { %4366 = vmatmul.f32.gmra.mxu0 %v6171_v45  ;;  %v4709_v45 = vsub.f32 %v4707_v59, %v4708_v27  ;;  %v4704_v4 = vand.u32 4294901760, %v4703_v55 }
 0x3bd   : > { %4577 = vmatpush.msra.mxu3 %v4475_v30 }
 0x3be   : > { %v4710_v20 = vand.u32 4294901760, %v4709_v45 }
 0x3c1   : > { %4424 = vmatmul.f32.vlgmr.msrb.gmra.mxu2 %v6152_v33 }
 0x3c2   : > { %4335 = vmatmul.f32.gmra.mxu3 %v7125_v61  ;;  %4521 = vmatmul.f32.vlgmr.msra.gmra.mxu1 %v7132_v26 }
 0x3c3   : > { %4666 = vmatpush.msrb.mxu2 %v4665_v14  ;;  %4767 = vmatpush.msra.mxu1 %v4665_v14 }
 0x3c4   : > { %4482 = vmatmul.f32.vlgmr.msra.gmra.mxu0 %v7127_v19 }
 0x3c5   : > { %4668 = vmatpush.msrb.mxu2 %v4667_v48  ;;  %4737 = vmatpush.msra.mxu0 %v4701_v41 }
 0x3c6   : > { %4769 = vmatpush.msra.mxu1 %v4667_v48 }
 0x3c7   : > { %4740 = vmatpush.msra.mxu0 %v4707_v59 }
 0x3c9   : > { %4428 = vmatmul.f32.gmra.mxu2 %v7125_v61 }
 0x3ca   : > { %4451 = vmatmul.f32.vlgmr.msrb.gmra.mxu3 %v6152_v33  ;;  %4525 = vmatmul.f32.gmra.mxu1 %v7135_v1 }
 0x3cb   : > { %4705 = vmatpush.msrb.mxu3 %v4704_v4 }
 0x3cc   : > { %4490 = vmatmul.f32.gmra.mxu0 %v7131_v21 }
 0x3cd   : > { %4711 = vmatpush.msrb.mxu3 %v4710_v20 }
 0x3d1   : > { %4551 = vmatmul.f32.vlgmr.msra.gmra.mxu2 %v7129_v42 }
 0x3d2   : > { %4455 = vmatmul.f32.gmra.mxu3 %v7125_v61  ;;  %4800 = vmatpush.msra.mxu2 %v4702_v28  ;;  %v4237_v28 = vld [vmem:[%s6048_s6] sm:$0xff] }
 0x3d3   : > { %4641 = vmatmul.f32.vlgmr.msrb.gmra.mxu1 %v7132_v26  ;;  %v3677_v33 = vpop.f32.mrf.mxu0 }
 0x3d4   : > { %4614 = vmatmul.f32.vlgmr.msrb.gmra.mxu0 %v7132_v26  ;;  %4804 = vmatpush.msra.mxu2 %v4708_v27  ;;  %v4239_v27 = vld [vmem:[%s6056_s11] sm:$0xff] }
 0x3d9   : > { %4556 = vmatmul.f32.gmra.mxu2 %v7134_v39 }
 0x3da   : > { %4581 = vmatmul.f32.vlgmr.msra.gmra.mxu3 %v7128_v47 }
 0x3db   : > { %4829 = vmatpush.msra.mxu3 %v4665_v14  ;;  %4645 = vmatmul.f32.gmra.mxu1 %v7135_v1  ;;  %v3716_v61 = vpop.f32.mrf.mxu1  ;;  %v3685_v19 = vpop.f32.mrf.mxu0 }
 0x3dc   : > { %4618 = vmatmul.f32.gmra.mxu0 %v7135_v1  ;;  %v3746_v22 = vpop.f32.mrf.mxu2  ;;  %v3776_v3 = vpop.f32.mrf.mxu3  ;;  %v3717_v37 = vadd.f32 %v3716_v61, %v3677_v33 }
 0x3dd   : > { %4831 = vmatpush.msra.mxu3 %v4667_v48 }
 0x3de   : > { %v3747_v54 = vadd.f32 %v3746_v22, %v3717_v37 }
 0x3e0   : > { %v3777_v46 = vadd.f32 %v3776_v3, %v3747_v54 }
 0x3e1   : > { %4674 = vmatmul.f32.vlgmr.msrb.gmra.mxu2 %v6895_v52 }
 0x3e2   : > { %4587 = vmatmul.f32.gmra.mxu3 %v7133_v11 }
 0x3e3   : > { %4773 = vmatmul.f32.vlgmr.msra.gmra.mxu1 %v6865_v23  ;;  %v3720_v47 = vpop.f32.mrf.mxu1  ;;  %v3809_v13 = vpop.f32.mrf.mxu0 }
 0x3e4   : > { %4743 = vmatmul.f32.vlgmr.msra.gmra.mxu0 %v6857_v12  ;;  %v3751_v12 = vpop.f32.mrf.mxu2  ;;  %v3782_v23 = vpop.f32.mrf.mxu3  ;;  %v3721_v49 = vadd.f32 %v3720_v47, %v3685_v19 }
 0x3e6   : > { %v3752_v25 = vadd.f32 %v3751_v12, %v3721_v49 }
 0x3e8   : > { %v3783_v14 = vadd.f32 %v3782_v23, %v3752_v25  ;;  %v4241_v23 = vld [vmem:[%s6093_s14] sm:$0xff] }
 0x3e9   : > { %4682 = vmatmul.f32.gmra.mxu2 %v6912_v31  ;;  %v3810_v31 = vadd.f32 %v3809_v13, %v3777_v46 }
 0x3ea   : > { %4713 = vmatmul.f32.vlgmr.msrb.gmra.mxu3 %v6848_v56 }
 0x3eb   : > { %4779 = vmatmul.f32.gmra.mxu1 %v6898_v8  ;;  %v3836_v42 = vpop.f32.mrf.mxu1  ;;  %v3813_v29 = vpop.f32.mrf.mxu0 }
 0x3ec   : > { %4748 = vmatmul.f32.gmra.mxu0 %v6884_v7  ;;  %v3837_v40 = vadd.f32 %v3836_v42, %v3810_v31  ;;  %v3814_v61 = vadd.f32 %v3813_v29, %v3783_v14 }
 0x3f1   : > { %4806 = vmatmul.f32.vlgmr.msra.gmra.mxu2 %v6848_v56 }
 0x3f2   : > { %4717 = vmatmul.f32.gmra.mxu3 %v6869_v0 }
 0x3f3   : > { %v6965_v17 = vpop.f32.mrf.mxu1 }
 0x3f9   : > { %4810 = vmatmul.f32.gmra.mxu2 %v6869_v0 }
 0x3fa   : > { %4833 = vmatmul.f32.vlgmr.msra.gmra.mxu3 %v6848_v56 }
 0x3fe   : > { %v3966_v5 = vpop.f32.mrf.mxu1 }
 0x3ff   : > { %v3936_v38 = vpop.f32.mrf.mxu0 }
 0x402   : > { %4837 = vmatmul.f32.gmra.mxu3 %v6869_v0 }
 0x403   : > { %v3867_v44 = vpop.f32.mrf.mxu2 }
 0x407   : > { %v3972_v18 = vpop.f32.mrf.mxu1 }
 0x409   : > { %v3941_v60 = vpop.f32.mrf.mxu0 }
 0x40c   : > { %v3875_v26 = vpop.f32.mrf.mxu2 }
 0x40d   : > { %v3906_v21 = vpop.f32.mrf.mxu3 }
 0x40e   : > { %v3907_v52 = vadd.f32 %v3906_v21, %v3867_v44 }
 0x40f   : > { %v4104_v10 = vpop.f32.mrf.mxu1 }
 0x410   : > { %v3937_v1 = vadd.f32 %v3936_v38, %v3907_v52 }
 0x411   : > { %v4065_v11 = vpop.f32.mrf.mxu0 }
 0x412   : > { %v4105_v43 = vadd.f32 %v4104_v10, %v4065_v11  ;;  %v3967_v35 = vadd.f32 %v3966_v5, %v3937_v1 }
 0x414   : > { %v3999_v39 = vpop.f32.mrf.mxu2 }
 0x415   : > { %v3910_v15 = vpop.f32.mrf.mxu3  ;;  %v4000_v58 = vadd.f32 %v3999_v39, %v3967_v35 }
 0x416   : > { %v3911_v24 = vadd.f32 %v3910_v15, %v3875_v26 }
 0x417   : > { %v4108_v56 = vpop.f32.mrf.mxu1 }
 0x418   : > { %v3942_v50 = vadd.f32 %v3941_v60, %v3911_v24  ;;  %v3841_v60 = vadd.f32 %v6965_v17, %v3814_v61 }
 0x419   : > { %v4073_v63 = vpop.f32.mrf.mxu0 }
 0x41a   : > { %v4109_v16 = vadd.f32 %v4108_v56, %v4073_v63  ;;  %v3973_v59 = vadd.f32 %v3972_v18, %v3942_v50  ;;  %v4253_v18 = vld [vmem:[%s6098_s10] sm:$0xff]  ;;  %v4238_v63 = vld [vmem:[%s6048_s6 + $0x8] sm:$0xff] }
 0x41b   : > { %v4240_v56 = vld [vmem:[%s6056_s11 + $0x8] sm:$0xff] }
 0x41c   : > { %v4003_v32 = vpop.f32.mrf.mxu2 }
 0x41d   : > { %v4026_v7 = vpop.f32.mrf.mxu3  ;;  %v4004_v19 = vadd.f32 %v4003_v32, %v3973_v59 }
 0x41e   : > { %v4027_v62 = vadd.f32 %v4026_v7, %v4000_v58 }
 0x41f   : > { %v4224_v8 = vpop.f32.mrf.mxu1 }
 0x420   : > { %v4231_v41 = vadd.f32 %v4027_v62, %v3837_v40 }
 0x421   : > { %v4197_v9 = vpop.f32.mrf.mxu0 }
 0x422   : > { %v4243_v42 = vmul.f32 %v4237_v28, %v4231_v41  ;;  %v4257_v22 = vmul.f32 %v4239_v27, %v4231_v41 }
 0x424   : > { %v4134_v53 = vpop.f32.mrf.mxu2 }
 0x425   : > { %v4030_v0 = vpop.f32.mrf.mxu3  ;;  %v4135_v34 = vadd.f32 %v4134_v53, %v4105_v43  ;;  %v4254_v53 = vld [vmem:[%s6098_s10 + $0x8] sm:$0xff] }
 0x426   : > { %v4031_v12 = vadd.f32 %v4030_v0, %v4004_v19  ;;  %v4242_v0 = vld [vmem:[%s6093_s14 + $0x8] sm:$0xff] }
 0x427   : > { %v4228_v57 = vpop.f32.mrf.mxu1 }
 0x428   : > { %v4232_v10 = vadd.f32 %v4031_v12, %v3841_v60 }
 0x429   : > { %v4201_v30 = vpop.f32.mrf.mxu0 }
 0x42a   : > { %v4244_v17 = vmul.f32 %v4238_v63, %v4232_v10  ;;  %v4258_v52 = vmul.f32 %v4240_v56, %v4232_v10 }
 0x42c   : > { %v4139_v51 = vpop.f32.mrf.mxu2 }
 0x42d   : > { %v4164_v36 = vpop.f32.mrf.mxu3  ;;  %v4140_v45 = vadd.f32 %v4139_v51, %v4109_v16 }
 0x42e   : > { %v4165_v6 = vadd.f32 %v4164_v36, %v4135_v34 }
 0x42f   : > { %v6976_v44 = vpop.f32.mrf.mxu1 }
 0x430   : > { %v4198_v2 = vadd.f32 %v4197_v9, %v4165_v6 }
 0x431   : > { %v6972_v4 = vpop.f32.mrf.mxu0 }
 0x432   : > { %v4225_v48 = vadd.f32 %v4224_v8, %v4198_v2 }
 0x434   : > { %v4233_v55 = vsub.f32 %v4225_v48, %v3837_v40  ;;  %v6974_v33 = vpop.f32.mrf.mxu2 }
 0x435   : > { %v4170_v20 = vpop.f32.mrf.mxu3 }
 0x436   : > { %v4235_v47 = vadd.f32 %v4233_v55, %v4027_v62  ;;  %v4171_v13 = vadd.f32 %v4170_v20, %v4140_v45 }
 0x437   : > { %v4398_v46 = vpop.f32.mrf.mxu1 }
 0x438   : > { %v4245_v3 = vmul.f32 %v4239_v27, %v4235_v47  ;;  %v4255_v5 = vmul.f32 %v4237_v28, %v4235_v47  ;;  %v4202_v38 = vadd.f32 %v4201_v30, %v4171_v13 }
 0x439   : > { %v4367_v9 = vpop.f32.mrf.mxu0 }
 0x43a   : > { %v4247_v29 = vadd.f32 %v4245_v3, %v4243_v42  ;;  %v4259_v21 = vsub.f32 %v4255_v5, %v4257_v22  ;;  %v4229_v26 = vadd.f32 %v4228_v57, %v4202_v38 }
 0x43c   : > { %v4249_v11 = vadd.f32 %v4247_v29, %v4241_v23  ;;  %v4261_v15 = vadd.f32 %v4259_v21, %v4253_v18  ;;  %v4234_v39 = vsub.f32 %v4229_v26, %v3841_v60  ;;  %v4301_v32 = vpop.f32.mrf.mxu2 }
 0x43d   : > { %v4332_v7 = vpop.f32.mrf.mxu3 }
 0x43e   : > { %4251 = vst.msk [vmem:[%s6093_s14] sm:$0xff] %vm806_vm1, %v4249_v11  ;;  %v4236_v37 = vadd.f32 %v4234_v39, %v4031_v12  ;;  %v4333_v55 = vadd.f32 %v4332_v7, %v6974_v33 }
 0x43f   : > { %4263 = vst.msk [vmem:[%s6098_s10] sm:$0xff] %vm806_vm1, %v4261_v15  ;;  %v4522_v31 = vpop.f32.mrf.mxu1 }
 0x440   : > { %v4246_v8 = vmul.f32 %v4240_v56, %v4236_v37  ;;  %v4256_v54 = vmul.f32 %v4238_v63, %v4236_v37  ;;  %v4363_v47 = vadd.f32 %v6972_v4, %v4333_v55 }
 0x441   : > { %v4483_v34 = vpop.f32.mrf.mxu0 }
 0x442   : > { %v4248_v1 = vadd.f32 %v4246_v8, %v4244_v17  ;;  %v4260_v43 = vsub.f32 %v4256_v54, %v4258_v52  ;;  %v4523_v59 = vadd.f32 %v4522_v31, %v4483_v34  ;;  %v4393_v38 = vadd.f32 %v6976_v44, %v4363_v47  ;;  %v5172_v17 = vld [vmem:[%s6048_s6 + $0x10] sm:$0xff] }
 0x443   : > { %v5174_v44 = vld [vmem:[%s6056_s11 + $0x10] sm:$0xff] }
 0x444   : > { %v4250_v49 = vadd.f32 %v4248_v1, %v4242_v0  ;;  %v4262_v30 = vadd.f32 %v4260_v43, %v4254_v53  ;;  %v4425_v24 = vpop.f32.mrf.mxu2 }
 0x445   : > { %v4336_v35 = vpop.f32.mrf.mxu3  ;;  %v4426_v29 = vadd.f32 %v4425_v24, %v4393_v38 }
 0x446   : > { %4252 = vst.msk [vmem:[%s6093_s14 + $0x8] sm:$0xff] %vm806_vm1, %v4250_v49  ;;  %v4337_v23 = vadd.f32 %v4336_v35, %v4301_v32 }
 0x447   : > { %4264 = vst.msk [vmem:[%s6098_s10 + $0x8] sm:$0xff] %vm806_vm1, %v4262_v30  ;;  %v4526_v57 = vpop.f32.mrf.mxu1 }
 0x448   : > { %v4368_v4 = vadd.f32 %v4367_v9, %v4337_v23 }
 0x449   : > { %v4491_v51 = vpop.f32.mrf.mxu0 }
 0x44a   : > { %v4527_v22 = vadd.f32 %v4526_v57, %v4491_v51  ;;  %v4399_v8 = vadd.f32 %v4398_v46, %v4368_v4  ;;  %v4863_v57 = vld [vmem:[%s6098_s10] sm:$0xff] }
 0x44c   : > { %v4429_v36 = vpop.f32.mrf.mxu2 }
 0x44d   : > { %v4452_v58 = vpop.f32.mrf.mxu3  ;;  %v4430_v1 = vadd.f32 %v4429_v36, %v4399_v8  ;;  %v4852_v55 = vld [vmem:[%s6093_s14 + $0x8] sm:$0xff] }
 0x44e   : > { %v4453_v15 = vadd.f32 %v4452_v58, %v4426_v29 }
 0x450   : > { %v4642_v2 = vpop.f32.mrf.mxu1 }
 0x451   : > { %v4615_v62 = vpop.f32.mrf.mxu0 }
 0x454   : > { %v4552_v6 = vpop.f32.mrf.mxu2 }
 0x455   : > { %v4456_v25 = vpop.f32.mrf.mxu3  ;;  %v4553_v45 = vadd.f32 %v4552_v6, %v4523_v59  ;;  %v4851_v6 = vld [vmem:[%s6093_s14] sm:$0xff] }
 0x456   : > { %v4457_v31 = vadd.f32 %v4456_v25, %v4430_v1 }
 0x458   : > { %v4646_v41 = vpop.f32.mrf.mxu1 }
 0x459   : > { %v4619_v48 = vpop.f32.mrf.mxu0 }
 0x45c   : > { %v4557_v16 = vpop.f32.mrf.mxu2 }
 0x45d   : > { %v4582_v50 = vpop.f32.mrf.mxu3  ;;  %v4558_v18 = vadd.f32 %v4557_v16, %v4527_v22 }
 0x45e   : > { %v4583_v19 = vadd.f32 %v4582_v50, %v4553_v45  ;;  %v4864_v45 = vld [vmem:[%s6098_s10 + $0x8] sm:$0xff] }
 0x460   : > { %v4774_v42 = vpop.f32.mrf.mxu1  ;;  %v4616_v3 = vadd.f32 %v4615_v62, %v4583_v19 }
 0x461   : > { %v4744_v20 = vpop.f32.mrf.mxu0 }
 0x462   : > { %v4643_v21 = vadd.f32 %v4642_v2, %v4616_v3  ;;  %v5173_v2 = vld [vmem:[%s6048_s6 + $0x18] sm:$0xff] }
 0x464   : > { %v4675_v14 = vpop.f32.mrf.mxu2  ;;  %v4841_v7 = vadd.f32 %v4643_v21, %v4453_v15 }
 0x465   : > { %v4588_v40 = vpop.f32.mrf.mxu3 }
 0x466   : > { %v4589_v10 = vadd.f32 %v4588_v40, %v4558_v18  ;;  %v4853_v43 = vmul.f32 %v5172_v17, %v4841_v7  ;;  %v4867_v49 = vmul.f32 %v5174_v44, %v4841_v7  ;;  %v5175_v40 = vld [vmem:[%s6056_s11 + $0x18] sm:$0xff] }
 0x468   : > { %v4780_v37 = vpop.f32.mrf.mxu1  ;;  %v4620_v32 = vadd.f32 %v4619_v48, %v4589_v10 }
 0x469   : > { %v4749_v26 = vpop.f32.mrf.mxu0 }
 0x46a   : > { %v4647_v9 = vadd.f32 %v4646_v41, %v4620_v32 }
 0x46c   : > { %v4683_v27 = vpop.f32.mrf.mxu2  ;;  %v4842_v62 = vadd.f32 %v4647_v9, %v4457_v31 }
 0x46d   : > { %v4714_v28 = vpop.f32.mrf.mxu3 }
 0x46e   : > { %v4715_v61 = vadd.f32 %v4714_v28, %v4675_v14  ;;  %v4854_v25 = vmul.f32 %v5173_v2, %v4842_v62  ;;  %v4868_v48 = vmul.f32 %v5175_v40, %v4842_v62 }
 0x470   : > { %v4745_v12 = vadd.f32 %v4744_v20, %v4715_v61 }
 0x472   : > { %v4775_v33 = vadd.f32 %v4774_v42, %v4745_v12 }
 0x474   : > { %v4807_v5 = vpop.f32.mrf.mxu2 }
 0x475   : > { %v4718_v13 = vpop.f32.mrf.mxu3  ;;  %v4808_v11 = vadd.f32 %v4807_v5, %v4775_v33 }
 0x476   : > { %v4719_v60 = vadd.f32 %v4718_v13, %v4683_v27 }
 0x478   : > { %v4750_v56 = vadd.f32 %v4749_v26, %v4719_v60 }
 0x47a   : > { %v4781_v53 = vadd.f32 %v4780_v37, %v4750_v56 }
 0x47c   : > { %v4811_v54 = vpop.f32.mrf.mxu2 }
 0x47d   : > { %v4834_v39 = vpop.f32.mrf.mxu3  ;;  %v4812_v24 = vadd.f32 %v4811_v54, %v4781_v53 }
 0x47e   : > { %v4835_v63 = vadd.f32 %v4834_v39, %v4808_v11 }
 0x480   : > { %v4843_v52 = vsub.f32 %v4835_v63, %v4453_v15 }
 0x482   : > { %v4845_v0 = vadd.f32 %v4843_v52, %v4643_v21 }
 0x484   : > { %v4855_v30 = vmul.f32 %v5174_v44, %v4845_v0  ;;  %v4865_v35 = vmul.f32 %v5172_v17, %v4845_v0 }
 0x485   : > { %v4838_v34 = vpop.f32.mrf.mxu3 }
 0x486   : > { %v4857_v58 = vadd.f32 %v4855_v30, %v4853_v43  ;;  %v4869_v46 = vsub.f32 %v4865_v35, %v4867_v49  ;;  %v4839_v51 = vadd.f32 %v4838_v34, %v4812_v24 }
 0x488   : > { %v4859_v36 = vadd.f32 %v4857_v58, %v4851_v6  ;;  %v4871_v50 = vadd.f32 %v4869_v46, %v4863_v57  ;;  %v4844_v16 = vsub.f32 %v4839_v51, %v4457_v31 }
 0x48a   : > { %4861 = vst.msk [vmem:[%s6093_s14] sm:$0xff] %vm806_vm1, %v4859_v36  ;;  %v4846_v14 = vadd.f32 %v4844_v16, %v4647_v9 }
 0x48b   : > { %4873 = vst.msk [vmem:[%s6098_s10] sm:$0xff] %vm806_vm1, %v4871_v50 }
 0x48c   : > { %v4856_v41 = vmul.f32 %v5175_v40, %v4846_v14  ;;  %v4866_v59 = vmul.f32 %v5173_v2, %v4846_v14 }
 0x48e   : > { %v4858_v28 = vadd.f32 %v4856_v41, %v4854_v25  ;;  %v4870_v27 = vsub.f32 %v4866_v59, %v4868_v48 }
 0x490   : > { %v4860_v20 = vadd.f32 %v4858_v28, %v4852_v55  ;;  %v4872_v61 = vadd.f32 %v4870_v27, %v4864_v45 }
 0x492   : > { %4862 = vst.msk [vmem:[%s6093_s14 + $0x8] sm:$0xff] %vm806_vm1, %v4860_v20 }
 0x493   : > { %4874 = vst.msk [vmem:[%s6098_s10 + $0x8] sm:$0xff] %vm806_vm1, %v4872_v61 }
 0x494 PF: > { %s35_s20 = sadd.s32 1, %s5773_s20   ;;  %s7136_s29 = smov %s5749_s30 }
 0x495   : > { %p32_p4 = scmp.ge.s32.totalorder %s35_s20, 6   ;;  %s7137_s30 = smov %s5753_s15 }
 0x496   : > { %s7138_s15 = smov %s6026_s27  ;;  %s7139_s16 = smov %s5765_s18 }
 0x497   : > { %s7140_s17 = smov %s5769_s19  ;;  %s7141_s18 = smov %s7144_s1 }
 0x498   : > { %s7142_s19 = smov %s7148_s26  ;;  %34 = sbr.rel (!%p32_p4) target bundleno = 24 (0x18), region = 185 }
 0x49d   :  { %4912 = vsyncpa [#allocation5], 1 }
 0x49e   :  { %4914 = vsyncpa [#allocation5 + $0x1], 1 }
 0x49f   :  { %4915 = vsyncpa [#allocation7], 1 }
 0x4a0   :  { %4917 = vsyncpa [#allocation7 + $0x1], 1 }
 0x4a1   :  { %4918 = vsyncpa [#allocation10], 1 }
 0x4a2   :  { %4919 = vsyncpa [#allocation13], 1 }
 0x4a3   :  { %4920 = vsyncpa [#allocation16], 1 }
 0x4a4   :  { %4921 = vsyncpa [#allocation19], 1 }

</bundles_post_ra>
